<compile_context>
chip_gen: v6e
topology: v6e:2x2x1
jax: 0.10.0
libtpu: 0.0.40
codegen_flags: <defaults>
</compile_context>

<pallas_src>
import math
import jax
import jax.numpy as jnp
from jax.experimental import pallas as pl
from jax.experimental.pallas import tpu as pltpu

# ---- hyperparameters (mirroring the PyTorch script, with small batch/seq) ----
NUM_HEADS = 2
NUM_HIDDENS = 256
FFN_NUM_HIDDENS = 512
NUM_BLKS = 2
MAX_LEN = 90
VOCAB_SIZE = 100
BATCH = 2
SEQ = 8
LN_EPS = 1e-5  # PyTorch nn.LayerNorm default


def bert_encoder_kernel(
    valid_lens_ref,                 # scalar-prefetch: (B,) int32 in SMEM
    x_ref,                          # (B, T, D) f32
    wqkv_ref, bqkv_ref,             # (NB, D, 3D) bf16 / (NB, 1, 3D) f32
    wo_ref, bo_ref,                 # (NB, D, D)  bf16 / (NB, 1, D)  f32
    g1_ref, be1_ref,                # (NB, 1, D) f32  LayerNorm 1
    w1_ref, b1_ref,                 # (NB, D, F) bf16 / (NB, 1, F) f32
    w2_ref, b2_ref,                 # (NB, F, D) bf16 / (NB, 1, D) f32
    g2_ref, be2_ref,                # (NB, 1, D) f32  LayerNorm 2
    out_ref,                        # (B, T, D) f32
    attn_scratch,                   # VMEM (B*T, D) f32
):
    B, T, D = x_ref.shape
    H = NUM_HEADS
    Dh = D // H
    BT = B * T

    x = x_ref[...].reshape(BT, D)                    # (B*T, D) f32

    # Valid-length masks (same across blocks / heads) — build once, reuse.
    col = jax.lax.broadcasted_iota(jnp.int32, (T, T), 1)
    masks = [col < valid_lens_ref[b] for b in range(B)]

    def layernorm(z, g, beta):
        mu = jnp.mean(z, axis=-1, keepdims=True)
        var = jnp.mean((z - mu) * (z - mu), axis=-1, keepdims=True)
        return (z - mu) * jax.lax.rsqrt(var + LN_EPS) * g + beta

    for blk in range(NUM_BLKS):                      # static unroll over blocks
        # --- fused QKV projection (one MXU matmul, bf16 in / f32 acc).
        # 1/sqrt(Dh) is pre-folded into the Q columns of wqkv / bqkv.
        qkv = jnp.dot(x.astype(jnp.bfloat16), wqkv_ref[blk],
                      preferred_element_type=jnp.float32) + bqkv_ref[blk]
        q = qkv[:, 0:D]                              # f32, 128-lane aligned slices
        k = qkv[:, D:2 * D]
        v = qkv[:, 2 * D:3 * D]

        # --- masked multi-head attention; per-head output written straight into
        # its 128-lane-aligned slice of the VMEM scratch (no concatenate copy).
        for b in range(B):                           # B=2, static
            r0 = b * T
            for h in range(H):                       # H=2, static
                c0 = h * Dh
                qh = q[r0:r0 + T, c0:c0 + Dh]        # (T, Dh) f32
                kh = k[r0:r0 + T, c0:c0 + Dh]
                vh = v[r0:r0 + T, c0:c0 + Dh]
                # scores = qh @ kh.T (scale already folded into wq)
                s = jax.lax.dot_general(qh, kh, (((1,), (1,)), ((), ())),
                                        preferred_element_type=jnp.float32)
                # masked softmax (masked positions -> -1e6, like d2l masked_softmax)
                s = jnp.where(masks[b], s, -1000000.0)
                s = s - jnp.max(s, axis=-1, keepdims=True)
                e = jnp.exp(s)
                inv = pl.reciprocal(jnp.sum(e, axis=-1, keepdims=True),
                                    approx=True)
                p = e * inv
                attn_scratch[r0:r0 + T, c0:c0 + Dh] = jnp.dot(
                    p, vh, preferred_element_type=jnp.float32)

        attn_out = jnp.dot(attn_scratch[...].astype(jnp.bfloat16), wo_ref[blk],
                           preferred_element_type=jnp.float32) + bo_ref[blk]

        # --- AddNorm 1 (f32; dropout == identity in eval) ---
        y = layernorm(attn_out + x, g1_ref[blk], be1_ref[blk])

        # --- position-wise FFN (bf16 matmuls, f32 elementwise) ---
        h1 = jnp.dot(y.astype(jnp.bfloat16), w1_ref[blk],
                     preferred_element_type=jnp.float32) + b1_ref[blk]
        h1 = jnp.maximum(h1, 0.0)
        h2 = jnp.dot(h1.astype(jnp.bfloat16), w2_ref[blk],
                     preferred_element_type=jnp.float32) + b2_ref[blk]

        # --- AddNorm 2 ---
        x = layernorm(h2 + y, g2_ref[blk], be2_ref[blk])

    out_ref[...] = x.reshape(B, T, D)


def bert_encoder_pallas(x, valid_lens, packed_params):
    """All NUM_BLKS encoder blocks in one pallas_call. x: (B, T, D) f32."""
    B, T, D = x.shape

    def full_spec(shape):
        nd = len(shape)
        return pl.BlockSpec(shape, lambda i, vl, _nd=nd: (0,) * _nd)

    grid_spec = pltpu.PrefetchScalarGridSpec(
        num_scalar_prefetch=1,
        grid=(1,),                                   # single grid step (no batch grid)
        in_specs=[full_spec(x.shape)] + [full_spec(p.shape) for p in packed_params],
        out_specs=full_spec((B, T, D)),
        scratch_shapes=[pltpu.VMEM((B * T, D), jnp.float32)],
    )

    # Advisory cost estimate for the XLA scheduler.
    F = FFN_NUM_HIDDENS
    H, Dh = NUM_HEADS, D // NUM_HEADS
    BT = B * T
    flops_blk = (2 * BT * D * 3 * D                      # fused QKV projection
                 + 2 * B * H * (2 * T * T * Dh)          # scores + P @ V
                 + 2 * BT * D * D                        # output projection
                 + 2 * BT * D * F + 2 * BT * F * D)      # FFN
    trans_blk = B * H * T * T + 4 * BT                   # exp + rsqrt / reciprocal
    bytes_acc = int(sum(p.size * p.dtype.itemsize for p in packed_params)
                    + 2 * x.size * 4)
    cost = pl.CostEstimate(flops=NUM_BLKS * flops_blk,
                           transcendentals=NUM_BLKS * trans_blk,
                           bytes_accessed=bytes_acc)

    return pl.pallas_call(
        bert_encoder_kernel,
        out_shape=jax.ShapeDtypeStruct((B, T, D), jnp.float32),
        grid_spec=grid_spec,
        compiler_params=pltpu.CompilerParams(dimension_semantics=("arbitrary",)),
        cost_estimate=cost,
    )(valid_lens, x, *packed_params)


def init_block_params(key):
    """Deterministic synthetic params for one encoder block (f32)."""
    D, F = NUM_HIDDENS, FFN_NUM_HIDDENS
    ks = jax.random.split(key, 8)
    scale = 0.02

    def w(k, shape):
        return (scale * jax.random.normal(k, shape)).astype(jnp.float32)

    wq, wk, wv, wo = (w(ks[0], (D, D)), w(ks[1], (D, D)),
                      w(ks[2], (D, D)), w(ks[3], (D, D)))
    bq = w(ks[4], (1, D)); bk = w(ks[5], (1, D))
    bv = w(ks[6], (1, D)); bo = w(ks[7], (1, D))
    ks2 = jax.random.split(ks[7], 4)
    w1 = w(ks2[0], (D, F)); b1 = w(ks2[1], (1, F))
    w2 = w(ks2[2], (F, D)); b2 = w(ks2[3], (1, D))
    g1 = jnp.ones((1, D), jnp.float32); be1 = jnp.zeros((1, D), jnp.float32)
    g2 = jnp.ones((1, D), jnp.float32); be2 = jnp.zeros((1, D), jnp.float32)
    return dict(wq=wq, bq=bq, wk=wk, bk=bk, wv=wv, bv=bv, wo=wo, bo=bo,
                g1=g1, be1=be1, w1=w1, b1=b1, w2=w2, b2=b2, g2=g2, be2=be2)


def pack_block_params(block_params):
    """Stack per-block params along a leading NUM_BLKS axis, fuse Q/K/V into one
    (D, 3D) weight, fold the 1/sqrt(Dh) attention scale into the Q columns, and
    cast matmul weights to bf16 (f32 accumulation happens in-kernel)."""
    Dh = NUM_HIDDENS // NUM_HEADS
    att_scale = 1.0 / math.sqrt(Dh)
    cols = {n: [] for n in ("wqkv", "bqkv", "wo", "bo", "g1", "be1",
                            "w1", "b1", "w2", "b2", "g2", "be2")}
    for p in block_params:
        cols["wqkv"].append(jnp.concatenate(
            [p["wq"] * att_scale, p["wk"], p["wv"]], axis=1))
        cols["bqkv"].append(jnp.concatenate(
            [p["bq"] * att_scale, p["bk"], p["bv"]], axis=1))
        for n in ("wo", "bo", "g1", "be1", "w1", "b1", "w2", "b2", "g2", "be2"):
            cols[n].append(p[n])

    def stack(name, dtype):
        return jnp.stack(cols[name], axis=0).astype(dtype)

    return [
        stack("wqkv", jnp.bfloat16), stack("bqkv", jnp.float32),
        stack("wo", jnp.bfloat16),   stack("bo", jnp.float32),
        stack("g1", jnp.float32),    stack("be1", jnp.float32),
        stack("w1", jnp.bfloat16),   stack("b1", jnp.float32),
        stack("w2", jnp.bfloat16),   stack("b2", jnp.float32),
        stack("g2", jnp.float32),    stack("be2", jnp.float32),
    ]


def bert_encoder_forward(tokens, segments, valid_lens, embeds, packed_params):
    tok_emb, seg_emb, pos_emb = embeds
    # Embedding lookups + positional embedding (plain-JAX glue: pure gathers).
    X = tok_emb[tokens] + seg_emb[segments] + pos_emb[:, :tokens.shape[1], :]
    # Both encoder blocks run inside a single fused Pallas kernel.
    return bert_encoder_pallas(X, valid_lens, packed_params)


if __name__ == "__main__":
    key = jax.random.PRNGKey(0)
    k_tok, k_seg, k_temb, k_semb, k_pemb, k_blk = jax.random.split(key, 6)

    tokens = jax.random.randint(k_tok, (BATCH, SEQ), 0, VOCAB_SIZE)
    segments = jax.random.randint(k_seg, (BATCH, SEQ), 0, 2)
    valid_lens = jnp.array([SEQ, 5], dtype=jnp.int32)

    tok_emb = (0.02 * jax.random.normal(k_temb, (VOCAB_SIZE, NUM_HIDDENS))).astype(jnp.float32)
    seg_emb = (0.02 * jax.random.normal(k_semb, (2, NUM_HIDDENS))).astype(jnp.float32)
    pos_emb = jax.random.normal(k_pemb, (1, MAX_LEN, NUM_HIDDENS)).astype(jnp.float32)

    block_keys = jax.random.split(k_blk, NUM_BLKS)
    packed = pack_block_params([init_block_params(bk) for bk in block_keys])

    out = bert_encoder_forward(tokens, segments, valid_lens,
                               (tok_emb, seg_emb, pos_emb), packed)
    out = jax.block_until_ready(out)
    assert out.shape == (BATCH, SEQ, NUM_HIDDENS)
    assert jnp.isfinite(out).all()
    print("KERNEL_OK")
</pallas_src>

<mosaic_0001>
module attributes {stable_mosaic.version = 11 : i64} {
  func.func @bert_encoder_kernel(%arg0: i32, %arg1: memref<2xi32, #tpu.memory_space<smem>>, %arg2: memref<2x8x256xf32, #tpu.memory_space<vmem>>, %arg3: memref<2x256x768xbf16, #tpu.memory_space<vmem>>, %arg4: memref<2x1x768xf32, #tpu.memory_space<vmem>>, %arg5: memref<2x256x256xbf16, #tpu.memory_space<vmem>>, %arg6: memref<2x1x256xf32, #tpu.memory_space<vmem>>, %arg7: memref<2x1x256xf32, #tpu.memory_space<vmem>>, %arg8: memref<2x1x256xf32, #tpu.memory_space<vmem>>, %arg9: memref<2x256x512xbf16, #tpu.memory_space<vmem>>, %arg10: memref<2x1x512xf32, #tpu.memory_space<vmem>>, %arg11: memref<2x512x256xbf16, #tpu.memory_space<vmem>>, %arg12: memref<2x1x256xf32, #tpu.memory_space<vmem>>, %arg13: memref<2x1x256xf32, #tpu.memory_space<vmem>>, %arg14: memref<2x1x256xf32, #tpu.memory_space<vmem>>, %arg15: memref<2x8x256xf32, #tpu.memory_space<vmem>>, %arg16: memref<16x256xf32, #tpu.memory_space<vmem>>) attributes {dimension_semantics = [#tpu.dimension_semantics<arbitrary>], iteration_bounds = array<i64: 1>, scalar_prefetch = 1 : i64, scratch_operands = 1 : i64, tpu.core_type = #tpu.core_type<tc>, window_params = [{pipeline_mode = #tpu.pipeline_mode<synchronous>, transform_indices = @transform_0, window_bounds = array<i64: 2, 8, 256>}, {pipeline_mode = #tpu.pipeline_mode<synchronous>, transform_indices = @transform_1, window_bounds = array<i64: 2, 256, 768>}, {pipeline_mode = #tpu.pipeline_mode<synchronous>, transform_indices = @transform_2, window_bounds = array<i64: 2, 1, 768>}, {pipeline_mode = #tpu.pipeline_mode<synchronous>, transform_indices = @transform_3, window_bounds = array<i64: 2, 256, 256>}, {pipeline_mode = #tpu.pipeline_mode<synchronous>, transform_indices = @transform_4, window_bounds = array<i64: 2, 1, 256>}, {pipeline_mode = #tpu.pipeline_mode<synchronous>, transform_indices = @transform_5, window_bounds = array<i64: 2, 1, 256>}, {pipeline_mode = #tpu.pipeline_mode<synchronous>, transform_indices = @transform_6, window_bounds = array<i64: 2, 1, 256>}, {pipeline_mode = #tpu.pipeline_mode<synchronous>, transform_indices = @transform_7, window_bounds = array<i64: 2, 256, 512>}, {pipeline_mode = #tpu.pipeline_mode<synchronous>, transform_indices = @transform_8, window_bounds = array<i64: 2, 1, 512>}, {pipeline_mode = #tpu.pipeline_mode<synchronous>, transform_indices = @transform_9, window_bounds = array<i64: 2, 512, 256>}, {pipeline_mode = #tpu.pipeline_mode<synchronous>, transform_indices = @transform_10, window_bounds = array<i64: 2, 1, 256>}, {pipeline_mode = #tpu.pipeline_mode<synchronous>, transform_indices = @transform_11, window_bounds = array<i64: 2, 1, 256>}, {pipeline_mode = #tpu.pipeline_mode<synchronous>, transform_indices = @transform_12, window_bounds = array<i64: 2, 1, 256>}, {pipeline_mode = #tpu.pipeline_mode<synchronous>, transform_indices = @transform_13, window_bounds = array<i64: 2, 8, 256>}]} {
    %c0 = arith.constant 0 : index
    %c0_0 = arith.constant 0 : index
    %c0_1 = arith.constant 0 : index
    %0 = vector.load %arg2[%c0, %c0_0, %c0_1] : memref<2x8x256xf32, #tpu.memory_space<vmem>>, vector<2x8x256xf32>
    %1 = vector.shape_cast %0 : vector<2x8x256xf32> to vector<16x256xf32>
    %2 = tpu.iota {dimensions = array<i32: 1>} : vector<8x8xi32>
    %c0_2 = arith.constant 0 : index
    %3 = memref.load %arg1[%c0_2] : memref<2xi32, #tpu.memory_space<smem>>
    %4 = vector.broadcast %3 : i32 to vector<8x8xi32>
    %5 = arith.cmpi slt, %2, %4 : vector<8x8xi32>
    %c1 = arith.constant 1 : index
    %6 = memref.load %arg1[%c1] : memref<2xi32, #tpu.memory_space<smem>>
    %7 = vector.broadcast %6 : i32 to vector<8x8xi32>
    %8 = arith.cmpi slt, %2, %7 : vector<8x8xi32>
    %9 = arith.truncf %1 : vector<16x256xf32> to vector<16x256xbf16>
    %c0_3 = arith.constant 0 : index
    %c0_4 = arith.constant 0 : index
    %c0_5 = arith.constant 0 : index
    %10 = vector.load %arg3[%c0_3, %c0_4, %c0_5] : memref<2x256x768xbf16, #tpu.memory_space<vmem>>, vector<1x256x768xbf16>
    %11 = vector.shape_cast %10 : vector<1x256x768xbf16> to vector<256x768xbf16>
    %cst = arith.constant dense<0.000000e+00> : vector<16x768xf32>
    %12 = tpu.matmul %9, %11, %cst {dimension_numbers = #tpu.dot_dimension_numbers<[1], [0], [0], [1], [0, 0, 1, 1], [], []>} : vector<16x256xbf16>, vector<256x768xbf16>, vector<16x768xf32> -> vector<16x768xf32>
    %c0_6 = arith.constant 0 : index
    %c0_7 = arith.constant 0 : index
    %c0_8 = arith.constant 0 : index
    %13 = vector.load %arg4[%c0_6, %c0_7, %c0_8] : memref<2x1x768xf32, #tpu.memory_space<vmem>>, vector<1x1x768xf32>
    %14 = vector.shape_cast %13 : vector<1x1x768xf32> to vector<1x768xf32>
    %15 = vector.broadcast %14 : vector<1x768xf32> to vector<16x768xf32>
    %16 = arith.addf %12, %15 : vector<16x768xf32>
    %17 = vector.extract_strided_slice %16 {offsets = [0, 0], sizes = [16, 256], strides = [1, 1]} : vector<16x768xf32> to vector<16x256xf32>
    %18 = vector.extract_strided_slice %16 {offsets = [0, 256], sizes = [16, 256], strides = [1, 1]} : vector<16x768xf32> to vector<16x256xf32>
    %19 = vector.extract_strided_slice %16 {offsets = [0, 512], sizes = [16, 256], strides = [1, 1]} : vector<16x768xf32> to vector<16x256xf32>
    %20 = vector.extract_strided_slice %17 {offsets = [0, 0], sizes = [8, 128], strides = [1, 1]} : vector<16x256xf32> to vector<8x128xf32>
    %21 = vector.extract_strided_slice %18 {offsets = [0, 0], sizes = [8, 128], strides = [1, 1]} : vector<16x256xf32> to vector<8x128xf32>
    %22 = vector.extract_strided_slice %19 {offsets = [0, 0], sizes = [8, 128], strides = [1, 1]} : vector<16x256xf32> to vector<8x128xf32>
    %cst_9 = arith.constant dense<0.000000e+00> : vector<8x8xf32>
    %23 = tpu.matmul %20, %21, %cst_9 {dimension_numbers = #tpu.dot_dimension_numbers<[1], [1], [0], [0], [0, 0, 1, 0], [], []>} : vector<8x128xf32>, vector<8x128xf32>, vector<8x8xf32> -> vector<8x8xf32>
    %cst_10 = arith.constant -1.000000e+06 : f32
    %24 = vector.broadcast %cst_10 : f32 to vector<8x8xf32>
    %25 = arith.select %5, %23, %24 : vector<8x8xi1>, vector<8x8xf32>
    %cst_11 = arith.constant dense<0xFF800000> : vector<8xf32>
    %26 = vector.multi_reduction <maximumf>, %25, %cst_11 [1] : vector<8x8xf32> to vector<8xf32>
    %27 = vector.shape_cast %26 : vector<8xf32> to vector<8x1xf32>
    %28 = vector.broadcast %27 : vector<8x1xf32> to vector<8x8xf32>
    %29 = arith.subf %25, %28 : vector<8x8xf32>
    %30 = math.exp %29 : vector<8x8xf32>
    %cst_12 = arith.constant dense<0.000000e+00> : vector<8xf32>
    %31 = vector.multi_reduction <add>, %30, %cst_12 [1] : vector<8x8xf32> to vector<8xf32>
    %32 = vector.shape_cast %31 : vector<8xf32> to vector<8x1xf32>
    %33 = tpu.reciprocal %32 {approx = true} : vector<8x1xf32> -> vector<8x1xf32>
    %34 = vector.broadcast %33 : vector<8x1xf32> to vector<8x8xf32>
    %35 = arith.mulf %30, %34 : vector<8x8xf32>
    %cst_13 = arith.constant dense<0.000000e+00> : vector<8x128xf32>
    %36 = tpu.matmul %35, %22, %cst_13 {dimension_numbers = #tpu.dot_dimension_numbers<[1], [0], [0], [1], [0, 0, 1, 1], [], []>} : vector<8x8xf32>, vector<8x128xf32>, vector<8x128xf32> -> vector<8x128xf32>
    %c0_14 = arith.constant 0 : index
    %c0_15 = arith.constant 0 : index
    %37 = vector.load %arg16[%c0_14, %c0_15] : memref<16x256xf32, #tpu.memory_space<vmem>>, vector<8x128xf32>
    tpu.vector_store %arg16[%c0_14, %c0_15], %36 {strides = array<i32>} : memref<16x256xf32, #tpu.memory_space<vmem>>, vector<8x128xf32>,
    %38 = vector.extract_strided_slice %17 {offsets = [0, 128], sizes = [8, 128], strides = [1, 1]} : vector<16x256xf32> to vector<8x128xf32>
    %39 = vector.extract_strided_slice %18 {offsets = [0, 128], sizes = [8, 128], strides = [1, 1]} : vector<16x256xf32> to vector<8x128xf32>
    %40 = vector.extract_strided_slice %19 {offsets = [0, 128], sizes = [8, 128], strides = [1, 1]} : vector<16x256xf32> to vector<8x128xf32>
    %cst_16 = arith.constant dense<0.000000e+00> : vector<8x8xf32>
    %41 = tpu.matmul %38, %39, %cst_16 {dimension_numbers = #tpu.dot_dimension_numbers<[1], [1], [0], [0], [0, 0, 1, 0], [], []>} : vector<8x128xf32>, vector<8x128xf32>, vector<8x8xf32> -> vector<8x8xf32>
    %cst_17 = arith.constant -1.000000e+06 : f32
    %42 = vector.broadcast %cst_17 : f32 to vector<8x8xf32>
    %43 = arith.select %5, %41, %42 : vector<8x8xi1>, vector<8x8xf32>
    %cst_18 = arith.constant dense<0xFF800000> : vector<8xf32>
    %44 = vector.multi_reduction <maximumf>, %43, %cst_18 [1] : vector<8x8xf32> to vector<8xf32>
    %45 = vector.shape_cast %44 : vector<8xf32> to vector<8x1xf32>
    %46 = vector.broadcast %45 : vector<8x1xf32> to vector<8x8xf32>
    %47 = arith.subf %43, %46 : vector<8x8xf32>
    %48 = math.exp %47 : vector<8x8xf32>
    %cst_19 = arith.constant dense<0.000000e+00> : vector<8xf32>
    %49 = vector.multi_reduction <add>, %48, %cst_19 [1] : vector<8x8xf32> to vector<8xf32>
    %50 = vector.shape_cast %49 : vector<8xf32> to vector<8x1xf32>
    %51 = tpu.reciprocal %50 {approx = true} : vector<8x1xf32> -> vector<8x1xf32>
    %52 = vector.broadcast %51 : vector<8x1xf32> to vector<8x8xf32>
    %53 = arith.mulf %48, %52 : vector<8x8xf32>
    %cst_20 = arith.constant dense<0.000000e+00> : vector<8x128xf32>
    %54 = tpu.matmul %53, %40, %cst_20 {dimension_numbers = #tpu.dot_dimension_numbers<[1], [0], [0], [1], [0, 0, 1, 1], [], []>} : vector<8x8xf32>, vector<8x128xf32>, vector<8x128xf32> -> vector<8x128xf32>
    %c0_21 = arith.constant 0 : index
    %c128 = arith.constant 128 : index
    %55 = vector.load %arg16[%c0_21, %c128] : memref<16x256xf32, #tpu.memory_space<vmem>>, vector<8x128xf32>
    tpu.vector_store %arg16[%c0_21, %c128], %54 {strides = array<i32>} : memref<16x256xf32, #tpu.memory_space<vmem>>, vector<8x128xf32>,
    %56 = vector.extract_strided_slice %17 {offsets = [8, 0], sizes = [8, 128], strides = [1, 1]} : vector<16x256xf32> to vector<8x128xf32>
    %57 = vector.extract_strided_slice %18 {offsets = [8, 0], sizes = [8, 128], strides = [1, 1]} : vector<16x256xf32> to vector<8x128xf32>
    %58 = vector.extract_strided_slice %19 {offsets = [8, 0], sizes = [8, 128], strides = [1, 1]} : vector<16x256xf32> to vector<8x128xf32>
    %cst_22 = arith.constant dense<0.000000e+00> : vector<8x8xf32>
    %59 = tpu.matmul %56, %57, %cst_22 {dimension_numbers = #tpu.dot_dimension_numbers<[1], [1], [0], [0], [0, 0, 1, 0], [], []>} : vector<8x128xf32>, vector<8x128xf32>, vector<8x8xf32> -> vector<8x8xf32>
    %cst_23 = arith.constant -1.000000e+06 : f32
    %60 = vector.broadcast %cst_23 : f32 to vector<8x8xf32>
    %61 = arith.select %8, %59, %60 : vector<8x8xi1>, vector<8x8xf32>
    %cst_24 = arith.constant dense<0xFF800000> : vector<8xf32>
    %62 = vector.multi_reduction <maximumf>, %61, %cst_24 [1] : vector<8x8xf32> to vector<8xf32>
    %63 = vector.shape_cast %62 : vector<8xf32> to vector<8x1xf32>
    %64 = vector.broadcast %63 : vector<8x1xf32> to vector<8x8xf32>
    %65 = arith.subf %61, %64 : vector<8x8xf32>
    %66 = math.exp %65 : vector<8x8xf32>
    %cst_25 = arith.constant dense<0.000000e+00> : vector<8xf32>
    %67 = vector.multi_reduction <add>, %66, %cst_25 [1] : vector<8x8xf32> to vector<8xf32>
    %68 = vector.shape_cast %67 : vector<8xf32> to vector<8x1xf32>
    %69 = tpu.reciprocal %68 {approx = true} : vector<8x1xf32> -> vector<8x1xf32>
    %70 = vector.broadcast %69 : vector<8x1xf32> to vector<8x8xf32>
    %71 = arith.mulf %66, %70 : vector<8x8xf32>
    %cst_26 = arith.constant dense<0.000000e+00> : vector<8x128xf32>
    %72 = tpu.matmul %71, %58, %cst_26 {dimension_numbers = #tpu.dot_dimension_numbers<[1], [0], [0], [1], [0, 0, 1, 1], [], []>} : vector<8x8xf32>, vector<8x128xf32>, vector<8x128xf32> -> vector<8x128xf32>
    %c8 = arith.constant 8 : index
    %c0_27 = arith.constant 0 : index
    %73 = vector.load %arg16[%c8, %c0_27] : memref<16x256xf32, #tpu.memory_space<vmem>>, vector<8x128xf32>
    tpu.vector_store %arg16[%c8, %c0_27], %72 {strides = array<i32>} : memref<16x256xf32, #tpu.memory_space<vmem>>, vector<8x128xf32>,
    %74 = vector.extract_strided_slice %17 {offsets = [8, 128], sizes = [8, 128], strides = [1, 1]} : vector<16x256xf32> to vector<8x128xf32>
    %75 = vector.extract_strided_slice %18 {offsets = [8, 128], sizes = [8, 128], strides = [1, 1]} : vector<16x256xf32> to vector<8x128xf32>
    %76 = vector.extract_strided_slice %19 {offsets = [8, 128], sizes = [8, 128], strides = [1, 1]} : vector<16x256xf32> to vector<8x128xf32>
    %cst_28 = arith.constant dense<0.000000e+00> : vector<8x8xf32>
    %77 = tpu.matmul %74, %75, %cst_28 {dimension_numbers = #tpu.dot_dimension_numbers<[1], [1], [0], [0], [0, 0, 1, 0], [], []>} : vector<8x128xf32>, vector<8x128xf32>, vector<8x8xf32> -> vector<8x8xf32>
    %cst_29 = arith.constant -1.000000e+06 : f32
    %78 = vector.broadcast %cst_29 : f32 to vector<8x8xf32>
    %79 = arith.select %8, %77, %78 : vector<8x8xi1>, vector<8x8xf32>
    %cst_30 = arith.constant dense<0xFF800000> : vector<8xf32>
    %80 = vector.multi_reduction <maximumf>, %79, %cst_30 [1] : vector<8x8xf32> to vector<8xf32>
    %81 = vector.shape_cast %80 : vector<8xf32> to vector<8x1xf32>
    %82 = vector.broadcast %81 : vector<8x1xf32> to vector<8x8xf32>
    %83 = arith.subf %79, %82 : vector<8x8xf32>
    %84 = math.exp %83 : vector<8x8xf32>
    %cst_31 = arith.constant dense<0.000000e+00> : vector<8xf32>
    %85 = vector.multi_reduction <add>, %84, %cst_31 [1] : vector<8x8xf32> to vector<8xf32>
    %86 = vector.shape_cast %85 : vector<8xf32> to vector<8x1xf32>
    %87 = tpu.reciprocal %86 {approx = true} : vector<8x1xf32> -> vector<8x1xf32>
    %88 = vector.broadcast %87 : vector<8x1xf32> to vector<8x8xf32>
    %89 = arith.mulf %84, %88 : vector<8x8xf32>
    %cst_32 = arith.constant dense<0.000000e+00> : vector<8x128xf32>
    %90 = tpu.matmul %89, %76, %cst_32 {dimension_numbers = #tpu.dot_dimension_numbers<[1], [0], [0], [1], [0, 0, 1, 1], [], []>} : vector<8x8xf32>, vector<8x128xf32>, vector<8x128xf32> -> vector<8x128xf32>
    %c8_33 = arith.constant 8 : index
    %c128_34 = arith.constant 128 : index
    %91 = vector.load %arg16[%c8_33, %c128_34] : memref<16x256xf32, #tpu.memory_space<vmem>>, vector<8x128xf32>
    tpu.vector_store %arg16[%c8_33, %c128_34], %90 {strides = array<i32>} : memref<16x256xf32, #tpu.memory_space<vmem>>, vector<8x128xf32>,
    %c0_35 = arith.constant 0 : index
    %c0_36 = arith.constant 0 : index
    %92 = vector.load %arg16[%c0_35, %c0_36] : memref<16x256xf32, #tpu.memory_space<vmem>>, vector<16x256xf32>
    %93 = arith.truncf %92 : vector<16x256xf32> to vector<16x256xbf16>
    %c0_37 = arith.constant 0 : index
    %c0_38 = arith.constant 0 : index
    %c0_39 = arith.constant 0 : index
    %94 = vector.load %arg5[%c0_37, %c0_38, %c0_39] : memref<2x256x256xbf16, #tpu.memory_space<vmem>>, vector<1x256x256xbf16>
    %95 = vector.shape_cast %94 : vector<1x256x256xbf16> to vector<256x256xbf16>
    %cst_40 = arith.constant dense<0.000000e+00> : vector<16x256xf32>
    %96 = tpu.matmul %93, %95, %cst_40 {dimension_numbers = #tpu.dot_dimension_numbers<[1], [0], [0], [1], [0, 0, 1, 1], [], []>} : vector<16x256xbf16>, vector<256x256xbf16>, vector<16x256xf32> -> vector<16x256xf32>
    %c0_41 = arith.constant 0 : index
    %c0_42 = arith.constant 0 : index
    %c0_43 = arith.constant 0 : index
    %97 = vector.load %arg6[%c0_41, %c0_42, %c0_43] : memref<2x1x256xf32, #tpu.memory_space<vmem>>, vector<1x1x256xf32>
    %98 = vector.shape_cast %97 : vector<1x1x256xf32> to vector<1x256xf32>
    %99 = vector.broadcast %98 : vector<1x256xf32> to vector<16x256xf32>
    %100 = arith.addf %96, %99 : vector<16x256xf32>
    %101 = arith.addf %100, %1 : vector<16x256xf32>
    %c0_44 = arith.constant 0 : index
    %c0_45 = arith.constant 0 : index
    %c0_46 = arith.constant 0 : index
    %102 = vector.load %arg7[%c0_44, %c0_45, %c0_46] : memref<2x1x256xf32, #tpu.memory_space<vmem>>, vector<1x1x256xf32>
    %103 = vector.shape_cast %102 : vector<1x1x256xf32> to vector<1x256xf32>
    %c0_47 = arith.constant 0 : index
    %c0_48 = arith.constant 0 : index
    %c0_49 = arith.constant 0 : index
    %104 = vector.load %arg8[%c0_47, %c0_48, %c0_49] : memref<2x1x256xf32, #tpu.memory_space<vmem>>, vector<1x1x256xf32>
    %105 = vector.shape_cast %104 : vector<1x1x256xf32> to vector<1x256xf32>
    %cst_50 = arith.constant dense<0.000000e+00> : vector<16xf32>
    %106 = vector.multi_reduction <add>, %101, %cst_50 [1] : vector<16x256xf32> to vector<16xf32>
    %107 = vector.shape_cast %106 : vector<16xf32> to vector<16x1xf32>
    %cst_51 = arith.constant 2.560000e+02 : f32
    %108 = vector.broadcast %cst_51 : f32 to vector<16x1xf32>
    %109 = arith.divf %107, %108 : vector<16x1xf32>
    %110 = vector.broadcast %109 : vector<16x1xf32> to vector<16x256xf32>
    %111 = arith.subf %101, %110 : vector<16x256xf32>
    %112 = vector.broadcast %109 : vector<16x1xf32> to vector<16x256xf32>
    %113 = arith.subf %101, %112 : vector<16x256xf32>
    %114 = arith.mulf %111, %113 : vector<16x256xf32>
    %cst_52 = arith.constant dense<0.000000e+00> : vector<16xf32>
    %115 = vector.multi_reduction <add>, %114, %cst_52 [1] : vector<16x256xf32> to vector<16xf32>
    %116 = vector.shape_cast %115 : vector<16xf32> to vector<16x1xf32>
    %cst_53 = arith.constant 2.560000e+02 : f32
    %117 = vector.broadcast %cst_53 : f32 to vector<16x1xf32>
    %118 = arith.divf %116, %117 : vector<16x1xf32>
    %119 = vector.broadcast %109 : vector<16x1xf32> to vector<16x256xf32>
    %120 = arith.subf %101, %119 : vector<16x256xf32>
    %cst_54 = arith.constant 9.99999974E-6 : f32
    %121 = vector.broadcast %cst_54 : f32 to vector<16x1xf32>
    %122 = arith.addf %118, %121 : vector<16x1xf32>
    %123 = math.rsqrt %122 : vector<16x1xf32>
    %124 = vector.broadcast %123 : vector<16x1xf32> to vector<16x256xf32>
    %125 = arith.mulf %120, %124 : vector<16x256xf32>
    %126 = vector.broadcast %103 : vector<1x256xf32> to vector<16x256xf32>
    %127 = arith.mulf %125, %126 : vector<16x256xf32>
    %128 = vector.broadcast %105 : vector<1x256xf32> to vector<16x256xf32>
    %129 = arith.addf %127, %128 : vector<16x256xf32>
    %130 = arith.truncf %129 : vector<16x256xf32> to vector<16x256xbf16>
    %c0_55 = arith.constant 0 : index
    %c0_56 = arith.constant 0 : index
    %c0_57 = arith.constant 0 : index
    %131 = vector.load %arg9[%c0_55, %c0_56, %c0_57] : memref<2x256x512xbf16, #tpu.memory_space<vmem>>, vector<1x256x512xbf16>
    %132 = vector.shape_cast %131 : vector<1x256x512xbf16> to vector<256x512xbf16>
    %cst_58 = arith.constant dense<0.000000e+00> : vector<16x512xf32>
    %133 = tpu.matmul %130, %132, %cst_58 {dimension_numbers = #tpu.dot_dimension_numbers<[1], [0], [0], [1], [0, 0, 1, 1], [], []>} : vector<16x256xbf16>, vector<256x512xbf16>, vector<16x512xf32> -> vector<16x512xf32>
    %c0_59 = arith.constant 0 : index
    %c0_60 = arith.constant 0 : index
    %c0_61 = arith.constant 0 : index
    %134 = vector.load %arg10[%c0_59, %c0_60, %c0_61] : memref<2x1x512xf32, #tpu.memory_space<vmem>>, vector<1x1x512xf32>
    %135 = vector.shape_cast %134 : vector<1x1x512xf32> to vector<1x512xf32>
    %136 = vector.broadcast %135 : vector<1x512xf32> to vector<16x512xf32>
    %137 = arith.addf %133, %136 : vector<16x512xf32>
    %cst_62 = arith.constant 0.000000e+00 : f32
    %138 = vector.broadcast %cst_62 : f32 to vector<16x512xf32>
    %139 = arith.maximumf %137, %138 : vector<16x512xf32>
    %140 = arith.truncf %139 : vector<16x512xf32> to vector<16x512xbf16>
    %c0_63 = arith.constant 0 : index
    %c0_64 = arith.constant 0 : index
    %c0_65 = arith.constant 0 : index
    %141 = vector.load %arg11[%c0_63, %c0_64, %c0_65] : memref<2x512x256xbf16, #tpu.memory_space<vmem>>, vector<1x512x256xbf16>
    %142 = vector.shape_cast %141 : vector<1x512x256xbf16> to vector<512x256xbf16>
    %cst_66 = arith.constant dense<0.000000e+00> : vector<16x256xf32>
    %143 = tpu.matmul %140, %142, %cst_66 {dimension_numbers = #tpu.dot_dimension_numbers<[1], [0], [0], [1], [0, 0, 1, 1], [], []>} : vector<16x512xbf16>, vector<512x256xbf16>, vector<16x256xf32> -> vector<16x256xf32>
    %c0_67 = arith.constant 0 : index
    %c0_68 = arith.constant 0 : index
    %c0_69 = arith.constant 0 : index
    %144 = vector.load %arg12[%c0_67, %c0_68, %c0_69] : memref<2x1x256xf32, #tpu.memory_space<vmem>>, vector<1x1x256xf32>
    %145 = vector.shape_cast %144 : vector<1x1x256xf32> to vector<1x256xf32>
    %146 = vector.broadcast %145 : vector<1x256xf32> to vector<16x256xf32>
    %147 = arith.addf %143, %146 : vector<16x256xf32>
    %148 = arith.addf %147, %129 : vector<16x256xf32>
    %c0_70 = arith.constant 0 : index
    %c0_71 = arith.constant 0 : index
    %c0_72 = arith.constant 0 : index
    %149 = vector.load %arg13[%c0_70, %c0_71, %c0_72] : memref<2x1x256xf32, #tpu.memory_space<vmem>>, vector<1x1x256xf32>
    %150 = vector.shape_cast %149 : vector<1x1x256xf32> to vector<1x256xf32>
    %c0_73 = arith.constant 0 : index
    %c0_74 = arith.constant 0 : index
    %c0_75 = arith.constant 0 : index
    %151 = vector.load %arg14[%c0_73, %c0_74, %c0_75] : memref<2x1x256xf32, #tpu.memory_space<vmem>>, vector<1x1x256xf32>
    %152 = vector.shape_cast %151 : vector<1x1x256xf32> to vector<1x256xf32>
    %cst_76 = arith.constant dense<0.000000e+00> : vector<16xf32>
    %153 = vector.multi_reduction <add>, %148, %cst_76 [1] : vector<16x256xf32> to vector<16xf32>
    %154 = vector.shape_cast %153 : vector<16xf32> to vector<16x1xf32>
    %cst_77 = arith.constant 2.560000e+02 : f32
    %155 = vector.broadcast %cst_77 : f32 to vector<16x1xf32>
    %156 = arith.divf %154, %155 : vector<16x1xf32>
    %157 = vector.broadcast %156 : vector<16x1xf32> to vector<16x256xf32>
    %158 = arith.subf %148, %157 : vector<16x256xf32>
    %159 = vector.broadcast %156 : vector<16x1xf32> to vector<16x256xf32>
    %160 = arith.subf %148, %159 : vector<16x256xf32>
    %161 = arith.mulf %158, %160 : vector<16x256xf32>
    %cst_78 = arith.constant dense<0.000000e+00> : vector<16xf32>
    %162 = vector.multi_reduction <add>, %161, %cst_78 [1] : vector<16x256xf32> to vector<16xf32>
    %163 = vector.shape_cast %162 : vector<16xf32> to vector<16x1xf32>
    %cst_79 = arith.constant 2.560000e+02 : f32
    %164 = vector.broadcast %cst_79 : f32 to vector<16x1xf32>
    %165 = arith.divf %163, %164 : vector<16x1xf32>
    %166 = vector.broadcast %156 : vector<16x1xf32> to vector<16x256xf32>
    %167 = arith.subf %148, %166 : vector<16x256xf32>
    %cst_80 = arith.constant 9.99999974E-6 : f32
    %168 = vector.broadcast %cst_80 : f32 to vector<16x1xf32>
    %169 = arith.addf %165, %168 : vector<16x1xf32>
    %170 = math.rsqrt %169 : vector<16x1xf32>
    %171 = vector.broadcast %170 : vector<16x1xf32> to vector<16x256xf32>
    %172 = arith.mulf %167, %171 : vector<16x256xf32>
    %173 = vector.broadcast %150 : vector<1x256xf32> to vector<16x256xf32>
    %174 = arith.mulf %172, %173 : vector<16x256xf32>
    %175 = vector.broadcast %152 : vector<1x256xf32> to vector<16x256xf32>
    %176 = arith.addf %174, %175 : vector<16x256xf32>
    %177 = arith.truncf %176 : vector<16x256xf32> to vector<16x256xbf16>
    %c1_81 = arith.constant 1 : index
    %c0_82 = arith.constant 0 : index
    %c0_83 = arith.constant 0 : index
    %178 = vector.load %arg3[%c1_81, %c0_82, %c0_83] : memref<2x256x768xbf16, #tpu.memory_space<vmem>>, vector<1x256x768xbf16>
    %179 = vector.shape_cast %178 : vector<1x256x768xbf16> to vector<256x768xbf16>
    %cst_84 = arith.constant dense<0.000000e+00> : vector<16x768xf32>
    %180 = tpu.matmul %177, %179, %cst_84 {dimension_numbers = #tpu.dot_dimension_numbers<[1], [0], [0], [1], [0, 0, 1, 1], [], []>} : vector<16x256xbf16>, vector<256x768xbf16>, vector<16x768xf32> -> vector<16x768xf32>
    %c1_85 = arith.constant 1 : index
    %c0_86 = arith.constant 0 : index
    %c0_87 = arith.constant 0 : index
    %181 = vector.load %arg4[%c1_85, %c0_86, %c0_87] : memref<2x1x768xf32, #tpu.memory_space<vmem>>, vector<1x1x768xf32>
    %182 = vector.shape_cast %181 : vector<1x1x768xf32> to vector<1x768xf32>
    %183 = vector.broadcast %182 : vector<1x768xf32> to vector<16x768xf32>
    %184 = arith.addf %180, %183 : vector<16x768xf32>
    %185 = vector.extract_strided_slice %184 {offsets = [0, 0], sizes = [16, 256], strides = [1, 1]} : vector<16x768xf32> to vector<16x256xf32>
    %186 = vector.extract_strided_slice %184 {offsets = [0, 256], sizes = [16, 256], strides = [1, 1]} : vector<16x768xf32> to vector<16x256xf32>
    %187 = vector.extract_strided_slice %184 {offsets = [0, 512], sizes = [16, 256], strides = [1, 1]} : vector<16x768xf32> to vector<16x256xf32>
    %188 = vector.extract_strided_slice %185 {offsets = [0, 0], sizes = [8, 128], strides = [1, 1]} : vector<16x256xf32> to vector<8x128xf32>
    %189 = vector.extract_strided_slice %186 {offsets = [0, 0], sizes = [8, 128], strides = [1, 1]} : vector<16x256xf32> to vector<8x128xf32>
    %190 = vector.extract_strided_slice %187 {offsets = [0, 0], sizes = [8, 128], strides = [1, 1]} : vector<16x256xf32> to vector<8x128xf32>
    %cst_88 = arith.constant dense<0.000000e+00> : vector<8x8xf32>
    %191 = tpu.matmul %188, %189, %cst_88 {dimension_numbers = #tpu.dot_dimension_numbers<[1], [1], [0], [0], [0, 0, 1, 0], [], []>} : vector<8x128xf32>, vector<8x128xf32>, vector<8x8xf32> -> vector<8x8xf32>
    %cst_89 = arith.constant -1.000000e+06 : f32
    %192 = vector.broadcast %cst_89 : f32 to vector<8x8xf32>
    %193 = arith.select %5, %191, %192 : vector<8x8xi1>, vector<8x8xf32>
    %cst_90 = arith.constant dense<0xFF800000> : vector<8xf32>
    %194 = vector.multi_reduction <maximumf>, %193, %cst_90 [1] : vector<8x8xf32> to vector<8xf32>
    %195 = vector.shape_cast %194 : vector<8xf32> to vector<8x1xf32>
    %196 = vector.broadcast %195 : vector<8x1xf32> to vector<8x8xf32>
    %197 = arith.subf %193, %196 : vector<8x8xf32>
    %198 = math.exp %197 : vector<8x8xf32>
    %cst_91 = arith.constant dense<0.000000e+00> : vector<8xf32>
    %199 = vector.multi_reduction <add>, %198, %cst_91 [1] : vector<8x8xf32> to vector<8xf32>
    %200 = vector.shape_cast %199 : vector<8xf32> to vector<8x1xf32>
    %201 = tpu.reciprocal %200 {approx = true} : vector<8x1xf32> -> vector<8x1xf32>
    %202 = vector.broadcast %201 : vector<8x1xf32> to vector<8x8xf32>
    %203 = arith.mulf %198, %202 : vector<8x8xf32>
    %cst_92 = arith.constant dense<0.000000e+00> : vector<8x128xf32>
    %204 = tpu.matmul %203, %190, %cst_92 {dimension_numbers = #tpu.dot_dimension_numbers<[1], [0], [0], [1], [0, 0, 1, 1], [], []>} : vector<8x8xf32>, vector<8x128xf32>, vector<8x128xf32> -> vector<8x128xf32>
    %c0_93 = arith.constant 0 : index
    %c0_94 = arith.constant 0 : index
    %205 = vector.load %arg16[%c0_93, %c0_94] : memref<16x256xf32, #tpu.memory_space<vmem>>, vector<8x128xf32>
    tpu.vector_store %arg16[%c0_93, %c0_94], %204 {strides = array<i32>} : memref<16x256xf32, #tpu.memory_space<vmem>>, vector<8x128xf32>,
    %206 = vector.extract_strided_slice %185 {offsets = [0, 128], sizes = [8, 128], strides = [1, 1]} : vector<16x256xf32> to vector<8x128xf32>
    %207 = vector.extract_strided_slice %186 {offsets = [0, 128], sizes = [8, 128], strides = [1, 1]} : vector<16x256xf32> to vector<8x128xf32>
    %208 = vector.extract_strided_slice %187 {offsets = [0, 128], sizes = [8, 128], strides = [1, 1]} : vector<16x256xf32> to vector<8x128xf32>
    %cst_95 = arith.constant dense<0.000000e+00> : vector<8x8xf32>
    %209 = tpu.matmul %206, %207, %cst_95 {dimension_numbers = #tpu.dot_dimension_numbers<[1], [1], [0], [0], [0, 0, 1, 0], [], []>} : vector<8x128xf32>, vector<8x128xf32>, vector<8x8xf32> -> vector<8x8xf32>
    %cst_96 = arith.constant -1.000000e+06 : f32
    %210 = vector.broadcast %cst_96 : f32 to vector<8x8xf32>
    %211 = arith.select %5, %209, %210 : vector<8x8xi1>, vector<8x8xf32>
    %cst_97 = arith.constant dense<0xFF800000> : vector<8xf32>
    %212 = vector.multi_reduction <maximumf>, %211, %cst_97 [1] : vector<8x8xf32> to vector<8xf32>
    %213 = vector.shape_cast %212 : vector<8xf32> to vector<8x1xf32>
    %214 = vector.broadcast %213 : vector<8x1xf32> to vector<8x8xf32>
    %215 = arith.subf %211, %214 : vector<8x8xf32>
    %216 = math.exp %215 : vector<8x8xf32>
    %cst_98 = arith.constant dense<0.000000e+00> : vector<8xf32>
    %217 = vector.multi_reduction <add>, %216, %cst_98 [1] : vector<8x8xf32> to vector<8xf32>
    %218 = vector.shape_cast %217 : vector<8xf32> to vector<8x1xf32>
    %219 = tpu.reciprocal %218 {approx = true} : vector<8x1xf32> -> vector<8x1xf32>
    %220 = vector.broadcast %219 : vector<8x1xf32> to vector<8x8xf32>
    %221 = arith.mulf %216, %220 : vector<8x8xf32>
    %cst_99 = arith.constant dense<0.000000e+00> : vector<8x128xf32>
    %222 = tpu.matmul %221, %208, %cst_99 {dimension_numbers = #tpu.dot_dimension_numbers<[1], [0], [0], [1], [0, 0, 1, 1], [], []>} : vector<8x8xf32>, vector<8x128xf32>, vector<8x128xf32> -> vector<8x128xf32>
    %c0_100 = arith.constant 0 : index
    %c128_101 = arith.constant 128 : index
    %223 = vector.load %arg16[%c0_100, %c128_101] : memref<16x256xf32, #tpu.memory_space<vmem>>, vector<8x128xf32>
    tpu.vector_store %arg16[%c0_100, %c128_101], %222 {strides = array<i32>} : memref<16x256xf32, #tpu.memory_space<vmem>>, vector<8x128xf32>,
    %224 = vector.extract_strided_slice %185 {offsets = [8, 0], sizes = [8, 128], strides = [1, 1]} : vector<16x256xf32> to vector<8x128xf32>
    %225 = vector.extract_strided_slice %186 {offsets = [8, 0], sizes = [8, 128], strides = [1, 1]} : vector<16x256xf32> to vector<8x128xf32>
    %226 = vector.extract_strided_slice %187 {offsets = [8, 0], sizes = [8, 128], strides = [1, 1]} : vector<16x256xf32> to vector<8x128xf32>
    %cst_102 = arith.constant dense<0.000000e+00> : vector<8x8xf32>
    %227 = tpu.matmul %224, %225, %cst_102 {dimension_numbers = #tpu.dot_dimension_numbers<[1], [1], [0], [0], [0, 0, 1, 0], [], []>} : vector<8x128xf32>, vector<8x128xf32>, vector<8x8xf32> -> vector<8x8xf32>
    %cst_103 = arith.constant -1.000000e+06 : f32
    %228 = vector.broadcast %cst_103 : f32 to vector<8x8xf32>
    %229 = arith.select %8, %227, %228 : vector<8x8xi1>, vector<8x8xf32>
    %cst_104 = arith.constant dense<0xFF800000> : vector<8xf32>
    %230 = vector.multi_reduction <maximumf>, %229, %cst_104 [1] : vector<8x8xf32> to vector<8xf32>
    %231 = vector.shape_cast %230 : vector<8xf32> to vector<8x1xf32>
    %232 = vector.broadcast %231 : vector<8x1xf32> to vector<8x8xf32>
    %233 = arith.subf %229, %232 : vector<8x8xf32>
    %234 = math.exp %233 : vector<8x8xf32>
    %cst_105 = arith.constant dense<0.000000e+00> : vector<8xf32>
    %235 = vector.multi_reduction <add>, %234, %cst_105 [1] : vector<8x8xf32> to vector<8xf32>
    %236 = vector.shape_cast %235 : vector<8xf32> to vector<8x1xf32>
    %237 = tpu.reciprocal %236 {approx = true} : vector<8x1xf32> -> vector<8x1xf32>
    %238 = vector.broadcast %237 : vector<8x1xf32> to vector<8x8xf32>
    %239 = arith.mulf %234, %238 : vector<8x8xf32>
    %cst_106 = arith.constant dense<0.000000e+00> : vector<8x128xf32>
    %240 = tpu.matmul %239, %226, %cst_106 {dimension_numbers = #tpu.dot_dimension_numbers<[1], [0], [0], [1], [0, 0, 1, 1], [], []>} : vector<8x8xf32>, vector<8x128xf32>, vector<8x128xf32> -> vector<8x128xf32>
    %c8_107 = arith.constant 8 : index
    %c0_108 = arith.constant 0 : index
    %241 = vector.load %arg16[%c8_107, %c0_108] : memref<16x256xf32, #tpu.memory_space<vmem>>, vector<8x128xf32>
    tpu.vector_store %arg16[%c8_107, %c0_108], %240 {strides = array<i32>} : memref<16x256xf32, #tpu.memory_space<vmem>>, vector<8x128xf32>,
    %242 = vector.extract_strided_slice %185 {offsets = [8, 128], sizes = [8, 128], strides = [1, 1]} : vector<16x256xf32> to vector<8x128xf32>
    %243 = vector.extract_strided_slice %186 {offsets = [8, 128], sizes = [8, 128], strides = [1, 1]} : vector<16x256xf32> to vector<8x128xf32>
    %244 = vector.extract_strided_slice %187 {offsets = [8, 128], sizes = [8, 128], strides = [1, 1]} : vector<16x256xf32> to vector<8x128xf32>
    %cst_109 = arith.constant dense<0.000000e+00> : vector<8x8xf32>
    %245 = tpu.matmul %242, %243, %cst_109 {dimension_numbers = #tpu.dot_dimension_numbers<[1], [1], [0], [0], [0, 0, 1, 0], [], []>} : vector<8x128xf32>, vector<8x128xf32>, vector<8x8xf32> -> vector<8x8xf32>
    %cst_110 = arith.constant -1.000000e+06 : f32
    %246 = vector.broadcast %cst_110 : f32 to vector<8x8xf32>
    %247 = arith.select %8, %245, %246 : vector<8x8xi1>, vector<8x8xf32>
    %cst_111 = arith.constant dense<0xFF800000> : vector<8xf32>
    %248 = vector.multi_reduction <maximumf>, %247, %cst_111 [1] : vector<8x8xf32> to vector<8xf32>
    %249 = vector.shape_cast %248 : vector<8xf32> to vector<8x1xf32>
    %250 = vector.broadcast %249 : vector<8x1xf32> to vector<8x8xf32>
    %251 = arith.subf %247, %250 : vector<8x8xf32>
    %252 = math.exp %251 : vector<8x8xf32>
    %cst_112 = arith.constant dense<0.000000e+00> : vector<8xf32>
    %253 = vector.multi_reduction <add>, %252, %cst_112 [1] : vector<8x8xf32> to vector<8xf32>
    %254 = vector.shape_cast %253 : vector<8xf32> to vector<8x1xf32>
    %255 = tpu.reciprocal %254 {approx = true} : vector<8x1xf32> -> vector<8x1xf32>
    %256 = vector.broadcast %255 : vector<8x1xf32> to vector<8x8xf32>
    %257 = arith.mulf %252, %256 : vector<8x8xf32>
    %cst_113 = arith.constant dense<0.000000e+00> : vector<8x128xf32>
    %258 = tpu.matmul %257, %244, %cst_113 {dimension_numbers = #tpu.dot_dimension_numbers<[1], [0], [0], [1], [0, 0, 1, 1], [], []>} : vector<8x8xf32>, vector<8x128xf32>, vector<8x128xf32> -> vector<8x128xf32>
    %c8_114 = arith.constant 8 : index
    %c128_115 = arith.constant 128 : index
    %259 = vector.load %arg16[%c8_114, %c128_115] : memref<16x256xf32, #tpu.memory_space<vmem>>, vector<8x128xf32>
    tpu.vector_store %arg16[%c8_114, %c128_115], %258 {strides = array<i32>} : memref<16x256xf32, #tpu.memory_space<vmem>>, vector<8x128xf32>,
    %c0_116 = arith.constant 0 : index
    %c0_117 = arith.constant 0 : index
    %260 = vector.load %arg16[%c0_116, %c0_117] : memref<16x256xf32, #tpu.memory_space<vmem>>, vector<16x256xf32>
    %261 = arith.truncf %260 : vector<16x256xf32> to vector<16x256xbf16>
    %c1_118 = arith.constant 1 : index
    %c0_119 = arith.constant 0 : index
    %c0_120 = arith.constant 0 : index
    %262 = vector.load %arg5[%c1_118, %c0_119, %c0_120] : memref<2x256x256xbf16, #tpu.memory_space<vmem>>, vector<1x256x256xbf16>
    %263 = vector.shape_cast %262 : vector<1x256x256xbf16> to vector<256x256xbf16>
    %cst_121 = arith.constant dense<0.000000e+00> : vector<16x256xf32>
    %264 = tpu.matmul %261, %263, %cst_121 {dimension_numbers = #tpu.dot_dimension_numbers<[1], [0], [0], [1], [0, 0, 1, 1], [], []>} : vector<16x256xbf16>, vector<256x256xbf16>, vector<16x256xf32> -> vector<16x256xf32>
    %c1_122 = arith.constant 1 : index
    %c0_123 = arith.constant 0 : index
    %c0_124 = arith.constant 0 : index
    %265 = vector.load %arg6[%c1_122, %c0_123, %c0_124] : memref<2x1x256xf32, #tpu.memory_space<vmem>>, vector<1x1x256xf32>
    %266 = vector.shape_cast %265 : vector<1x1x256xf32> to vector<1x256xf32>
    %267 = vector.broadcast %266 : vector<1x256xf32> to vector<16x256xf32>
    %268 = arith.addf %264, %267 : vector<16x256xf32>
    %269 = arith.addf %268, %176 : vector<16x256xf32>
    %c1_125 = arith.constant 1 : index
    %c0_126 = arith.constant 0 : index
    %c0_127 = arith.constant 0 : index
    %270 = vector.load %arg7[%c1_125, %c0_126, %c0_127] : memref<2x1x256xf32, #tpu.memory_space<vmem>>, vector<1x1x256xf32>
    %271 = vector.shape_cast %270 : vector<1x1x256xf32> to vector<1x256xf32>
    %c1_128 = arith.constant 1 : index
    %c0_129 = arith.constant 0 : index
    %c0_130 = arith.constant 0 : index
    %272 = vector.load %arg8[%c1_128, %c0_129, %c0_130] : memref<2x1x256xf32, #tpu.memory_space<vmem>>, vector<1x1x256xf32>
    %273 = vector.shape_cast %272 : vector<1x1x256xf32> to vector<1x256xf32>
    %cst_131 = arith.constant dense<0.000000e+00> : vector<16xf32>
    %274 = vector.multi_reduction <add>, %269, %cst_131 [1] : vector<16x256xf32> to vector<16xf32>
    %275 = vector.shape_cast %274 : vector<16xf32> to vector<16x1xf32>
    %cst_132 = arith.constant 2.560000e+02 : f32
    %276 = vector.broadcast %cst_132 : f32 to vector<16x1xf32>
    %277 = arith.divf %275, %276 : vector<16x1xf32>
    %278 = vector.broadcast %277 : vector<16x1xf32> to vector<16x256xf32>
    %279 = arith.subf %269, %278 : vector<16x256xf32>
    %280 = vector.broadcast %277 : vector<16x1xf32> to vector<16x256xf32>
    %281 = arith.subf %269, %280 : vector<16x256xf32>
    %282 = arith.mulf %279, %281 : vector<16x256xf32>
    %cst_133 = arith.constant dense<0.000000e+00> : vector<16xf32>
    %283 = vector.multi_reduction <add>, %282, %cst_133 [1] : vector<16x256xf32> to vector<16xf32>
    %284 = vector.shape_cast %283 : vector<16xf32> to vector<16x1xf32>
    %cst_134 = arith.constant 2.560000e+02 : f32
    %285 = vector.broadcast %cst_134 : f32 to vector<16x1xf32>
    %286 = arith.divf %284, %285 : vector<16x1xf32>
    %287 = vector.broadcast %277 : vector<16x1xf32> to vector<16x256xf32>
    %288 = arith.subf %269, %287 : vector<16x256xf32>
    %cst_135 = arith.constant 9.99999974E-6 : f32
    %289 = vector.broadcast %cst_135 : f32 to vector<16x1xf32>
    %290 = arith.addf %286, %289 : vector<16x1xf32>
    %291 = math.rsqrt %290 : vector<16x1xf32>
    %292 = vector.broadcast %291 : vector<16x1xf32> to vector<16x256xf32>
    %293 = arith.mulf %288, %292 : vector<16x256xf32>
    %294 = vector.broadcast %271 : vector<1x256xf32> to vector<16x256xf32>
    %295 = arith.mulf %293, %294 : vector<16x256xf32>
    %296 = vector.broadcast %273 : vector<1x256xf32> to vector<16x256xf32>
    %297 = arith.addf %295, %296 : vector<16x256xf32>
    %298 = arith.truncf %297 : vector<16x256xf32> to vector<16x256xbf16>
    %c1_136 = arith.constant 1 : index
    %c0_137 = arith.constant 0 : index
    %c0_138 = arith.constant 0 : index
    %299 = vector.load %arg9[%c1_136, %c0_137, %c0_138] : memref<2x256x512xbf16, #tpu.memory_space<vmem>>, vector<1x256x512xbf16>
    %300 = vector.shape_cast %299 : vector<1x256x512xbf16> to vector<256x512xbf16>
    %cst_139 = arith.constant dense<0.000000e+00> : vector<16x512xf32>
    %301 = tpu.matmul %298, %300, %cst_139 {dimension_numbers = #tpu.dot_dimension_numbers<[1], [0], [0], [1], [0, 0, 1, 1], [], []>} : vector<16x256xbf16>, vector<256x512xbf16>, vector<16x512xf32> -> vector<16x512xf32>
    %c1_140 = arith.constant 1 : index
    %c0_141 = arith.constant 0 : index
    %c0_142 = arith.constant 0 : index
    %302 = vector.load %arg10[%c1_140, %c0_141, %c0_142] : memref<2x1x512xf32, #tpu.memory_space<vmem>>, vector<1x1x512xf32>
    %303 = vector.shape_cast %302 : vector<1x1x512xf32> to vector<1x512xf32>
    %304 = vector.broadcast %303 : vector<1x512xf32> to vector<16x512xf32>
    %305 = arith.addf %301, %304 : vector<16x512xf32>
    %cst_143 = arith.constant 0.000000e+00 : f32
    %306 = vector.broadcast %cst_143 : f32 to vector<16x512xf32>
    %307 = arith.maximumf %305, %306 : vector<16x512xf32>
    %308 = arith.truncf %307 : vector<16x512xf32> to vector<16x512xbf16>
    %c1_144 = arith.constant 1 : index
    %c0_145 = arith.constant 0 : index
    %c0_146 = arith.constant 0 : index
    %309 = vector.load %arg11[%c1_144, %c0_145, %c0_146] : memref<2x512x256xbf16, #tpu.memory_space<vmem>>, vector<1x512x256xbf16>
    %310 = vector.shape_cast %309 : vector<1x512x256xbf16> to vector<512x256xbf16>
    %cst_147 = arith.constant dense<0.000000e+00> : vector<16x256xf32>
    %311 = tpu.matmul %308, %310, %cst_147 {dimension_numbers = #tpu.dot_dimension_numbers<[1], [0], [0], [1], [0, 0, 1, 1], [], []>} : vector<16x512xbf16>, vector<512x256xbf16>, vector<16x256xf32> -> vector<16x256xf32>
    %c1_148 = arith.constant 1 : index
    %c0_149 = arith.constant 0 : index
    %c0_150 = arith.constant 0 : index
    %312 = vector.load %arg12[%c1_148, %c0_149, %c0_150] : memref<2x1x256xf32, #tpu.memory_space<vmem>>, vector<1x1x256xf32>
    %313 = vector.shape_cast %312 : vector<1x1x256xf32> to vector<1x256xf32>
    %314 = vector.broadcast %313 : vector<1x256xf32> to vector<16x256xf32>
    %315 = arith.addf %311, %314 : vector<16x256xf32>
    %316 = arith.addf %315, %297 : vector<16x256xf32>
    %c1_151 = arith.constant 1 : index
    %c0_152 = arith.constant 0 : index
    %c0_153 = arith.constant 0 : index
    %317 = vector.load %arg13[%c1_151, %c0_152, %c0_153] : memref<2x1x256xf32, #tpu.memory_space<vmem>>, vector<1x1x256xf32>
    %318 = vector.shape_cast %317 : vector<1x1x256xf32> to vector<1x256xf32>
    %c1_154 = arith.constant 1 : index
    %c0_155 = arith.constant 0 : index
    %c0_156 = arith.constant 0 : index
    %319 = vector.load %arg14[%c1_154, %c0_155, %c0_156] : memref<2x1x256xf32, #tpu.memory_space<vmem>>, vector<1x1x256xf32>
    %320 = vector.shape_cast %319 : vector<1x1x256xf32> to vector<1x256xf32>
    %cst_157 = arith.constant dense<0.000000e+00> : vector<16xf32>
    %321 = vector.multi_reduction <add>, %316, %cst_157 [1] : vector<16x256xf32> to vector<16xf32>
    %322 = vector.shape_cast %321 : vector<16xf32> to vector<16x1xf32>
    %cst_158 = arith.constant 2.560000e+02 : f32
    %323 = vector.broadcast %cst_158 : f32 to vector<16x1xf32>
    %324 = arith.divf %322, %323 : vector<16x1xf32>
    %325 = vector.broadcast %324 : vector<16x1xf32> to vector<16x256xf32>
    %326 = arith.subf %316, %325 : vector<16x256xf32>
    %327 = vector.broadcast %324 : vector<16x1xf32> to vector<16x256xf32>
    %328 = arith.subf %316, %327 : vector<16x256xf32>
    %329 = arith.mulf %326, %328 : vector<16x256xf32>
    %cst_159 = arith.constant dense<0.000000e+00> : vector<16xf32>
    %330 = vector.multi_reduction <add>, %329, %cst_159 [1] : vector<16x256xf32> to vector<16xf32>
    %331 = vector.shape_cast %330 : vector<16xf32> to vector<16x1xf32>
    %cst_160 = arith.constant 2.560000e+02 : f32
    %332 = vector.broadcast %cst_160 : f32 to vector<16x1xf32>
    %333 = arith.divf %331, %332 : vector<16x1xf32>
    %334 = vector.broadcast %324 : vector<16x1xf32> to vector<16x256xf32>
    %335 = arith.subf %316, %334 : vector<16x256xf32>
    %cst_161 = arith.constant 9.99999974E-6 : f32
    %336 = vector.broadcast %cst_161 : f32 to vector<16x1xf32>
    %337 = arith.addf %333, %336 : vector<16x1xf32>
    %338 = math.rsqrt %337 : vector<16x1xf32>
    %339 = vector.broadcast %338 : vector<16x1xf32> to vector<16x256xf32>
    %340 = arith.mulf %335, %339 : vector<16x256xf32>
    %341 = vector.broadcast %318 : vector<1x256xf32> to vector<16x256xf32>
    %342 = arith.mulf %340, %341 : vector<16x256xf32>
    %343 = vector.broadcast %320 : vector<1x256xf32> to vector<16x256xf32>
    %344 = arith.addf %342, %343 : vector<16x256xf32>
    %345 = vector.shape_cast %344 : vector<16x256xf32> to vector<2x8x256xf32>
    %c0_162 = arith.constant 0 : index
    %c0_163 = arith.constant 0 : index
    %c0_164 = arith.constant 0 : index
    %346 = vector.load %arg15[%c0_162, %c0_163, %c0_164] : memref<2x8x256xf32, #tpu.memory_space<vmem>>, vector<2x8x256xf32>
    tpu.vector_store %arg15[%c0_162, %c0_163, %c0_164], %345 {strides = array<i32>} : memref<2x8x256xf32, #tpu.memory_space<vmem>>, vector<2x8x256xf32>,
    return
  }
  func.func @transform_0(%arg0: i32, %arg1: memref<2xi32, #tpu.memory_space<smem>>) -> (i32, i32, i32) {
    %c0_i32 = arith.constant 0 : i32
    %c0_i32_0 = arith.constant 0 : i32
    %c0_i32_1 = arith.constant 0 : i32
    %c0_i32_2 = arith.constant 0 : i32
    return %c0_i32, %c0_i32_0, %c0_i32_1 : i32, i32, i32
  }
  func.func @transform_1(%arg0: i32, %arg1: memref<2xi32, #tpu.memory_space<smem>>) -> (i32, i32, i32) {
    %c0_i32 = arith.constant 0 : i32
    %c0_i32_0 = arith.constant 0 : i32
    %c0_i32_1 = arith.constant 0 : i32
    %c0_i32_2 = arith.constant 0 : i32
    return %c0_i32, %c0_i32_0, %c0_i32_1 : i32, i32, i32
  }
  func.func @transform_2(%arg0: i32, %arg1: memref<2xi32, #tpu.memory_space<smem>>) -> (i32, i32, i32) {
    %c0_i32 = arith.constant 0 : i32
    %c0_i32_0 = arith.constant 0 : i32
    %c0_i32_1 = arith.constant 0 : i32
    %c0_i32_2 = arith.constant 0 : i32
    return %c0_i32, %c0_i32_0, %c0_i32_1 : i32, i32, i32
  }
  func.func @transform_3(%arg0: i32, %arg1: memref<2xi32, #tpu.memory_space<smem>>) -> (i32, i32, i32) {
    %c0_i32 = arith.constant 0 : i32
    %c0_i32_0 = arith.constant 0 : i32
    %c0_i32_1 = arith.constant 0 : i32
    %c0_i32_2 = arith.constant 0 : i32
    return %c0_i32, %c0_i32_0, %c0_i32_1 : i32, i32, i32
  }
  func.func @transform_4(%arg0: i32, %arg1: memref<2xi32, #tpu.memory_space<smem>>) -> (i32, i32, i32) {
    %c0_i32 = arith.constant 0 : i32
    %c0_i32_0 = arith.constant 0 : i32
    %c0_i32_1 = arith.constant 0 : i32
    %c0_i32_2 = arith.constant 0 : i32
    return %c0_i32, %c0_i32_0, %c0_i32_1 : i32, i32, i32
  }
  func.func @transform_5(%arg0: i32, %arg1: memref<2xi32, #tpu.memory_space<smem>>) -> (i32, i32, i32) {
    %c0_i32 = arith.constant 0 : i32
    %c0_i32_0 = arith.constant 0 : i32
    %c0_i32_1 = arith.constant 0 : i32
    %c0_i32_2 = arith.constant 0 : i32
    return %c0_i32, %c0_i32_0, %c0_i32_1 : i32, i32, i32
  }
  func.func @transform_6(%arg0: i32, %arg1: memref<2xi32, #tpu.memory_space<smem>>) -> (i32, i32, i32) {
    %c0_i32 = arith.constant 0 : i32
    %c0_i32_0 = arith.constant 0 : i32
    %c0_i32_1 = arith.constant 0 : i32
    %c0_i32_2 = arith.constant 0 : i32
    return %c0_i32, %c0_i32_0, %c0_i32_1 : i32, i32, i32
  }
  func.func @transform_7(%arg0: i32, %arg1: memref<2xi32, #tpu.memory_space<smem>>) -> (i32, i32, i32) {
    %c0_i32 = arith.constant 0 : i32
    %c0_i32_0 = arith.constant 0 : i32
    %c0_i32_1 = arith.constant 0 : i32
    %c0_i32_2 = arith.constant 0 : i32
    return %c0_i32, %c0_i32_0, %c0_i32_1 : i32, i32, i32
  }
  func.func @transform_8(%arg0: i32, %arg1: memref<2xi32, #tpu.memory_space<smem>>) -> (i32, i32, i32) {
    %c0_i32 = arith.constant 0 : i32
    %c0_i32_0 = arith.constant 0 : i32
    %c0_i32_1 = arith.constant 0 : i32
    %c0_i32_2 = arith.constant 0 : i32
    return %c0_i32, %c0_i32_0, %c0_i32_1 : i32, i32, i32
  }
  func.func @transform_9(%arg0: i32, %arg1: memref<2xi32, #tpu.memory_space<smem>>) -> (i32, i32, i32) {
    %c0_i32 = arith.constant 0 : i32
    %c0_i32_0 = arith.constant 0 : i32
    %c0_i32_1 = arith.constant 0 : i32
    %c0_i32_2 = arith.constant 0 : i32
    return %c0_i32, %c0_i32_0, %c0_i32_1 : i32, i32, i32
  }
  func.func @transform_10(%arg0: i32, %arg1: memref<2xi32, #tpu.memory_space<smem>>) -> (i32, i32, i32) {
    %c0_i32 = arith.constant 0 : i32
    %c0_i32_0 = arith.constant 0 : i32
    %c0_i32_1 = arith.constant 0 : i32
    %c0_i32_2 = arith.constant 0 : i32
    return %c0_i32, %c0_i32_0, %c0_i32_1 : i32, i32, i32
  }
  func.func @transform_11(%arg0: i32, %arg1: memref<2xi32, #tpu.memory_space<smem>>) -> (i32, i32, i32) {
    %c0_i32 = arith.constant 0 : i32
    %c0_i32_0 = arith.constant 0 : i32
    %c0_i32_1 = arith.constant 0 : i32
    %c0_i32_2 = arith.constant 0 : i32
    return %c0_i32, %c0_i32_0, %c0_i32_1 : i32, i32, i32
  }
  func.func @transform_12(%arg0: i32, %arg1: memref<2xi32, #tpu.memory_space<smem>>) -> (i32, i32, i32) {
    %c0_i32 = arith.constant 0 : i32
    %c0_i32_0 = arith.constant 0 : i32
    %c0_i32_1 = arith.constant 0 : i32
    %c0_i32_2 = arith.constant 0 : i32
    return %c0_i32, %c0_i32_0, %c0_i32_1 : i32, i32, i32
  }
  func.func @transform_13(%arg0: i32, %arg1: memref<2xi32, #tpu.memory_space<smem>>) -> (i32, i32, i32) {
    %c0_i32 = arith.constant 0 : i32
    %c0_i32_0 = arith.constant 0 : i32
    %c0_i32_1 = arith.constant 0 : i32
    %c0_i32_2 = arith.constant 0 : i32
    return %c0_i32, %c0_i32_0, %c0_i32_1 : i32, i32, i32
  }
}

</mosaic_0001>

<bundles_post_ra>
// kernel: tpu_custom_call.1
= control target key start
LH: loop header
LB: loop body
LE: loop exit
PB: predicated region body
PF: predicated region fallthrough
CT: control target
= control target key end

     0   :  { %s7405_s29 = smov [#allocation4]   ;;  %s7962_s0 = inlined_call_operand.hbm [shape: s32[2], index: 0, kind: input, shape index: {}]   ;;  %s7963_s1 = inlined_call_operand.hbm [shape: f32[2,8,256], index: 1, kind: input, shape index: {}]   ;;  %s7964_s2 = inlined_call_operand.hbm [shape: bf16[2,256,768], index: 2, kind: input, shape index: {}]   ;;  %s7965_s3 = inlined_call_operand.hbm [shape: f32[2,1,768], index: 3, kind: input, shape index: {}]   ;;  %s7966_s4 = inlined_call_operand.hbm [shape: bf16[2,256,256], index: 4, kind: input, shape index: {}]   ;;  %s7967_s5 = inlined_call_operand.vmem [shape: f32[2,1,256], index: 5, kind: input, shape index: {}]   ;;  %s7968_s6 = inlined_call_operand.vmem [shape: f32[2,1,256], index: 6, kind: input, shape index: {}]   ;;  %s7969_s7 = inlined_call_operand.hbm [shape: f32[2,1,256], index: 7, kind: input, shape index: {}]   ;;  %s7970_s8 = inlined_call_operand.hbm [shape: bf16[2,256,512], index: 8, kind: input, shape index: {}]   ;;  %s7971_s9 = inlined_call_operand.vmem [shape: f32[2,1,512], index: 9, kind: input, shape index: {}]   ;;  %s7972_s10 = inlined_call_operand.hbm [shape: bf16[2,512,256], index: 10, kind: input, shape index: {}]   ;;  %s7973_s11 = inlined_call_operand.vmem [shape: f32[2,1,256], index: 11, kind: input, shape index: {}]   ;;  %s7974_s12 = inlined_call_operand.hbm [shape: f32[2,1,256], index: 12, kind: input, shape index: {}]   ;;  %s7975_s13 = inlined_call_operand.hbm [shape: f32[2,1,256], index: 13, kind: input, shape index: {}]   ;;  %s7976_s14 = inlined_call_operand.hbm [shape: f32[2,8,256], index: 14, kind: output, shape index: {}]  }
   0x1   :  { %20 = dma.hbm_to_smem %s7962_s0, 16, %s7405_s29, [#allocation3] }
   0x2   :  { %7391 = dma.done.wait [#allocation3], 16 }
   0x3   :  { %7392 = vsyncadd [#allocation3], 4294967280 }
   0x4   :  { %22 = sfence }
   0x5   :  { %23 = vsyncpa [#allocation6], 0 }
   0x6   :  { %24 = vsyncpa [#allocation9], 0 }
   0x7   :  { %25 = vsyncpa [#allocation12], 0 }
   0x8   :  { %26 = vsyncpa [#allocation15], 0 }
   0x9   :  { %27 = vsyncpa [#allocation18], 0 }
   0xa   :  { %28 = vsyncpa [#allocation7], 0  ;;  %s7406_s16 = smov [#allocation8]  }
   0xb   :  { %s46_s17 = sshll.u32 %s7406_s16, 4  ;;  %s47_s17 = int_to_ptr.vmem [resolvable:$true] %s46_s17 }
   0xc   :  { %s7199_s18 = scalar_lea.vmem %s47_s17, 24576  ;;  %p7204_p1 = scmp.lt.s32.totalorder %s47_s17, %s47_s17 }
   0xd   :  { %p7200_p0 = scmp.ne.s32.totalorder %s47_s17, %s7199_s18  ;;  %p7205_p2 = scmp.lt.s32.totalorder %s7199_s18, %s7199_s18 }
   0xf   :  { %p7206_p3 = por %p7205_p2, %p7204_p1 }
  0x11   :  { %p7207_p4 = pnand %p7206_p3, %p7200_p0 }
  0x13   :  { %7210 = shalt.err (!%p7207_p4)
}
  0x14   :  { %s7407_s0 = smov 384   ;;  %s7408_s19 = smov 24  }
  0x15   :  { %52 = dma.hbm_to_vmem [thread:$0]  %s7964_s2, 24576, %s47_s17, [#allocation9], %s7407_s0, %s7407_s0, %s7408_s19  }
  0x16   :  { %s7409_s22 = smov [#allocation11]  }
  0x17   :  { %s70_s23 = sshll.u32 %s7409_s22, 4  ;;  %s71_s23 = int_to_ptr.vmem [resolvable:$true] %s70_s23 }
  0x18   :  { %s7219_s24 = scalar_lea.vmem %s71_s23, 8192  ;;  %p7224_p6 = scmp.lt.s32.totalorder %s71_s23, %s71_s23 }
  0x19   :  { %p7220_p5 = scmp.ne.s32.totalorder %s71_s23, %s7219_s24  ;;  %p7225_p7 = scmp.lt.s32.totalorder %s7219_s24, %s7219_s24 }
  0x1b   :  { %p7226_p8 = por %p7225_p7, %p7224_p6 }
  0x1d   :  { %p7227_p9 = pnand %p7226_p8, %p7220_p5 }
  0x1f   :  { %7230 = shalt.err (!%p7227_p9)
}
  0x20   :  { %s7410_s25 = smov 128   ;;  %s7411_s26 = smov 8  }
  0x21   :  { %76 = dma.hbm_to_vmem [thread:$0]  %s7966_s4, 8192, %s71_s23, [#allocation12], %s7410_s25, %s7410_s25, %s7411_s26  }
  0x22   :  { %s7412_s2 = smov [#allocation14]  }
  0x23   :  { %s98_s29 = sshll.u32 %s7412_s2, 4  ;;  %s99_s29 = int_to_ptr.vmem [resolvable:$true] %s98_s29 }
  0x24   :  { %s7239_s30 = scalar_lea.vmem %s99_s29, 16384  ;;  %p7244_p11 = scmp.lt.s32.totalorder %s99_s29, %s99_s29 }
  0x25   :  { %p7240_p10 = scmp.ne.s32.totalorder %s99_s29, %s7239_s30  ;;  %p7245_p12 = scmp.lt.s32.totalorder %s7239_s30, %s7239_s30 }
  0x27   :  { %p7246_p13 = por %p7245_p12, %p7244_p11 }
  0x29   :  { %p7247_p0 = pnand %p7246_p13, %p7240_p10 }
  0x2b   :  { %7250 = shalt.err (!%p7247_p0)
}
  0x2c   :  { %s7413_s15 = smov 256   ;;  %s7414_s16 = smov 16  }
  0x2d   :  { %104 = dma.hbm_to_vmem [thread:$0]  %s7970_s8, 16384, %s99_s29, [#allocation15], %s7413_s15, %s7413_s15, %s7414_s16  }
  0x2e   :  { %s7415_s4 = smov [#allocation17]   ;;  %s7416_s19 = smov [#allocation5]  }
  0x2f   :  { %s126_s0 = sshll.u32 %s7415_s4, 4  ;;  %s34_s20 = sshll.u32 %s7416_s19, 4  ;;  %s127_s0 = int_to_ptr.vmem [resolvable:$true] %s126_s0  ;;  %s35_s20 = int_to_ptr.vmem [resolvable:$true] %s34_s20 }
  0x30   :  { %s7259_s21 = scalar_lea.vmem %s127_s0, 64  ;;  %p7264_p2 = scmp.lt.s32.totalorder %s127_s0, %s127_s0 }
  0x31   :  { %p7260_p1 = scmp.ne.s32.totalorder %s127_s0, %s7259_s21  ;;  %p7265_p3 = scmp.lt.s32.totalorder %s7259_s21, %s7259_s21 }
  0x33   :  { %p7266_p4 = por %p7265_p3, %p7264_p2 }
  0x35   :  { %p7267_p5 = pnand %p7266_p4, %p7260_p1 }
  0x37   :  { %7270 = shalt.err (!%p7267_p5)
}
  0x38   :  { %s7417_s22 = smov 32   ;;  %s7418_s23 = smov 2  }
  0x39   :  { %132 = dma.hbm_to_vmem [thread:$0]  %s7974_s12, 64, %s127_s0, [#allocation18], %s7417_s22, %s7417_s22, %s7418_s23  }
  0x3a   :  { %s7279_s8 = scalar_lea.vmem %s35_s20, 512  ;;  %p7284_p7 = scmp.lt.s32.totalorder %s35_s20, %s35_s20 }
  0x3b   :  { %p7280_p6 = scmp.ne.s32.totalorder %s35_s20, %s7279_s8  ;;  %p7285_p8 = scmp.lt.s32.totalorder %s7279_s8, %s7279_s8 }
  0x3d   :  { %p7286_p9 = por %p7285_p8, %p7284_p7 }
  0x3f   :  { %p7287_p10 = pnand %p7286_p9, %p7280_p6 }
  0x41   :  { %7290 = shalt.err (!%p7287_p10)
}
  0x42   :  { %40 = dma.hbm_to_vmem [thread:$0]  %s7963_s1, 512, %s35_s20, [#allocation6], %s7413_s15, %s7413_s15, %s7414_s16  }
  0x43   :  { %s7419_s29 = smov [#allocation10]  }
  0x44   :  { %s58_s30 = sshll.u32 %s7419_s29, 4  ;;  %s59_s30 = int_to_ptr.vmem [resolvable:$true] %s58_s30 }
  0x45   :  { %s7299_s17 = scalar_lea.vmem %s59_s30, 192  ;;  %p7304_p12 = scmp.lt.s32.totalorder %s59_s30, %s59_s30 }
  0x46   :  { %p7300_p11 = scmp.ne.s32.totalorder %s59_s30, %s7299_s17  ;;  %p7305_p13 = scmp.lt.s32.totalorder %s7299_s17, %s7299_s17 }
  0x48   :  { %p7306_p0 = por %p7305_p13, %p7304_p12 }
  0x4a   :  { %p7307_p1 = pnand %p7306_p0, %p7300_p11 }
  0x4c   :  { %7310 = shalt.err (!%p7307_p1)
}
  0x4d   :  { %s7420_s12 = smov 96   ;;  %s7421_s18 = smov 6  }
  0x4e   :  { %64 = dma.hbm_to_vmem [thread:$0]  %s7965_s3, 192, %s59_s30, [#allocation9], %s7420_s12, %s7420_s12, %s7421_s18  }
  0x4f   :  { %s7422_s19 = smov [#allocation13]   ;;  %s7423_s24 = smov [#allocation16]  }
  0x50   :  { %s86_s21 = sshll.u32 %s7422_s19, 4  ;;  %s112_s1 = sshll.u32 %s7423_s24, 4  ;;  %s87_s21 = int_to_ptr.vmem [resolvable:$true] %s86_s21  ;;  %s113_s1 = int_to_ptr.vmem [resolvable:$true] %s112_s1 }
  0x51   :  { %s7319_s20 = scalar_lea.vmem %s87_s21, 64  ;;  %p7324_p3 = scmp.lt.s32.totalorder %s87_s21, %s87_s21 }
  0x52   :  { %p7320_p2 = scmp.ne.s32.totalorder %s87_s21, %s7319_s20  ;;  %p7325_p4 = scmp.lt.s32.totalorder %s7319_s20, %s7319_s20 }
  0x54   :  { %p7326_p5 = por %p7325_p4, %p7324_p3 }
  0x56   :  { %p7327_p6 = pnand %p7326_p5, %p7320_p2 }
  0x58   :  { %7330 = shalt.err (!%p7327_p6)
}
  0x59   :  { %92 = dma.hbm_to_vmem [thread:$0]  %s7969_s7, 64, %s87_s21, [#allocation12], %s7417_s22, %s7417_s22, %s7418_s23  }
  0x5a   :  { %s7339_s3 = scalar_lea.vmem %s113_s1, 16384  ;;  %p7344_p8 = scmp.lt.s32.totalorder %s113_s1, %s113_s1 }
  0x5b   :  { %p7340_p7 = scmp.ne.s32.totalorder %s113_s1, %s7339_s3  ;;  %p7345_p9 = scmp.lt.s32.totalorder %s7339_s3, %s7339_s3 }
  0x5d   :  { %p7346_p10 = por %p7345_p9, %p7344_p8 }
  0x5f   :  { %p7347_p11 = pnand %p7346_p10, %p7340_p7 }
  0x61   :  { %7350 = shalt.err (!%p7347_p11)
}
  0x62   :  { %118 = dma.hbm_to_vmem [thread:$0]  %s7972_s10, 16384, %s113_s1, [#allocation15], %s7410_s25, %s7410_s25, %s7411_s26  }
  0x63   :  { %s7424_s29 = smov [#allocation19]  }
  0x64   :  { %s138_s30 = sshll.u32 %s7424_s29, 4  ;;  %s139_s30 = int_to_ptr.vmem [resolvable:$true] %s138_s30 }
  0x65   :  { %s7359_s17 = scalar_lea.vmem %s139_s30, 64  ;;  %p7364_p13 = scmp.lt.s32.totalorder %s139_s30, %s139_s30 }
  0x66   :  { %p7360_p12 = scmp.ne.s32.totalorder %s139_s30, %s7359_s17  ;;  %p7365_p0 = scmp.lt.s32.totalorder %s7359_s17, %s7359_s17 }
  0x68   :  { %p7366_p1 = por %p7365_p0, %p7364_p13 }
  0x6a   :  { %p7367_p2 = pnand %p7366_p1, %p7360_p12 }
  0x6c   :  { %7370 = shalt.err (!%p7367_p2)
}
  0x6d   :  { %144 = dma.hbm_to_vmem [thread:$0]  %s7975_s13, 64, %s139_s30, [#allocation18], %s7417_s22, %s7417_s22, %s7418_s23  }
  0x6e   :  { %7393 = dma.done.wait [#allocation6], 512  }
  0x6f   :  { %7394 = vsyncadd [#allocation6], 4294966784 }
  0x70   :  { %7395 = dma.done.wait [#allocation9], 24768  }
  0x71   :  { %7396 = vsyncadd [#allocation9], 4294942528 }
  0x72   :  { %7397 = dma.done.wait [#allocation12], 8256  }
  0x73   :  { %7398 = vsyncadd [#allocation12], 4294959040 }
  0x74   :  { %7399 = dma.done.wait [#allocation15], 32768  }
  0x75   :  { %7400 = vsyncadd [#allocation15], 4294934528 }
  0x76   :  { %7401 = dma.done.wait [#allocation18], 128  }
  0x77   :  { %7402 = vsyncadd [#allocation18], 4294967168  ;;  %v6363_v0 = vld [vmem:[#allocation8 + $0x154] ss:$24 sps:$4 sm:$0xff]   ;;  %v6367_v2 = vld [vmem:[#allocation8 + $0x150] ss:$24 sps:$4 sm:$0xff]  }
  0x78   :  { %v6365_v1 = vld [vmem:[#allocation8 + $0x15c] ss:$24 sps:$4 sm:$0xff]   ;;  %794 = vmatprep.subr.bf16.mxu0 %v6363_v0  ;;  %v6368_v3 = vld [vmem:[#allocation8 + $0x158] ss:$24 sps:$4 sm:$0xff]   ;;  %v6371_v5 = vld [vmem:[#allocation8 + $0x12c] ss:$24 sps:$4 sm:$0xff]  }
  0x79   :  { %837 = vmatprep.subr.bf16.mxu1 %v6365_v1  ;;  %v6369_v4 = vld [vmem:[#allocation8 + $0x124] ss:$24 sps:$4 sm:$0xff]   ;;  %795 = vmatpush1.bf16.msra.mxu0 %v6367_v2  ;;  %v6373_v6 = vld [vmem:[#allocation8 + $0x120] ss:$24 sps:$4 sm:$0xff]   ;;  %v6375_v8 = vld [vmem:[#allocation8 + $0xf4] ss:$24 sps:$4 sm:$0xff]  }
  0x7a   :  { %838 = vmatpush1.bf16.msra.mxu1 %v6368_v3  ;;  %796 = vmatprep.subr.bf16.mxu0 %v6369_v4  ;;  %v6374_v7 = vld [vmem:[#allocation8 + $0x128] ss:$24 sps:$4 sm:$0xff]   ;;  %v6377_v9 = vld [vmem:[#allocation8 + $0xfc] ss:$24 sps:$4 sm:$0xff]   ;;  %v6380_v11 = vld [vmem:[#allocation8 + $0xf8] ss:$24 sps:$4 sm:$0xff]  }
  0x7b   :  { %839 = vmatprep.subr.bf16.mxu1 %v6371_v5  ;;  %v6379_v10 = vld [vmem:[#allocation8 + $0xf0] ss:$24 sps:$4 sm:$0xff]   ;;  %v6381_v12 = vld [vmem:[#allocation8 + $0xc4] ss:$24 sps:$4 sm:$0xff]   ;;  %v6385_v14 = vld [vmem:[#allocation8 + $0xc0] ss:$24 sps:$4 sm:$0xff]  }
  0x7c   :  { %v6383_v13 = vld [vmem:[#allocation8 + $0xcc] ss:$24 sps:$4 sm:$0xff]   ;;  %v6386_v15 = vld [vmem:[#allocation8 + $0xc8] ss:$24 sps:$4 sm:$0xff]   ;;  %v6389_v17 = vld [vmem:[#allocation8 + $0x9c] ss:$24 sps:$4 sm:$0xff]  }
  0x7d   :  { %797 = vmatpush1.bf16.msra.mxu0 %v6373_v6  ;;  %v6387_v16 = vld [vmem:[#allocation8 + $0x94] ss:$24 sps:$4 sm:$0xff]   ;;  %v6391_v18 = vld [vmem:[#allocation8 + $0x90] ss:$24 sps:$4 sm:$0xff]   ;;  %v6393_v20 = vld [vmem:[#allocation8 + $0x64] ss:$24 sps:$4 sm:$0xff]  }
  0x7e   :  { %840 = vmatpush1.bf16.msra.mxu1 %v6374_v7  ;;  %798 = vmatprep.subr.bf16.mxu0 %v6375_v8  ;;  %v6392_v19 = vld [vmem:[#allocation8 + $0x98] ss:$24 sps:$4 sm:$0xff]   ;;  %v6395_v21 = vld [vmem:[#allocation8 + $0x6c] ss:$24 sps:$4 sm:$0xff]   ;;  %v6398_v23 = vld [vmem:[#allocation8 + $0x68] ss:$24 sps:$4 sm:$0xff]  }
  0x7f   :  { %841 = vmatprep.subr.bf16.mxu1 %v6377_v9  ;;  %v6397_v22 = vld [vmem:[#allocation8 + $0x60] ss:$24 sps:$4 sm:$0xff]   ;;  %v6399_v24 = vld [vmem:[#allocation8 + $0x34] ss:$24 sps:$4 sm:$0xff]   ;;  %v6403_v26 = vld [vmem:[#allocation8 + $0x30] ss:$24 sps:$4 sm:$0xff]  }
  0x80   :  { %v6401_v25 = vld [vmem:[#allocation8 + $0x3c] ss:$24 sps:$4 sm:$0xff]   ;;  %v6404_v27 = vld [vmem:[#allocation8 + $0x38] ss:$24 sps:$4 sm:$0xff]   ;;  %v6407_v29 = vld [vmem:[#allocation8 + $0xc] ss:$24 sps:$4 sm:$0xff]  }
  0x81   :  { %799 = vmatpush1.bf16.msra.mxu0 %v6379_v10  ;;  %v6405_v28 = vld [vmem:[#allocation8 + $0x4] ss:$24 sps:$4 sm:$0xff]   ;;  %v6409_v30 = vld [vmem:[#allocation8] ss:$24 sps:$4 sm:$0xff]   ;;  %v6411_v32 = vld [vmem:[#allocation8 + $0x2d4] ss:$24 sps:$4 sm:$0xff]  }
  0x82   :  { %842 = vmatpush1.bf16.msra.mxu1 %v6380_v11  ;;  %800 = vmatprep.subr.bf16.mxu0 %v6381_v12  ;;  %v6410_v31 = vld [vmem:[#allocation8 + $0x8] ss:$24 sps:$4 sm:$0xff]   ;;  %v6413_v33 = vld [vmem:[#allocation8 + $0x2dc] ss:$24 sps:$4 sm:$0xff]   ;;  %v6416_v35 = vld [vmem:[#allocation8 + $0x2d8] ss:$24 sps:$4 sm:$0xff]  }
  0x83   :  { %843 = vmatprep.subr.bf16.mxu1 %v6383_v13  ;;  %v6415_v34 = vld [vmem:[#allocation8 + $0x2d0] ss:$24 sps:$4 sm:$0xff]   ;;  %v6417_v36 = vld [vmem:[#allocation8 + $0x2a4] ss:$24 sps:$4 sm:$0xff]   ;;  %v6421_v38 = vld [vmem:[#allocation8 + $0x2a0] ss:$24 sps:$4 sm:$0xff]  }
  0x84   :  { %v6419_v37 = vld [vmem:[#allocation8 + $0x2ac] ss:$24 sps:$4 sm:$0xff]   ;;  %v6422_v39 = vld [vmem:[#allocation8 + $0x2a8] ss:$24 sps:$4 sm:$0xff]   ;;  %v6425_v41 = vld [vmem:[#allocation8 + $0x27c] ss:$24 sps:$4 sm:$0xff]  }
  0x85   :  { %801 = vmatpush1.bf16.msra.mxu0 %v6385_v14  ;;  %v6423_v40 = vld [vmem:[#allocation8 + $0x274] ss:$24 sps:$4 sm:$0xff]   ;;  %v6427_v42 = vld [vmem:[#allocation8 + $0x270] ss:$24 sps:$4 sm:$0xff]   ;;  %v6429_v44 = vld [vmem:[#allocation8 + $0x244] ss:$24 sps:$4 sm:$0xff]  }
  0x86   :  { %844 = vmatpush1.bf16.msra.mxu1 %v6386_v15  ;;  %802 = vmatprep.subr.bf16.mxu0 %v6387_v16  ;;  %v6428_v43 = vld [vmem:[#allocation8 + $0x278] ss:$24 sps:$4 sm:$0xff]   ;;  %v6431_v45 = vld [vmem:[#allocation8 + $0x24c] ss:$24 sps:$4 sm:$0xff]   ;;  %v6434_v48 = vld [vmem:[#allocation8 + $0x248] ss:$24 sps:$4 sm:$0xff]  }
  0x87   :  { %845 = vmatprep.subr.bf16.mxu1 %v6389_v17  ;;  %v173_v46 = vld [vmem:[#allocation5 + $0x8] sm:$0xff]  ;;  %v6433_v47 = vld [vmem:[#allocation8 + $0x240] ss:$24 sps:$4 sm:$0xff]   ;;  %v6437_v52 = vld [vmem:[#allocation8 + $0x21c] ss:$24 sps:$4 sm:$0xff]   ;;  %vm7426_vm0 = vmmov 0  }
  0x88   :  { %v175_v49 = vld [vmem:[#allocation5 + $0x18] sm:$0xff]  ;;  %v6435_v50 = vld [vmem:[#allocation8 + $0x214] ss:$24 sps:$4 sm:$0xff]   ;;  %v6439_v53 = vld [vmem:[#allocation8 + $0x210] ss:$24 sps:$4 sm:$0xff]   ;;  %s178_s10 = sld [smem:[#allocation4]] }
  0x89   :  { %803 = vmatpush1.bf16.msra.mxu0 %v6391_v18  ;;  %v185_v51 = vpack.c.bf16 %v175_v49, %v173_v46  ;;  %v6440_v54 = vld [vmem:[#allocation8 + $0x218] ss:$24 sps:$4 sm:$0xff]   ;;  %v6441_v55 = vld [vmem:[#allocation8 + $0x1e4] ss:$24 sps:$4 sm:$0xff]   ;;  %v6446_v58 = vld [vmem:[#allocation8 + $0x1e8] ss:$24 sps:$4 sm:$0xff]  }
  0x8a   :  { %846 = vmatpush1.bf16.msra.mxu1 %v6392_v19  ;;  %804 = vmatprep.subr.bf16.mxu0 %v6393_v20  ;;  %v6443_v56 = vld [vmem:[#allocation8 + $0x1ec] ss:$24 sps:$4 sm:$0xff]   ;;  %v6445_v57 = vld [vmem:[#allocation8 + $0x1e0] ss:$24 sps:$4 sm:$0xff]   ;;  %v6449_v60 = vld [vmem:[#allocation8 + $0x1bc] ss:$24 sps:$4 sm:$0xff]  }
  0x8b   :  { %847 = vmatprep.subr.bf16.mxu1 %v6395_v21  ;;  %826 = vmatprep.mubr.bf16.mxu0 %v185_v51  ;;  %v6447_v59 = vld [vmem:[#allocation8 + $0x1b4] ss:$24 sps:$4 sm:$0xff]   ;;  %v6451_v61 = vld [vmem:[#allocation8 + $0x1b0] ss:$24 sps:$4 sm:$0xff]   ;;  %v6453_v63 = vld [vmem:[#allocation8 + $0x184] ss:$24 sps:$4 sm:$0xff]  }
  0x8c   :  { %869 = vmatprep.mubr.bf16.mxu1 %v185_v51  ;;  %v6452_v62 = vld [vmem:[#allocation8 + $0x1b8] ss:$24 sps:$4 sm:$0xff]   ;;  %v6455_v0 = vld [vmem:[#allocation8 + $0x18c] ss:$24 sps:$4 sm:$0xff]   ;;  %v6458_v2 = vld [vmem:[#allocation8 + $0x188] ss:$24 sps:$4 sm:$0xff]  }
  0x8d   :  { %805 = vmatpush1.bf16.msra.mxu0 %v6397_v22  ;;  %v6457_v1 = vld [vmem:[#allocation8 + $0x180] ss:$24 sps:$4 sm:$0xff]   ;;  %v174_v4 = vld [vmem:[#allocation5 + $0x10] sm:$0xff]  ;;  %v6461_v5 = vld [vmem:[#allocation8 + $0x164] ss:$24 sps:$4 sm:$0xff]   ;;  %vm994_vm2 = vcmask 64512  }
  0x8e   :  { %848 = vmatpush1.bf16.msra.mxu1 %v6398_v23  ;;  %806 = vmatprep.subr.bf16.mxu0 %v6399_v24  ;;  %v172_v3 = vld [vmem:[#allocation5] sm:$0xff]  ;;  %v6464_v8 = vld [vmem:[#allocation8 + $0x134] ss:$24 sps:$4 sm:$0xff]   ;;  %v6462_v9 = vld [vmem:[#allocation8 + $0x130] ss:$24 sps:$4 sm:$0xff]   ;;  %s5703_s13 = sld [smem:[#allocation4 + $0x1]] }
  0x8f   :  { %849 = vmatprep.subr.bf16.mxu1 %v6401_v25  ;;  %v7554_v6 = vpack.c.bf16 %v174_v4, %v172_v3  ;;  %v6459_v7 = vld [vmem:[#allocation8 + $0x160] ss:$24 sps:$4 sm:$0xff]   ;;  %v6467_v10 = vld [vmem:[#allocation8 + $0x104] ss:$24 sps:$4 sm:$0xff]   ;;  %v6470_v12 = vld [vmem:[#allocation8 + $0xd4] ss:$24 sps:$4 sm:$0xff]  }
  0x90   :  { %v6465_v11 = vld [vmem:[#allocation8 + $0x100] ss:$24 sps:$4 sm:$0xff]   ;;  %v6468_v13 = vld [vmem:[#allocation8 + $0xd0] ss:$24 sps:$4 sm:$0xff]   ;;  %v6473_v14 = vld [vmem:[#allocation8 + $0xa4] ss:$24 sps:$4 sm:$0xff]  }
  0x91   :  { %807 = vmatpush1.bf16.msra.mxu0 %v6403_v26  ;;  %v6471_v15 = vld [vmem:[#allocation8 + $0xa0] ss:$24 sps:$4 sm:$0xff]   ;;  %v6476_v16 = vld [vmem:[#allocation8 + $0x74] ss:$24 sps:$4 sm:$0xff]   ;;  %v6474_v17 = vld [vmem:[#allocation8 + $0x70] ss:$24 sps:$4 sm:$0xff]  }
  0x92   :  { %850 = vmatpush1.bf16.msra.mxu1 %v6404_v27  ;;  %808 = vmatprep.subr.bf16.mxu0 %v6405_v28  ;;  %v6479_v18 = vld [vmem:[#allocation8 + $0x44] ss:$24 sps:$4 sm:$0xff]   ;;  %v6477_v19 = vld [vmem:[#allocation8 + $0x40] ss:$24 sps:$4 sm:$0xff]   ;;  %v6482_v20 = vld [vmem:[#allocation8 + $0x14] ss:$24 sps:$4 sm:$0xff]  }
  0x93   :  { %851 = vmatprep.subr.bf16.mxu1 %v6407_v29  ;;  %v6480_v21 = vld [vmem:[#allocation8 + $0x10] ss:$24 sps:$4 sm:$0xff]   ;;  %v6485_v22 = vld [vmem:[#allocation8 + $0x2e4] ss:$24 sps:$4 sm:$0xff]   ;;  %v6483_v23 = vld [vmem:[#allocation8 + $0x2e0] ss:$24 sps:$4 sm:$0xff]  }
  0x94   :  { %v6488_v24 = vld [vmem:[#allocation8 + $0x2b4] ss:$24 sps:$4 sm:$0xff]   ;;  %v6486_v25 = vld [vmem:[#allocation8 + $0x2b0] ss:$24 sps:$4 sm:$0xff]   ;;  %v6491_v26 = vld [vmem:[#allocation8 + $0x284] ss:$24 sps:$4 sm:$0xff]  }
  0x95   :  { %809 = vmatpush1.bf16.msra.mxu0 %v6409_v30  ;;  %v6489_v27 = vld [vmem:[#allocation8 + $0x280] ss:$24 sps:$4 sm:$0xff]   ;;  %v6494_v28 = vld [vmem:[#allocation8 + $0x254] ss:$24 sps:$4 sm:$0xff]   ;;  %v6492_v29 = vld [vmem:[#allocation8 + $0x250] ss:$24 sps:$4 sm:$0xff]  }
  0x96   :  { %852 = vmatpush1.bf16.msra.mxu1 %v6410_v31  ;;  %810 = vmatprep.subr.bf16.mxu0 %v6411_v32  ;;  %v6497_v30 = vld [vmem:[#allocation8 + $0x224] ss:$24 sps:$4 sm:$0xff]   ;;  %v6495_v31 = vld [vmem:[#allocation8 + $0x220] ss:$24 sps:$4 sm:$0xff]   ;;  %v6500_v32 = vld [vmem:[#allocation8 + $0x1f4] ss:$24 sps:$4 sm:$0xff]  }
  0x97   :  { %853 = vmatprep.subr.bf16.mxu1 %v6413_v33  ;;  %v6498_v33 = vld [vmem:[#allocation8 + $0x1f0] ss:$24 sps:$4 sm:$0xff]  }
  0x99   :  { %811 = vmatpush2.bf16.msra.mxu0 %v6415_v34  ;;  %v6503_v34 = vld [vmem:[#allocation8 + $0x1c4] ss:$24 sps:$4 sm:$0xff]  }
  0x9a   :  { %854 = vmatpush2.bf16.msra.mxu1 %v6416_v35  ;;  %812 = vmatprep.subr.bf16.mxu0 %v6417_v36  ;;  %v6501_v35 = vld [vmem:[#allocation8 + $0x1c0] ss:$24 sps:$4 sm:$0xff]   ;;  %v6506_v36 = vld [vmem:[#allocation8 + $0x194] ss:$24 sps:$4 sm:$0xff]  }
  0x9b   :  { %855 = vmatprep.subr.bf16.mxu1 %v6419_v37  ;;  %v6504_v37 = vld [vmem:[#allocation8 + $0x190] ss:$24 sps:$4 sm:$0xff]  }
  0x9d   :  { %813 = vmatpush2.bf16.msra.mxu0 %v6421_v38  ;;  %v7425_v38 = vmov 0.0  }
  0x9e   :  { %856 = vmatpush2.bf16.msra.mxu1 %v6422_v39  ;;  %814 = vmatprep.subr.bf16.mxu0 %v6423_v40  ;;  %v176_v39 = vlaneseq }
  0x9f   :  { %857 = vmatprep.subr.bf16.mxu1 %v6425_v41 }
  0xa0   :  { %v7565_v40 = vshrl.u32 %v176_v39, 7 }
  0xa1   :  { %815 = vmatpush2.bf16.msra.mxu0 %v6427_v42  ;;  %v282_v42 = vld [vmem:[#allocation10] sm:$0x3f] }
  0xa2   :  { %858 = vmatpush2.bf16.msra.mxu1 %v6428_v43  ;;  %816 = vmatprep.subr.bf16.mxu0 %v6429_v44  ;;  %v7568_v41 = vsub.s32 2, %v7565_v40  ;;  %v7571_v43 = vsub.s32 0, %v7565_v40 }
  0xa3   :  { %859 = vmatprep.subr.bf16.mxu1 %v6431_v45 }
  0xa4   :  { %v7574_v44 = vrot.slane %v282_v42, %v7568_v41  ;;  %v287_v45 = vrot.slane %v282_v42, %v7571_v43 }
  0xa5   :  { %817 = vmatpush2.bf16.msra.mxu0 %v6433_v47 }
  0xa6   :  { %860 = vmatpush2.bf16.msra.mxu1 %v6434_v48  ;;  %818 = vmatprep.subr.bf16.mxu0 %v6435_v50  ;;  %v7578_v48 = vsub.s32 1, %v7565_v40 }
  0xa7   :  { %861 = vmatprep.subr.bf16.mxu1 %v6437_v52 }
  0xa9   :  { %819 = vmatpush2.bf16.msra.mxu0 %v6439_v53  ;;  %v291_v53 = vrot.slane %v282_v42, %v7578_v48 }
  0xaa   :  { %862 = vmatpush2.bf16.msra.mxu1 %v6440_v54  ;;  %820 = vmatprep.subr.bf16.mxu0 %v6441_v55 }
  0xab   :  { %863 = vmatprep.subr.bf16.mxu1 %v6443_v56 }
  0xad   :  { %821 = vmatpush2.bf16.msra.mxu0 %v6445_v57  ;;  %v302_v57 = vsub.s32 4, %v7565_v40 }
  0xae   :  { %864 = vmatpush2.bf16.msra.mxu1 %v6446_v58  ;;  %822 = vmatprep.subr.bf16.mxu0 %v6447_v59  ;;  %v306_v58 = vsub.s32 5, %v7565_v40 }
  0xaf   :  { %865 = vmatprep.subr.bf16.mxu1 %v6449_v60  ;;  %v303_v59 = vrot.slane %v282_v42, %v302_v57 }
  0xb0   :  { %v307_v60 = vrot.slane %v282_v42, %v306_v58 }
  0xb1   :  { %823 = vmatpush2.bf16.msra.mxu0 %v6451_v61 }
  0xb2   :  { %866 = vmatpush2.bf16.msra.mxu1 %v6452_v62  ;;  %824 = vmatprep.subr.bf16.mxu0 %v6453_v63 }
  0xb3   :  { %867 = vmatprep.subr.bf16.mxu1 %v6455_v0 }
  0xb5   :  { %825 = vmatpush2.bf16.msra.mxu0 %v6457_v1 }
  0xb6   :  { %868 = vmatpush2.bf16.msra.mxu1 %v6458_v2  ;;  %880 = vmatprep.subr.bf16.mxu0 %v6461_v5  ;;  %v7596_v5 = vand.u32 127, %v176_v39 }
  0xb7   :  { %6295 = vmatprep.subr.mxu1 %v7425_v38 }
  0xb8   :  { %827 = vmatmul.mubr.bf16.vlgmr.msra.gmra.mxu0 %v7554_v6 }
  0xb9   :  { %870 = vmatmul.mubr.bf16.vlgmr.msra.gmra.mxu1 %v7554_v6  ;;  %881 = vmatpush1.bf16.msra.mxu0 %v6459_v7 }
  0xba   :  { %912 = vmatprep.mubr.bf16.mxu0 %v185_v51  ;;  %882 = vmatprep.subr.bf16.mxu0 %v6464_v8 }
  0xbb   :  { %6297 = vmatprep.mubr.msk.f32.mxu1 %vm7426_vm0, %v7425_v38 }
  0xbd   :  { %883 = vmatpush1.bf16.msra.mxu0 %v6462_v9 }
  0xbe   :  { %884 = vmatprep.subr.bf16.mxu0 %v6467_v10 }
  0xc1   :  { %885 = vmatpush1.bf16.msra.mxu0 %v6465_v11 }
  0xc2   :  { %886 = vmatprep.subr.bf16.mxu0 %v6470_v12 }
  0xc5   :  { %887 = vmatpush1.bf16.msra.mxu0 %v6468_v13 }
  0xc6   :  { %888 = vmatprep.subr.bf16.mxu0 %v6473_v14 }
  0xc9   :  { %889 = vmatpush1.bf16.msra.mxu0 %v6471_v15 }
  0xca   :  { %890 = vmatprep.subr.bf16.mxu0 %v6476_v16 }
  0xcd   :  { %891 = vmatpush1.bf16.msra.mxu0 %v6474_v17 }
  0xce   :  { %892 = vmatprep.subr.bf16.mxu0 %v6479_v18  ;;  %v7608_v18 = vsub.s32 3, %v7565_v40 }
  0xd1   :  { %893 = vmatpush1.bf16.msra.mxu0 %v6477_v19  ;;  %v7611_v19 = vrot.slane %v282_v42, %v7608_v18 }
  0xd2   :  { %894 = vmatprep.subr.bf16.mxu0 %v6482_v20 }
  0xd5   :  { %895 = vmatpush1.bf16.msra.mxu0 %v6480_v21 }
  0xd6   :  { %896 = vmatprep.subr.bf16.mxu0 %v6485_v22 }
  0xd9   :  { %897 = vmatpush2.bf16.msra.mxu0 %v6483_v23 }
  0xda   :  { %898 = vmatprep.subr.bf16.mxu0 %v6488_v24 }
  0xdd   :  { %899 = vmatpush2.bf16.msra.mxu0 %v6486_v25 }
  0xde   :  { %900 = vmatprep.subr.bf16.mxu0 %v6491_v26 }
  0xe1   :  { %901 = vmatpush2.bf16.msra.mxu0 %v6489_v27 }
  0xe2   :  { %902 = vmatprep.subr.bf16.mxu0 %v6494_v28 }
  0xe5   :  { %903 = vmatpush2.bf16.msra.mxu0 %v6492_v29 }
  0xe6   :  { %904 = vmatprep.subr.bf16.mxu0 %v6497_v30 }
  0xe9   :  { %905 = vmatpush2.bf16.msra.mxu0 %v6495_v31 }
  0xea   :  { %906 = vmatprep.subr.bf16.mxu0 %v6500_v32 }
  0xed   :  { %907 = vmatpush2.bf16.msra.mxu0 %v6498_v33 }
  0xee   :  { %908 = vmatprep.subr.bf16.mxu0 %v6503_v34 }
  0xf1   :  { %909 = vmatpush2.bf16.msra.mxu0 %v6501_v35 }
  0xf2   :  { %910 = vmatprep.subr.bf16.mxu0 %v6506_v36 }
  0xf5   :  { %911 = vmatpush2.bf16.msra.mxu0 %v6504_v37 }
  0xf6   :  { %6260 = vmatprep.subr.mxu0 %v7425_v38 }
  0xf8   :  { %913 = vmatmul.mubr.bf16.vlgmr.msra.gmra.mxu0 %v7554_v6  ;;  %v179_v6 = vstv %s178_s10 }
  0xf9   :  { %6262 = vmatprep.mubr.msk.f32.mxu0 %vm7426_vm0, %v7425_v38  ;;  %vm7599_vm1 = vcmp.lt.s32.totalorder %v7596_v5, %v179_v6 }
 0x178   :  { %v828_v46 = vpop.f32.mrf.mxu0 }
 0x179   :  { %v871_v47 = vpop.f32.mrf.mxu1  ;;  %v829_v50 = vadd.f32 %v828_v46, %v287_v45  ;;  %v182_v46 = vstv %s5703_s13 }
 0x17a   :  { %v872_v49 = vadd.f32 %v871_v47, %v7574_v44  ;;  %v830_v51 = vpop.f32.mrf.mxu0  ;;  %vm7639_vm3 = vcmp.lt.s32.totalorder %v7596_v5, %v182_v46  ;;  %v6542_v46 = vld [vmem:[#allocation11 + $0xc4] ss:$8 sps:$4 sm:$0xff]  }
 0x17b   :  { %v873_v20 = vpop.f32.mrf.mxu1  ;;  %v831_v24 = vadd.f32 %v830_v51, %v291_v53 }
 0x17c   :  { %6261 = vmatpush3.xpose.msra.mxu0 %v872_v49  ;;  %v832_v52 = vpop.f32.mrf.mxu0  ;;  %v874_v23 = vadd.f32 %v873_v20, %v7611_v19  ;;  %v6512_v20 = vld [vmem:[#allocation11 + $0x64] ss:$8 sps:$4 sm:$0xff]   ;;  %v6894_v49 = vld [vmem:[#allocation11 + $0x160] ss:$8 sps:$4 sm:$0xff]  }
 0x17d   :  { %6265 = vmatprep.subr.mxu0 %v7425_v38  ;;  %v7583_v54 = vadd.f32 %v832_v52, %v287_v45  ;;  %v875_v37 = vpop.f32.mrf.mxu1 }
 0x17e   :  { %v834_v55 = vpop.f32.mrf.mxu0  ;;  %v876_v45 = vadd.f32 %v875_v37, %v7574_v44  ;;  %v6536_v37 = vld [vmem:[#allocation11 + $0xe4] ss:$8 sps:$4 sm:$0xff]  }
 0x17f   :  { %6263 = vmatmul.mubr.f32.vlgmr.msra.gmra.mxu0 %v829_v50  ;;  %v7585_v56 = vadd.f32 %v834_v55, %v291_v53 }
 0x180   :  { %6267 = vmatprep.mubr.msk.f32.mxu0 %vm7426_vm0, %v7425_v38 }
 0x1b8   :  { %v914_v61 = vpop.f32.mrf.mxu0 }
 0x1b9   :  { %v915_v62 = vadd.f32 %v914_v61, %v303_v59 }
 0x1ba   :  { %v916_v63 = vpop.f32.mrf.mxu0 }
 0x1bb   :  { %v917_v0 = vadd.f32 %v916_v63, %v307_v60  ;;  %6266 = vmatpush3.msra.mxu0 %v915_v62  ;;  %v877_v63 = vpop.f32.mrf.mxu1 }
 0x1bc   :  { %v918_v1 = vpop.f32.mrf.mxu0  ;;  %6270 = vmatprep.subr.mxu0 %v7425_v38 }
 0x1bd   :  { %v919_v2 = vadd.f32 %v918_v1, %v303_v59 }
 0x1be   :  { %v920_v3 = vpop.f32.mrf.mxu0 }
 0x1bf   :  { %v921_v4 = vadd.f32 %v920_v3, %v307_v60 }
 0x1c1   :  { %6296 = vmatpush3.msra.mxu1 %v921_v4 }
 0x23f   :  { %v989_v8 = vpop.f32.mrf.mxu0 }
 0x240   :  { %v993_v9 = vsel %vm7599_vm1, %v989_v8, -1000000.0 }
 0x241   :  { %v6264_v10 = vpop.f32.mrf.mxu0  ;;  %v995_v11 = vsel %vm994_vm2, %v993_v9, -inf }
 0x242   :  { %996 = vmax.xlane.f32.xlu0 %v995_v11 }
 0x2cb   :  { %v997_v12 = vpop.xlane.xlu0 %996 }
 0x2cc   :  { %v998_v13 = vsub.f32 %v993_v9, %v997_v12 }
 0x2ce   :  { %v999_v14 = vmul.f32 1.442695, %v998_v13 }
 0x2d0   :  { %7131 = vpow2.f32 %v999_v14 }
 0x2dd   :  { %v7132_v15 = vpop.eup %7131 }
 0x2de   :  { %v1001_v16 = vsel %vm994_vm2, %v7132_v15, 0.0 }
 0x2df   :  { %1002 = vadd.xlane.f32.xlu0 %v1001_v16 }
 0x368   :  { %v1003_v17 = vpop.xlane.xlu0 %1002 }
 0x369   :  { %7133 = vrcp.f32 %v1003_v17  ;;  %v6507_v17 = vld [vmem:[#allocation11 + $0x70] ss:$8 sps:$4 sm:$0xff]  }
 0x376   :  { %v7134_v21 = vpop.eup %7133 }
 0x377   :  { %v1005_v22 = vmul.f32 %v7134_v21, %v7132_v15  ;;  %v6510_v21 = vld [vmem:[#allocation11 + $0x60] ss:$8 sps:$4 sm:$0xff]  }
 0x379   :  { %6268 = vmatmul.mubr.msk.f32.vlgmr.msra.gmra.mxu0 %vm994_vm2, %v1005_v22  ;;  %v6515_v22 = vld [vmem:[#allocation11 + $0x54] ss:$8 sps:$4 sm:$0xff]  }
 0x37a   :  { %6271 = vmatpush3.xpose.msra.mxu0 %v874_v23  ;;  %6272 = vmatprep.mubr.msk.f32.mxu0 %vm7426_vm0, %v7425_v38  ;;  %v6513_v23 = vld [vmem:[#allocation11 + $0x50] ss:$8 sps:$4 sm:$0xff]  }
 0x37b   :  { %6275 = vmatprep.subr.mxu0 %v7425_v38 }
 0x37d   :  { %6273 = vmatmul.mubr.f32.vlgmr.msra.gmra.mxu0 %v831_v24  ;;  %v6518_v24 = vld [vmem:[#allocation11 + $0x44] ss:$8 sps:$4 sm:$0xff]  }
 0x37e   :  { %6276 = vmatpush3.msra.mxu0 %v917_v0  ;;  %6277 = vmatprep.mubr.msk.f32.mxu0 %vm7426_vm0, %v7425_v38 }
 0x37f   :  { %6280 = vmatprep.subr.mxu0 %v7425_v38 }
 0x439   :  { %v7621_v25 = vpop.f32.mrf.mxu0 }
 0x43b   :  { %v6269_v26 = vpop.f32.mrf.mxu0 }
 0x43c   :  { %v6516_v26 = vld [vmem:[#allocation11 + $0x40] ss:$8 sps:$4 sm:$0xff]  }
 0x43d   :  { %v1146_v27 = vpop.f32.mrf.mxu0 }
 0x43e   :  { %v1150_v28 = vsel %vm7599_vm1, %v1146_v27, -1000000.0  ;;  %v6521_v27 = vld [vmem:[#allocation11 + $0x34] ss:$8 sps:$4 sm:$0xff]  }
 0x43f   :  { %v6274_v29 = vpop.f32.mrf.mxu0  ;;  %v1151_v30 = vsel %vm994_vm2, %v1150_v28, -inf }
 0x440   :  { %1152 = vmax.xlane.f32.xlu1 %v1151_v30  ;;  %v6524_v29 = vld [vmem:[#allocation11 + $0x24] ss:$8 sps:$4 sm:$0xff]   ;;  %v6522_v30 = vld [vmem:[#allocation11 + $0x20] ss:$8 sps:$4 sm:$0xff]  }
 0x4c9   :  { %v1153_v31 = vpop.xlane.xlu1 %1152 }
 0x4ca   :  { %v1154_v32 = vsub.f32 %v1150_v28, %v1153_v31  ;;  %v6519_v28 = vld [vmem:[#allocation11 + $0x30] ss:$8 sps:$4 sm:$0xff]   ;;  %v6527_v31 = vld [vmem:[#allocation11 + $0x14] ss:$8 sps:$4 sm:$0xff]  }
 0x4cc   :  { %v1155_v33 = vmul.f32 1.442695, %v1154_v32  ;;  %v6525_v32 = vld [vmem:[#allocation11 + $0x10] ss:$8 sps:$4 sm:$0xff]  }
 0x4ce   :  { %7135 = vpow2.f32 %v1155_v33  ;;  %v6530_v33 = vld [vmem:[#allocation11 + $0x4] ss:$8 sps:$4 sm:$0xff]  }
 0x4db   :  { %v7136_v34 = vpop.eup %7135 }
 0x4dc   :  { %v1157_v35 = vsel %vm994_vm2, %v7136_v34, 0.0 }
 0x4dd   :  { %1158 = vadd.xlane.f32.xlu1 %v1157_v35  ;;  %v6533_v35 = vld [vmem:[#allocation11 + $0xf4] ss:$8 sps:$4 sm:$0xff]  }
 0x566   :  { %v1159_v36 = vpop.xlane.xlu1 %1158 }
 0x567   :  { %7137 = vrcp.f32 %v1159_v36  ;;  %v6531_v36 = vld [vmem:[#allocation11 + $0xf0] ss:$8 sps:$4 sm:$0xff]  }
 0x574   :  { %v7138_v39 = vpop.eup %7137 }
 0x575   :  { %v1161_v42 = vmul.f32 %v7138_v39, %v7136_v34  ;;  %v6528_v34 = vld [vmem:[#allocation11] ss:$8 sps:$4 sm:$0xff]  }
 0x576   :  { %v6534_v39 = vld [vmem:[#allocation11 + $0xe0] ss:$8 sps:$4 sm:$0xff]  }
 0x577   :  { %6278 = vmatmul.mubr.msk.f32.vlgmr.msra.gmra.mxu0 %vm994_vm2, %v1161_v42  ;;  %v6539_v42 = vld [vmem:[#allocation11 + $0xd4] ss:$8 sps:$4 sm:$0xff]  }
 0x578   :  { %6281 = vmatpush3.xpose.msra.mxu0 %v876_v45  ;;  %6282 = vmatprep.mubr.msk.f32.mxu0 %vm7426_vm0, %v7425_v38  ;;  %v6537_v45 = vld [vmem:[#allocation11 + $0xd0] ss:$8 sps:$4 sm:$0xff]  }
 0x579   :  { %6285 = vmatprep.subr.mxu0 %v7425_v38 }
 0x57b   :  { %6283 = vmatmul.mubr.f32.vlgmr.msra.gmra.mxu0 %v7583_v54 }
 0x57c   :  { %6286 = vmatpush3.msra.mxu0 %v919_v2  ;;  %6287 = vmatprep.mubr.msk.f32.mxu0 %vm7426_vm0, %v7425_v38  ;;  %v878_v2 = vadd.f32 %v877_v63, %v7611_v19 }
 0x57d   :  { %6290 = vmatprep.subr.mxu0 %v7425_v38 }
 0x637   :  { %v7636_v47 = vpop.f32.mrf.mxu0 }
 0x639   :  { %v6279_v44 = vpop.f32.mrf.mxu0 }
 0x63a   :  { %v6540_v44 = vld [vmem:[#allocation11 + $0xc0] ss:$8 sps:$4 sm:$0xff]  }
 0x63b   :  { %v1302_v50 = vpop.f32.mrf.mxu0 }
 0x63c   :  { %v1306_v51 = vsel %vm7639_vm3, %v1302_v50, -1000000.0  ;;  %v6545_v50 = vld [vmem:[#allocation11 + $0xb4] ss:$8 sps:$4 sm:$0xff]  }
 0x63d   :  { %v6284_v52 = vpop.f32.mrf.mxu0  ;;  %v1307_v53 = vsel %vm994_vm2, %v1306_v51, -inf }
 0x63e   :  { %1308 = vmax.xlane.f32.xlu0 %v1307_v53  ;;  %v6548_v52 = vld [vmem:[#allocation11 + $0xa4] ss:$8 sps:$4 sm:$0xff]   ;;  %v6546_v53 = vld [vmem:[#allocation11 + $0xa0] ss:$8 sps:$4 sm:$0xff]  }
 0x6c7   :  { %v1309_v54 = vpop.xlane.xlu0 %1308 }
 0x6c8   :  { %v1310_v55 = vsub.f32 %v1306_v51, %v1309_v54  ;;  %v6543_v51 = vld [vmem:[#allocation11 + $0xb0] ss:$8 sps:$4 sm:$0xff]   ;;  %v6551_v54 = vld [vmem:[#allocation11 + $0x94] ss:$8 sps:$4 sm:$0xff]  }
 0x6ca   :  { %v1311_v59 = vmul.f32 1.442695, %v1310_v55  ;;  %v6549_v55 = vld [vmem:[#allocation11 + $0x90] ss:$8 sps:$4 sm:$0xff]  }
 0x6cc   :  { %7139 = vpow2.f32 %v1311_v59  ;;  %v6554_v59 = vld [vmem:[#allocation11 + $0x84] ss:$8 sps:$4 sm:$0xff]  }
 0x6d9   :  { %v7140_v60 = vpop.eup %7139 }
 0x6da   :  { %v1313_v61 = vsel %vm994_vm2, %v7140_v60, 0.0 }
 0x6db   :  { %1314 = vadd.xlane.f32.xlu1 %v1313_v61 }
 0x764   :  { %v1315_v62 = vpop.xlane.xlu1 %1314 }
 0x765   :  { %7141 = vrcp.f32 %v1315_v62 }
 0x772   :  { %v7142_v0 = vpop.eup %7141 }
 0x773   :  { %v1317_v1 = vmul.f32 %v7142_v0, %v7140_v60  ;;  %v6552_v60 = vld [vmem:[#allocation11 + $0x80] ss:$8 sps:$4 sm:$0xff]  }
 0x775   :  { %6288 = vmatmul.mubr.msk.f32.vlgmr.msra.gmra.mxu0 %vm994_vm2, %v1317_v1  ;;  %v1586_v1 = vld [vmem:[%s7967_s5] sm:$0x3] }
 0x776   :  { %6291 = vmatpush3.xpose.msra.mxu0 %v878_v2  ;;  %6292 = vmatprep.mubr.msk.f32.mxu0 %vm7426_vm0, %v7425_v38  ;;  %v1591_v2 = vrot.slane %v1586_v1, %v7571_v43 }
 0x779   :  { %6293 = vmatmul.mubr.f32.vlgmr.msra.gmra.mxu0 %v7585_v56  ;;  %v6509_v56 = vld [vmem:[#allocation11 + $0x74] ss:$8 sps:$4 sm:$0xff]  }
 0x77a   :  { %1758 = vmatprep.subr.bf16.mxu1 %v6509_v56 }
 0x835   :  { %v7652_v3 = vpop.f32.mrf.mxu0 }
 0x836   :  { %v1552_v63 = vpack.c.bf16 %v7652_v3, %v7621_v25  ;;  %v7180_v25 = vld [vmem:[#allocation5 + $0x8] sm:$0xff] }
 0x837   :  { %v6289_v4 = vpop.f32.mrf.mxu0 }
 0x838   :  { %v1595_v4 = vrot.slane %v1586_v1, %v7578_v48  ;;  %v6608_v1 = vld [vmem:[#allocation14 + $0x1ec] ss:$16 sps:$4 sm:$0xff]  }
 0x839   :  { %v1458_v5 = vpop.f32.mrf.mxu0 }
 0x83a   :  { %v1462_v6 = vsel %vm7639_vm3, %v1458_v5, -1000000.0 }
 0x83b   :  { %v6294_v8 = vpop.f32.mrf.mxu0  ;;  %v1463_v9 = vsel %vm994_vm2, %v1462_v6, -inf }
 0x83c   :  { %1464 = vmax.xlane.f32.xlu0 %v1463_v9 }
 0x8c5   :  { %v1465_v10 = vpop.xlane.xlu0 %1464 }
 0x8c6   :  { %v1466_v11 = vsub.f32 %v1462_v6, %v1465_v10 }
 0x8c8   :  { %v1467_v12 = vmul.f32 1.442695, %v1466_v11 }
 0x8ca   :  { %7143 = vpow2.f32 %v1467_v12 }
 0x8d7   :  { %v7144_v13 = vpop.eup %7143 }
 0x8d8   :  { %v1469_v14 = vsel %vm994_vm2, %v7144_v13, 0.0 }
 0x8d9   :  { %1470 = vadd.xlane.f32.xlu1 %v1469_v14 }
 0x962   :  { %v1471_v15 = vpop.xlane.xlu1 %1470 }
 0x963   :  { %7145 = vrcp.f32 %v1471_v15  ;;  %v7181_v15 = vld [vmem:[#allocation5 + $0x10] sm:$0xff] }
 0x970   :  { %v7146_v16 = vpop.eup %7145 }
 0x971   :  { %v1473_v19 = vmul.f32 %v7146_v16, %v7144_v13 }
 0x973   :  { %6298 = vmatmul.mubr.msk.f32.vlgmr.msra.gmra.mxu1 %vm994_vm2, %v1473_v19 }
 0x974   :  { %1759 = vmatpush1.bf16.msra.mxu1 %v6507_v17  ;;  %v7182_v17 = vld [vmem:[#allocation5 + $0x18] sm:$0xff] }
 0x975   :  { %1760 = vmatprep.subr.bf16.mxu1 %v6512_v20 }
 0x978   :  { %1761 = vmatpush1.bf16.msra.mxu1 %v6510_v21  ;;  %v6555_v21 = vld [vmem:[#allocation14 + $0xe0] ss:$16 sps:$4 sm:$0xff]  }
 0x979   :  { %1762 = vmatprep.subr.bf16.mxu1 %v6515_v22  ;;  %v6557_v22 = vld [vmem:[#allocation14 + $0xe4] ss:$16 sps:$4 sm:$0xff]  }
 0x97a   :  { %2278 = vmatprep.subr.bf16.mxu0 %v6557_v22  ;;  %v6612_v22 = vld [vmem:[#allocation14 + $0x1c8] ss:$16 sps:$4 sm:$0xff]  }
 0x97b   :  { %2279 = vmatpush1.bf16.msra.mxu0 %v6555_v21  ;;  %v6609_v21 = vld [vmem:[#allocation14 + $0x1c0] ss:$16 sps:$4 sm:$0xff]  }
 0x97c   :  { %1763 = vmatpush1.bf16.msra.mxu1 %v6513_v23  ;;  %v6558_v23 = vld [vmem:[#allocation14 + $0xe8] ss:$16 sps:$4 sm:$0xff]  }
 0x97d   :  { %1764 = vmatprep.subr.bf16.mxu1 %v6518_v24  ;;  %v6560_v24 = vld [vmem:[#allocation14 + $0xec] ss:$16 sps:$4 sm:$0xff]  }
 0x980   :  { %1765 = vmatpush1.bf16.msra.mxu1 %v6516_v26  ;;  %v6563_v26 = vld [vmem:[#allocation14 + $0xc4] ss:$16 sps:$4 sm:$0xff]  }
 0x981   :  { %1766 = vmatprep.subr.bf16.mxu1 %v6521_v27  ;;  %v6566_v27 = vld [vmem:[#allocation14 + $0xcc] ss:$16 sps:$4 sm:$0xff]   ;;  %2280 = vmatprep.subr.bf16.mxu0 %v6563_v26  ;;  %v6623_v26 = vld [vmem:[#allocation14 + $0x184] ss:$16 sps:$4 sm:$0xff]  }
 0x984   :  { %1767 = vmatpush1.bf16.msra.mxu1 %v6519_v28  ;;  %v6561_v28 = vld [vmem:[#allocation14 + $0xc0] ss:$16 sps:$4 sm:$0xff]  }
 0x985   :  { %1768 = vmatprep.subr.bf16.mxu1 %v6524_v29  ;;  %v6564_v29 = vld [vmem:[#allocation14 + $0xc8] ss:$16 sps:$4 sm:$0xff]   ;;  %2281 = vmatpush1.bf16.msra.mxu0 %v6561_v28 }
 0x986   :  { %v6624_v28 = vld [vmem:[#allocation14 + $0x188] ss:$16 sps:$4 sm:$0xff]  }
 0x988   :  { %1769 = vmatpush1.bf16.msra.mxu1 %v6522_v30  ;;  %v6569_v30 = vld [vmem:[#allocation14 + $0xa4] ss:$16 sps:$4 sm:$0xff]  }
 0x989   :  { %1770 = vmatprep.subr.bf16.mxu1 %v6527_v31  ;;  %v6572_v31 = vld [vmem:[#allocation14 + $0xac] ss:$16 sps:$4 sm:$0xff]   ;;  %2282 = vmatprep.subr.bf16.mxu0 %v6569_v30  ;;  %v6629_v30 = vld [vmem:[#allocation14 + $0x164] ss:$16 sps:$4 sm:$0xff]  }
 0x98c   :  { %1771 = vmatpush1.bf16.msra.mxu1 %v6525_v32  ;;  %v6567_v32 = vld [vmem:[#allocation14 + $0xa0] ss:$16 sps:$4 sm:$0xff]  }
 0x98d   :  { %1772 = vmatprep.subr.bf16.mxu1 %v6530_v33  ;;  %v6570_v33 = vld [vmem:[#allocation14 + $0xa8] ss:$16 sps:$4 sm:$0xff]   ;;  %2283 = vmatpush1.bf16.msra.mxu0 %v6567_v32  ;;  %v6627_v32 = vld [vmem:[#allocation14 + $0x160] ss:$16 sps:$4 sm:$0xff]  }
 0x990   :  { %1773 = vmatpush1.bf16.msra.mxu1 %v6528_v34  ;;  %v6575_v34 = vld [vmem:[#allocation14 + $0x84] ss:$16 sps:$4 sm:$0xff]  }
 0x991   :  { %1774 = vmatprep.subr.bf16.mxu1 %v6533_v35  ;;  %v6578_v35 = vld [vmem:[#allocation14 + $0x8c] ss:$16 sps:$4 sm:$0xff]   ;;  %2284 = vmatprep.subr.bf16.mxu0 %v6575_v34  ;;  %v6635_v34 = vld [vmem:[#allocation14 + $0x144] ss:$16 sps:$4 sm:$0xff]  }
 0x994   :  { %1775 = vmatpush2.bf16.msra.mxu1 %v6531_v36  ;;  %v6573_v36 = vld [vmem:[#allocation14 + $0x80] ss:$16 sps:$4 sm:$0xff]  }
 0x995   :  { %1776 = vmatprep.subr.bf16.mxu1 %v6536_v37  ;;  %v6576_v37 = vld [vmem:[#allocation14 + $0x88] ss:$16 sps:$4 sm:$0xff]   ;;  %2285 = vmatpush1.bf16.msra.mxu0 %v6573_v36  ;;  %v6633_v36 = vld [vmem:[#allocation14 + $0x140] ss:$16 sps:$4 sm:$0xff]  }
 0x998   :  { %1777 = vmatpush2.bf16.msra.mxu1 %v6534_v39  ;;  %v6581_v39 = vld [vmem:[#allocation14 + $0x64] ss:$16 sps:$4 sm:$0xff]  }
 0x999   :  { %1778 = vmatprep.subr.bf16.mxu1 %v6539_v42  ;;  %v6584_v42 = vld [vmem:[#allocation14 + $0x6c] ss:$16 sps:$4 sm:$0xff]   ;;  %2286 = vmatprep.subr.bf16.mxu0 %v6581_v39  ;;  %v6641_v39 = vld [vmem:[#allocation14 + $0x124] ss:$16 sps:$4 sm:$0xff]  }
 0x99c   :  { %1779 = vmatpush2.bf16.msra.mxu1 %v6537_v45  ;;  %v6579_v45 = vld [vmem:[#allocation14 + $0x60] ss:$16 sps:$4 sm:$0xff]  }
 0x99d   :  { %1780 = vmatprep.subr.bf16.mxu1 %v6542_v46  ;;  %v6582_v46 = vld [vmem:[#allocation14 + $0x68] ss:$16 sps:$4 sm:$0xff]   ;;  %2287 = vmatpush1.bf16.msra.mxu0 %v6579_v45  ;;  %v6639_v45 = vld [vmem:[#allocation14 + $0x120] ss:$16 sps:$4 sm:$0xff]  }
 0x9a0   :  { %1781 = vmatpush2.bf16.msra.mxu1 %v6540_v44  ;;  %v6587_v44 = vld [vmem:[#allocation14 + $0x44] ss:$16 sps:$4 sm:$0xff]  }
 0x9a1   :  { %1782 = vmatprep.subr.bf16.mxu1 %v6545_v50  ;;  %v6590_v50 = vld [vmem:[#allocation14 + $0x4c] ss:$16 sps:$4 sm:$0xff]   ;;  %2288 = vmatprep.subr.bf16.mxu0 %v6587_v44  ;;  %v6647_v44 = vld [vmem:[#allocation14 + $0x104] ss:$16 sps:$4 sm:$0xff]  }
 0x9a4   :  { %1783 = vmatpush2.bf16.msra.mxu1 %v6543_v51  ;;  %v6585_v51 = vld [vmem:[#allocation14 + $0x40] ss:$16 sps:$4 sm:$0xff]  }
 0x9a5   :  { %1784 = vmatprep.subr.bf16.mxu1 %v6548_v52  ;;  %v6588_v52 = vld [vmem:[#allocation14 + $0x48] ss:$16 sps:$4 sm:$0xff]   ;;  %2289 = vmatpush1.bf16.msra.mxu0 %v6585_v51  ;;  %v6645_v51 = vld [vmem:[#allocation14 + $0x100] ss:$16 sps:$4 sm:$0xff]  }
 0x9a8   :  { %1785 = vmatpush2.bf16.msra.mxu1 %v6546_v53  ;;  %v6593_v53 = vld [vmem:[#allocation14 + $0x24] ss:$16 sps:$4 sm:$0xff]  }
 0x9a9   :  { %1786 = vmatprep.subr.bf16.mxu1 %v6551_v54  ;;  %v6596_v54 = vld [vmem:[#allocation14 + $0x2c] ss:$16 sps:$4 sm:$0xff]   ;;  %2290 = vmatprep.subr.bf16.mxu0 %v6593_v53 }
 0x9aa   :  { %v6653_v53 = vld [vmem:[#allocation16 + $0x74] ss:$8 sps:$4 sm:$0xff]  }
 0x9ac   :  { %1787 = vmatpush2.bf16.msra.mxu1 %v6549_v55  ;;  %v6591_v55 = vld [vmem:[#allocation14 + $0x20] ss:$16 sps:$4 sm:$0xff]  }
 0x9ad   :  { %1788 = vmatprep.subr.bf16.mxu1 %v6554_v59  ;;  %v6594_v59 = vld [vmem:[#allocation14 + $0x28] ss:$16 sps:$4 sm:$0xff]   ;;  %2291 = vmatpush1.bf16.msra.mxu0 %v6591_v55 }
 0x9b0   :  { %1789 = vmatpush2.bf16.msra.mxu1 %v6552_v60  ;;  %v6599_v60 = vld [vmem:[#allocation14 + $0x4] ss:$16 sps:$4 sm:$0xff]  }
 0x9b1   :  { %2321 = vmatprep.subr.bf16.mxu1 %v6560_v24  ;;  %2292 = vmatprep.subr.bf16.mxu0 %v6599_v60  ;;  %v6618_v24 = vld [vmem:[#allocation14 + $0x1a8] ss:$16 sps:$4 sm:$0xff]  }
 0xa33   :  { %v1543_v61 = vpop.f32.mrf.mxu1 }
 0xa34   :  { %v1553_v62 = vpack.c.bf16 %v1543_v61, %v7636_v47  ;;  %v7179_v47 = vld [vmem:[#allocation5] sm:$0xff]  ;;  %v6602_v61 = vld [vmem:[#allocation14 + $0xc] ss:$16 sps:$4 sm:$0xff]  }
 0xa35   :  { %v6299_v0 = vpop.f32.mrf.mxu1 }
 0xa36   :  { %1790 = vmatprep.mubr.bf16.mxu1 %v1553_v62  ;;  %v6597_v62 = vld [vmem:[#allocation14] ss:$16 sps:$4 sm:$0xff]   ;;  %v6605_v0 = vld [vmem:[#allocation14 + $0x1e4] ss:$16 sps:$4 sm:$0xff]  }
 0xa37   :  { %1791 = vmatmul.mubr.bf16.vlgmr.msra.gmra.mxu1 %v1552_v63  ;;  %v6600_v63 = vld [vmem:[#allocation14 + $0x8] ss:$16 sps:$4 sm:$0xff]   ;;  %2293 = vmatpush1.bf16.msra.mxu0 %v6597_v62 }
 0xa38   :  { %2322 = vmatpush1.bf16.msra.mxu1 %v6558_v23  ;;  %2294 = vmatprep.subr.bf16.mxu0 %v6605_v0  ;;  %v6615_v23 = vld [vmem:[#allocation14 + $0x1a0] ss:$16 sps:$4 sm:$0xff]  }
 0xa39   :  { %2323 = vmatprep.subr.bf16.mxu1 %v6566_v27  ;;  %v6621_v27 = vld [vmem:[#allocation14 + $0x180] ss:$16 sps:$4 sm:$0xff]  }
 0xa3a   :  { %v1805_v0 = vld [vmem:[%s7968_s6] sm:$0x3] }
 0xa3c   :  { %2324 = vmatpush1.bf16.msra.mxu1 %v6564_v29  ;;  %v6626_v29 = vld [vmem:[#allocation14 + $0x18c] ss:$16 sps:$4 sm:$0xff]  }
 0xa3d   :  { %2325 = vmatprep.subr.bf16.mxu1 %v6572_v31  ;;  %v6632_v31 = vld [vmem:[#allocation14 + $0x16c] ss:$16 sps:$4 sm:$0xff]  }
 0xa40   :  { %2326 = vmatpush1.bf16.msra.mxu1 %v6570_v33  ;;  %v6630_v33 = vld [vmem:[#allocation14 + $0x168] ss:$16 sps:$4 sm:$0xff]  }
 0xa41   :  { %2327 = vmatprep.subr.bf16.mxu1 %v6578_v35  ;;  %v6638_v35 = vld [vmem:[#allocation14 + $0x14c] ss:$16 sps:$4 sm:$0xff]  }
 0xa44   :  { %2328 = vmatpush1.bf16.msra.mxu1 %v6576_v37  ;;  %v6636_v37 = vld [vmem:[#allocation14 + $0x148] ss:$16 sps:$4 sm:$0xff]  }
 0xa45   :  { %2329 = vmatprep.subr.bf16.mxu1 %v6584_v42  ;;  %v6644_v42 = vld [vmem:[#allocation14 + $0x12c] ss:$16 sps:$4 sm:$0xff]  }
 0xa48   :  { %2330 = vmatpush1.bf16.msra.mxu1 %v6582_v46  ;;  %v6642_v46 = vld [vmem:[#allocation14 + $0x128] ss:$16 sps:$4 sm:$0xff]  }
 0xa49   :  { %2331 = vmatprep.subr.bf16.mxu1 %v6590_v50  ;;  %v6650_v50 = vld [vmem:[#allocation14 + $0x10c] ss:$16 sps:$4 sm:$0xff]  }
 0xa4c   :  { %2332 = vmatpush1.bf16.msra.mxu1 %v6588_v52  ;;  %v6648_v52 = vld [vmem:[#allocation14 + $0x108] ss:$16 sps:$4 sm:$0xff]  }
 0xa4d   :  { %2333 = vmatprep.subr.bf16.mxu1 %v6596_v54  ;;  %v6656_v54 = vld [vmem:[#allocation16 + $0x174] ss:$8 sps:$4 sm:$0xff]  }
 0xa50   :  { %2334 = vmatpush1.bf16.msra.mxu1 %v6594_v59 }
 0xa51   :  { %2335 = vmatprep.subr.bf16.mxu1 %v6602_v61 }
 0xa54   :  { %2336 = vmatpush1.bf16.msra.mxu1 %v6600_v63 }
 0xa55   :  { %2337 = vmatprep.subr.bf16.mxu1 %v6608_v1 }
 0xaf7   :  { %v1792_v5 = vpop.f32.mrf.mxu1 }
 0xaf8   :  { %v1793_v6 = vadd.f32 %v1792_v5, %v1591_v2 }
 0xaf9   :  { %v1794_v8 = vpop.f32.mrf.mxu1 }
 0xafa   :  { %v1795_v9 = vadd.f32 %v1794_v8, %v1595_v4  ;;  %v7667_v11 = vadd.f32 %v7179_v47, %v1793_v6 }
 0xafb   :  { %v1796_v10 = vpop.f32.mrf.mxu1 }
 0xafc   :  { %v7669_v3 = vadd.f32 %v7180_v25, %v1795_v9  ;;  %v1797_v12 = vadd.f32 %v1796_v10, %v1591_v2  ;;  %v6603_v2 = vld [vmem:[#allocation14 + $0x1e0] ss:$16 sps:$4 sm:$0xff]  }
 0xafd   :  { %v1798_v13 = vpop.f32.mrf.mxu1  ;;  %2295 = vmatpush2.bf16.msra.mxu0 %v6603_v2  ;;  %v1806_v2 = vld [vmem:[#allocation13] sm:$0x3] }
 0xafe   :  { %v1799_v14 = vadd.f32 %v1798_v13, %v1595_v4  ;;  %v1807_v56 = vadd.f32 %v7669_v3, %v7667_v11  ;;  %v7673_v16 = vadd.f32 %v7181_v15, %v1797_v12  ;;  %v6606_v4 = vld [vmem:[#allocation14 + $0x1e8] ss:$16 sps:$4 sm:$0xff]  }
 0xaff   :  { %2338 = vmatpush2.bf16.msra.mxu1 %v6606_v4 }
 0xb00   :  { %v7675_v19 = vadd.f32 %v7182_v17, %v1799_v14  ;;  %1808 = vadd.xlane.f32.xlu0 %v1807_v56  ;;  %v6611_v17 = vld [vmem:[#allocation14 + $0x1c4] ss:$16 sps:$4 sm:$0xff]  }
 0xb01   :  { %2296 = vmatprep.subr.bf16.mxu0 %v6611_v17 }
 0xb02   :  { %v1810_v20 = vadd.f32 %v7675_v19, %v7673_v16  ;;  %2297 = vmatpush2.bf16.msra.mxu0 %v6609_v21 }
 0xb04   :  { %1811 = vadd.xlane.f32.xlu1 %v1810_v20  ;;  %v6614_v20 = vld [vmem:[#allocation14 + $0x1cc] ss:$16 sps:$4 sm:$0xff]  }
 0xb05   :  { %2339 = vmatprep.subr.bf16.mxu1 %v6614_v20 }
 0xb06   :  { %2340 = vmatpush2.bf16.msra.mxu1 %v6612_v22 }
 0xb89   :  { %v1809_v5 = vpop.xlane.xlu0 %1808 }
 0xb8a   :  { %v1814_v6 = vmul.f32 0.00390625, %v1809_v5  ;;  %v1844_v5 = vrot.slane %v1805_v0, %v7571_v43 }
 0xb8c   :  { %v7680_v8 = vsub.f32 %v7667_v11, %v1814_v6  ;;  %v7683_v9 = vsub.f32 %v7669_v3, %v1814_v6  ;;  %v1848_v6 = vrot.slane %v1805_v0, %v7578_v48  ;;  %v6699_v0 = vld [vmem:[#allocation16 + $0xf0] ss:$8 sps:$4 sm:$0xff]  }
 0xb8d   :  { %v1812_v10 = vpop.xlane.xlu1 %1811 }
 0xb8e   :  { %v1815_v47 = vmul.f32 0.00390625, %v1812_v10  ;;  %v1820_v25 = vmul.f32 %v7680_v8, %v7680_v8  ;;  %v1821_v12 = vmul.f32 %v7683_v9, %v7683_v9 }
 0xb90   :  { %v7690_v13 = vsub.f32 %v7673_v16, %v1815_v47  ;;  %v7693_v14 = vsub.f32 %v7675_v19, %v1815_v47  ;;  %v1824_v56 = vadd.f32 %v1821_v12, %v1820_v25  ;;  %v6617_v16 = vld [vmem:[#allocation14 + $0x1a4] ss:$16 sps:$4 sm:$0xff]   ;;  %v6620_v19 = vld [vmem:[#allocation14 + $0x1ac] ss:$16 sps:$4 sm:$0xff]   ;;  %v1859_v25 = vrot.slane %v1806_v2, %v7571_v43 }
 0xb91   :  { %2298 = vmatprep.subr.bf16.mxu0 %v6617_v16  ;;  %2341 = vmatprep.subr.bf16.mxu1 %v6620_v19  ;;  %v1863_v12 = vrot.slane %v1806_v2, %v7578_v48  ;;  %v6651_v19 = vld [vmem:[#allocation16 + $0x70] ss:$8 sps:$4 sm:$0xff]   ;;  %v6707_v2 = vld [vmem:[#allocation16 + $0xe4] ss:$8 sps:$4 sm:$0xff]  }
 0xb92   :  { %1825 = vadd.xlane.f32.xlu0 %v1824_v56  ;;  %v1822_v11 = vmul.f32 %v7690_v13, %v7690_v13  ;;  %v1823_v3 = vmul.f32 %v7693_v14, %v7693_v14  ;;  %2299 = vmatpush2.bf16.msra.mxu0 %v6615_v23  ;;  %v6654_v23 = vld [vmem:[#allocation16 + $0x170] ss:$8 sps:$4 sm:$0xff]  }
 0xb93   :  { %2342 = vmatpush2.bf16.msra.mxu1 %v6618_v24  ;;  %2300 = vmatprep.subr.bf16.mxu0 %v6623_v26  ;;  %v6662_v24 = vld [vmem:[#allocation16 + $0x164] ss:$8 sps:$4 sm:$0xff]   ;;  %v6657_v26 = vld [vmem:[#allocation16 + $0x60] ss:$8 sps:$4 sm:$0xff]  }
 0xb94   :  { %v1827_v15 = vadd.f32 %v1823_v3, %v1822_v11  ;;  %2343 = vmatprep.subr.bf16.mxu1 %v6626_v29  ;;  %v6668_v29 = vld [vmem:[#allocation16 + $0x154] ss:$8 sps:$4 sm:$0xff]  }
 0xb96   :  { %1828 = vadd.xlane.f32.xlu1 %v1827_v15  ;;  %2301 = vmatpush2.bf16.msra.mxu0 %v6621_v27  ;;  %v6660_v27 = vld [vmem:[#allocation16 + $0x160] ss:$8 sps:$4 sm:$0xff]  }
 0xb97   :  { %2344 = vmatpush2.bf16.msra.mxu1 %v6624_v28  ;;  %2302 = vmatprep.subr.bf16.mxu0 %v6629_v30  ;;  %v6665_v28 = vld [vmem:[#allocation16 + $0x54] ss:$8 sps:$4 sm:$0xff]   ;;  %v6663_v30 = vld [vmem:[#allocation16 + $0x50] ss:$8 sps:$4 sm:$0xff]  }
 0xb98   :  { %2345 = vmatprep.subr.bf16.mxu1 %v6632_v31  ;;  %v6666_v31 = vld [vmem:[#allocation16 + $0x150] ss:$8 sps:$4 sm:$0xff]  }
 0xb9a   :  { %2303 = vmatpush2.bf16.msra.mxu0 %v6627_v32  ;;  %v6671_v32 = vld [vmem:[#allocation16 + $0x44] ss:$8 sps:$4 sm:$0xff]  }
 0xb9b   :  { %2346 = vmatpush2.bf16.msra.mxu1 %v6630_v33  ;;  %2304 = vmatprep.subr.bf16.mxu0 %v6635_v34  ;;  %v6674_v33 = vld [vmem:[#allocation16 + $0x144] ss:$8 sps:$4 sm:$0xff]   ;;  %v6669_v34 = vld [vmem:[#allocation16 + $0x40] ss:$8 sps:$4 sm:$0xff]  }
 0xb9c   :  { %2347 = vmatprep.subr.bf16.mxu1 %v6638_v35  ;;  %v6672_v35 = vld [vmem:[#allocation16 + $0x140] ss:$8 sps:$4 sm:$0xff]  }
 0xb9e   :  { %2305 = vmatpush2.bf16.msra.mxu0 %v6633_v36  ;;  %v6677_v36 = vld [vmem:[#allocation16 + $0x34] ss:$8 sps:$4 sm:$0xff]  }
 0xb9f   :  { %2348 = vmatpush2.bf16.msra.mxu1 %v6636_v37  ;;  %2306 = vmatprep.subr.bf16.mxu0 %v6641_v39  ;;  %v6680_v37 = vld [vmem:[#allocation16 + $0x134] ss:$8 sps:$4 sm:$0xff]   ;;  %v6675_v39 = vld [vmem:[#allocation16 + $0x30] ss:$8 sps:$4 sm:$0xff]  }
 0xba0   :  { %2349 = vmatprep.subr.bf16.mxu1 %v6644_v42  ;;  %v6678_v42 = vld [vmem:[#allocation16 + $0x130] ss:$8 sps:$4 sm:$0xff]  }
 0xba2   :  { %2307 = vmatpush2.bf16.msra.mxu0 %v6639_v45  ;;  %v6683_v45 = vld [vmem:[#allocation16 + $0x24] ss:$8 sps:$4 sm:$0xff]  }
 0xba3   :  { %2350 = vmatpush2.bf16.msra.mxu1 %v6642_v46  ;;  %2308 = vmatprep.subr.bf16.mxu0 %v6647_v44  ;;  %v6686_v46 = vld [vmem:[#allocation16 + $0x124] ss:$8 sps:$4 sm:$0xff]   ;;  %v6681_v44 = vld [vmem:[#allocation16 + $0x20] ss:$8 sps:$4 sm:$0xff]  }
 0xba4   :  { %2351 = vmatprep.subr.bf16.mxu1 %v6650_v50  ;;  %v6684_v50 = vld [vmem:[#allocation16 + $0x120] ss:$8 sps:$4 sm:$0xff]  }
 0xba6   :  { %2309 = vmatpush2.bf16.msra.mxu0 %v6645_v51  ;;  %v6689_v51 = vld [vmem:[#allocation16 + $0x14] ss:$8 sps:$4 sm:$0xff]  }
 0xba7   :  { %2352 = vmatpush2.bf16.msra.mxu1 %v6648_v52  ;;  %2772 = vmatprep.subr.bf16.mxu0 %v6653_v53  ;;  %v6692_v52 = vld [vmem:[#allocation16 + $0x114] ss:$8 sps:$4 sm:$0xff]   ;;  %v6687_v53 = vld [vmem:[#allocation16 + $0x10] ss:$8 sps:$4 sm:$0xff]  }
 0xba8   :  { %2815 = vmatprep.subr.bf16.mxu1 %v6656_v54  ;;  %v6690_v54 = vld [vmem:[#allocation16 + $0x110] ss:$8 sps:$4 sm:$0xff]  }
 0xc1b   :  { %v1826_v55 = vpop.xlane.xlu0 %1825 }
 0xc1c   :  { %v1830_v59 = vmul.f32 0.00390625, %v1826_v55  ;;  %v6695_v55 = vld [vmem:[#allocation16 + $0x4] ss:$8 sps:$4 sm:$0xff]  }
 0xc1e   :  { %v1832_v60 = vadd.f32 1e-05, %v1830_v59  ;;  %v6698_v59 = vld [vmem:[#allocation16 + $0x104] ss:$8 sps:$4 sm:$0xff]  }
 0xc1f   :  { %v1829_v61 = vpop.xlane.xlu1 %1828 }
 0xc20   :  { %7147 = vrsqrt.f32 %v1832_v60  ;;  %v1831_v62 = vmul.f32 0.00390625, %v1829_v61  ;;  %v6693_v60 = vld [vmem:[#allocation16] ss:$8 sps:$4 sm:$0xff]  }
 0xc21   :  { %v6696_v61 = vld [vmem:[#allocation16 + $0x100] ss:$8 sps:$4 sm:$0xff]  }
 0xc22   :  { %v1833_v63 = vadd.f32 1e-05, %v1831_v62  ;;  %v6701_v62 = vld [vmem:[#allocation16 + $0xf4] ss:$8 sps:$4 sm:$0xff]  }
 0xc24   :  { %7149 = vrsqrt.f32 %v1833_v63  ;;  %v6704_v63 = vld [vmem:[#allocation16 + $0x1f4] ss:$8 sps:$4 sm:$0xff]  }
 0xc2d   :  { %v7148_v1 = vpop.eup %7147 }
 0xc2e   :  { %v1837_v4 = vmul.f32 %v7148_v1, %v7683_v9  ;;  %v1836_v10 = vmul.f32 %v7148_v1, %v7680_v8  ;;  %v6702_v1 = vld [vmem:[#allocation16 + $0x1f0] ss:$8 sps:$4 sm:$0xff]  }
 0xc30   :  { %v1852_v11 = vmul.f32 %v1848_v6, %v1837_v4  ;;  %v1851_v15 = vmul.f32 %v1844_v5, %v1836_v10  ;;  %v6710_v4 = vld [vmem:[#allocation16 + $0x1e4] ss:$8 sps:$4 sm:$0xff]   ;;  %v6713_v10 = vld [vmem:[#allocation16 + $0xd4] ss:$8 sps:$4 sm:$0xff]  }
 0xc31   :  { %v7150_v47 = vpop.eup %7149 }
 0xc32   :  { %v1839_v56 = vmul.f32 %v7150_v47, %v7693_v14  ;;  %v1838_v3 = vmul.f32 %v7150_v47, %v7690_v13  ;;  %v7710_v9 = vadd.f32 %v1863_v12, %v1852_v11  ;;  %v7714_v22 = vadd.f32 %v1859_v25, %v1851_v15  ;;  %v6659_v13 = vld [vmem:[#allocation16 + $0x64] ss:$8 sps:$4 sm:$0xff]   ;;  %v6716_v47 = vld [vmem:[#allocation16 + $0x1d4] ss:$8 sps:$4 sm:$0xff]   ;;  %v6720_v15 = vld [vmem:[#allocation16 + $0x1c0] ss:$8 sps:$4 sm:$0xff]  }
 0xc33   :  { %v6722_v11 = vld [vmem:[#allocation16 + $0x1c4] ss:$8 sps:$4 sm:$0xff]  }
 0xc34   :  { %v1854_v17 = vmul.f32 %v1848_v6, %v1839_v56  ;;  %v1853_v20 = vmul.f32 %v1844_v5, %v1838_v3  ;;  %v6705_v5 = vld [vmem:[#allocation16 + $0xe0] ss:$8 sps:$4 sm:$0xff]   ;;  %v6719_v56 = vld [vmem:[#allocation16 + $0xc4] ss:$8 sps:$4 sm:$0xff]  }
 0xc35   :  { %v6708_v6 = vld [vmem:[#allocation16 + $0x1e0] ss:$8 sps:$4 sm:$0xff]  }
 0xc36   :  { %v7712_v21 = vadd.f32 %v1863_v12, %v1854_v17  ;;  %v7716_v8 = vadd.f32 %v1859_v25, %v1853_v20  ;;  %v6711_v25 = vld [vmem:[#allocation16 + $0xd0] ss:$8 sps:$4 sm:$0xff]   ;;  %v6717_v3 = vld [vmem:[#allocation16 + $0xc0] ss:$8 sps:$4 sm:$0xff]   ;;  %v6725_v17 = vld [vmem:[#allocation16 + $0xb4] ss:$8 sps:$4 sm:$0xff]  }
 0xc37   :  { %v6714_v12 = vld [vmem:[#allocation16 + $0x1d0] ss:$8 sps:$4 sm:$0xff]   ;;  %v6728_v20 = vld [vmem:[#allocation16 + $0x1b4] ss:$8 sps:$4 sm:$0xff]  }
 0xc38   :  { %v1871_v16 = vpack.c.bf16 %v7712_v21, %v7710_v9  ;;  %v1870_v14 = vpack.c.bf16 %v7716_v8, %v7714_v22 }
 0xc3a   :  { %2310 = vmatprep.mubr.bf16.mxu0 %v1871_v16  ;;  %2353 = vmatprep.mubr.bf16.mxu1 %v1871_v16  ;;  %v6723_v16 = vld [vmem:[#allocation16 + $0xb0] ss:$8 sps:$4 sm:$0xff]  }
 0xc3b   :  { %2311 = vmatmul.mubr.bf16.vlgmr.msra.gmra.mxu0 %v1870_v14  ;;  %2354 = vmatmul.mubr.bf16.vlgmr.msra.gmra.mxu1 %v1870_v14  ;;  %v6726_v14 = vld [vmem:[#allocation16 + $0x1b0] ss:$8 sps:$4 sm:$0xff]  }
 0xc3c   :  { %2773 = vmatpush1.bf16.msra.mxu0 %v6651_v19  ;;  %2816 = vmatpush1.bf16.msra.mxu1 %v6654_v23  ;;  %v6731_v19 = vld [vmem:[#allocation16 + $0xa4] ss:$8 sps:$4 sm:$0xff]  }
 0xc3d   :  { %2774 = vmatprep.subr.bf16.mxu0 %v6659_v13  ;;  %2817 = vmatprep.subr.bf16.mxu1 %v6662_v24  ;;  %v6734_v23 = vld [vmem:[#allocation16 + $0x1a4] ss:$8 sps:$4 sm:$0xff]   ;;  %v6729_v13 = vld [vmem:[#allocation16 + $0xa0] ss:$8 sps:$4 sm:$0xff]  }
 0xc3e   :  { %v6732_v24 = vld [vmem:[#allocation16 + $0x1a0] ss:$8 sps:$4 sm:$0xff]  }
 0xc40   :  { %2775 = vmatpush1.bf16.msra.mxu0 %v6657_v26  ;;  %2818 = vmatpush1.bf16.msra.mxu1 %v6660_v27  ;;  %v6737_v26 = vld [vmem:[#allocation16 + $0x94] ss:$8 sps:$4 sm:$0xff]  }
 0xc41   :  { %2776 = vmatprep.subr.bf16.mxu0 %v6665_v28  ;;  %2819 = vmatprep.subr.bf16.mxu1 %v6668_v29  ;;  %v6740_v27 = vld [vmem:[#allocation16 + $0x194] ss:$8 sps:$4 sm:$0xff]   ;;  %v6735_v28 = vld [vmem:[#allocation16 + $0x90] ss:$8 sps:$4 sm:$0xff]  }
 0xc42   :  { %v6738_v29 = vld [vmem:[#allocation16 + $0x190] ss:$8 sps:$4 sm:$0xff]  }
 0xc44   :  { %2777 = vmatpush1.bf16.msra.mxu0 %v6663_v30  ;;  %2820 = vmatpush1.bf16.msra.mxu1 %v6666_v31  ;;  %v6743_v30 = vld [vmem:[#allocation16 + $0x84] ss:$8 sps:$4 sm:$0xff]  }
 0xc45   :  { %2778 = vmatprep.subr.bf16.mxu0 %v6671_v32  ;;  %2821 = vmatprep.subr.bf16.mxu1 %v6674_v33  ;;  %v6746_v31 = vld [vmem:[#allocation16 + $0x184] ss:$8 sps:$4 sm:$0xff]   ;;  %v6741_v32 = vld [vmem:[#allocation16 + $0x80] ss:$8 sps:$4 sm:$0xff]  }
 0xc46   :  { %v6744_v33 = vld [vmem:[#allocation16 + $0x180] ss:$8 sps:$4 sm:$0xff]  }
 0xc48   :  { %2779 = vmatpush1.bf16.msra.mxu0 %v6669_v34  ;;  %2822 = vmatpush1.bf16.msra.mxu1 %v6672_v35  ;;  %v1936_v34 = vld [vmem:[%s7971_s9] sm:$0xf] }
 0xc49   :  { %2780 = vmatprep.subr.bf16.mxu0 %v6677_v36  ;;  %2823 = vmatprep.subr.bf16.mxu1 %v6680_v37  ;;  %v1945_v37 = vrot.slane %v1936_v34, %v7578_v48 }
 0xc4c   :  { %2781 = vmatpush1.bf16.msra.mxu0 %v6675_v39  ;;  %2824 = vmatpush1.bf16.msra.mxu1 %v6678_v42  ;;  %v1953_v39 = vrot.slane %v1936_v34, %v7608_v18  ;;  %v1941_v42 = vrot.slane %v1936_v34, %v7571_v43 }
 0xc4d   :  { %2782 = vmatprep.subr.bf16.mxu0 %v6683_v45  ;;  %2825 = vmatprep.subr.bf16.mxu1 %v6686_v46  ;;  %v1949_v45 = vrot.slane %v1936_v34, %v7568_v41 }
 0xc50   :  { %2783 = vmatpush1.bf16.msra.mxu0 %v6681_v44  ;;  %2826 = vmatpush1.bf16.msra.mxu1 %v6684_v50 }
 0xc51   :  { %2784 = vmatprep.subr.bf16.mxu0 %v6689_v51  ;;  %2827 = vmatprep.subr.bf16.mxu1 %v6692_v52 }
 0xc54   :  { %2785 = vmatpush1.bf16.msra.mxu0 %v6687_v53  ;;  %2828 = vmatpush1.bf16.msra.mxu1 %v6690_v54 }
 0xc55   :  { %2786 = vmatprep.subr.bf16.mxu0 %v6695_v55  ;;  %2829 = vmatprep.subr.bf16.mxu1 %v6698_v59 }
 0xc58   :  { %2787 = vmatpush1.bf16.msra.mxu0 %v6693_v60  ;;  %2830 = vmatpush1.bf16.msra.mxu1 %v6696_v61 }
 0xc59   :  { %2788 = vmatprep.subr.bf16.mxu0 %v6701_v62  ;;  %2831 = vmatprep.subr.bf16.mxu1 %v6704_v63 }
 0xc5c   :  { %2789 = vmatpush2.bf16.msra.mxu0 %v6699_v0  ;;  %2832 = vmatpush2.bf16.msra.mxu1 %v6702_v1 }
 0xc5d   :  { %2790 = vmatprep.subr.bf16.mxu0 %v6707_v2  ;;  %2833 = vmatprep.subr.bf16.mxu1 %v6710_v4 }
 0xc60   :  { %2791 = vmatpush2.bf16.msra.mxu0 %v6705_v5  ;;  %2834 = vmatpush2.bf16.msra.mxu1 %v6708_v6 }
 0xc61   :  { %2792 = vmatprep.subr.bf16.mxu0 %v6713_v10  ;;  %2835 = vmatprep.subr.bf16.mxu1 %v6716_v47 }
 0xc64   :  { %2793 = vmatpush2.bf16.msra.mxu0 %v6711_v25  ;;  %2836 = vmatpush2.bf16.msra.mxu1 %v6714_v12 }
 0xc65   :  { %2794 = vmatprep.subr.bf16.mxu0 %v6719_v56  ;;  %2837 = vmatprep.subr.bf16.mxu1 %v6722_v11 }
 0xc68   :  { %2795 = vmatpush2.bf16.msra.mxu0 %v6717_v3  ;;  %2838 = vmatpush2.bf16.msra.mxu1 %v6720_v15  ;;  %v2440_v15 = vld [vmem:[%s7973_s11] sm:$0x3] }
 0xc69   :  { %2796 = vmatprep.subr.bf16.mxu0 %v6725_v17  ;;  %2839 = vmatprep.subr.bf16.mxu1 %v6728_v20  ;;  %v2445_v17 = vrot.slane %v2440_v15, %v7571_v43  ;;  %v2449_v20 = vrot.slane %v2440_v15, %v7578_v48  ;;  %v6794_v15 = vld [vmem:[#allocation8 + $0x30c] ss:$24 sps:$4 sm:$0xff]  }
 0xc6c   :  { %2797 = vmatpush2.bf16.msra.mxu0 %v6723_v16  ;;  %2840 = vmatpush2.bf16.msra.mxu1 %v6726_v14 }
 0xc6d   :  { %2798 = vmatprep.subr.bf16.mxu0 %v6731_v19  ;;  %2841 = vmatprep.subr.bf16.mxu1 %v6734_v23 }
 0xc70   :  { %2799 = vmatpush2.bf16.msra.mxu0 %v6729_v13  ;;  %2842 = vmatpush2.bf16.msra.mxu1 %v6732_v24 }
 0xc71   :  { %2800 = vmatprep.subr.bf16.mxu0 %v6737_v26  ;;  %2843 = vmatprep.subr.bf16.mxu1 %v6740_v27 }
 0xc74   :  { %2801 = vmatpush2.bf16.msra.mxu0 %v6735_v28  ;;  %2844 = vmatpush2.bf16.msra.mxu1 %v6738_v29 }
 0xc75   :  { %2802 = vmatprep.subr.bf16.mxu0 %v6743_v30  ;;  %2845 = vmatprep.subr.bf16.mxu1 %v6746_v31 }
 0xc78   :  { %2803 = vmatpush2.bf16.msra.mxu0 %v6741_v32  ;;  %2846 = vmatpush2.bf16.msra.mxu1 %v6744_v33 }
 0xcfb   :  { %v2312_v35 = vpop.f32.mrf.mxu0  ;;  %v2355_v36 = vpop.f32.mrf.mxu1 }
 0xcfc   :  { %v2313_v59 = vadd.f32 %v2312_v35, %v1941_v42  ;;  %v2356_v60 = vadd.f32 %v2355_v36, %v1949_v45 }
 0xcfd   :  { %v2314_v46 = vpop.f32.mrf.mxu0  ;;  %v2357_v44 = vpop.f32.mrf.mxu1 }
 0xcfe   :  { %v2315_v52 = vadd.f32 %v2314_v46, %v1945_v37  ;;  %v2358_v53 = vadd.f32 %v2357_v44, %v1953_v39  ;;  %v2364_v47 = vmax.f32 %v2313_v59, 0.0  ;;  %v2366_v25 = vmax.f32 %v2356_v60, 0.0  ;;  %v6749_v46 = vld [vmem:[#allocation8 + $0x454] ss:$24 sps:$4 sm:$0xff]   ;;  %v6750_v44 = vld [vmem:[#allocation8 + $0x458] ss:$24 sps:$4 sm:$0xff]  }
 0xcff   :  { %v2316_v50 = vpop.f32.mrf.mxu0  ;;  %v2359_v51 = vpop.f32.mrf.mxu1  ;;  %3538 = vmatprep.subr.bf16.mxu0 %v6749_v46  ;;  %v6762_v59 = vld [vmem:[#allocation8 + $0x3f8] ss:$24 sps:$4 sm:$0xff]   ;;  %v6767_v60 = vld [vmem:[#allocation8 + $0x3c4] ss:$24 sps:$4 sm:$0xff]   ;;  %v6804_v46 = vld [vmem:[#allocation8 + $0x5a8] ss:$24 sps:$4 sm:$0xff]  }
 0xd00   :  { %v2317_v54 = vadd.f32 %v2316_v50, %v1941_v42  ;;  %v2360_v55 = vadd.f32 %v2359_v51, %v1949_v45  ;;  %v2365_v4 = vmax.f32 %v2315_v52, 0.0  ;;  %v2367_v5 = vmax.f32 %v2358_v53, 0.0  ;;  %v6752_v50 = vld [vmem:[#allocation8 + $0x45c] ss:$24 sps:$4 sm:$0xff]   ;;  %v6758_v52 = vld [vmem:[#allocation8 + $0x42c] ss:$24 sps:$4 sm:$0xff]  }
 0xd01   :  { %v2318_v61 = vpop.f32.mrf.mxu0  ;;  %v2361_v62 = vpop.f32.mrf.mxu1  ;;  %v6755_v51 = vld [vmem:[#allocation8 + $0x424] ss:$24 sps:$4 sm:$0xff]   ;;  %3581 = vmatprep.subr.bf16.mxu1 %v6752_v50  ;;  %v6753_v53 = vld [vmem:[#allocation8 + $0x420] ss:$24 sps:$4 sm:$0xff]  }
 0xd02   :  { %v2319_v63 = vadd.f32 %v2318_v61, %v1945_v37  ;;  %v2362_v0 = vadd.f32 %v2361_v62, %v1953_v39  ;;  %v2368_v1 = vmax.f32 %v2317_v54, 0.0  ;;  %v2370_v2 = vmax.f32 %v2360_v55, 0.0  ;;  %v6764_v54 = vld [vmem:[#allocation8 + $0x3fc] ss:$24 sps:$4 sm:$0xff]   ;;  %v6759_v55 = vld [vmem:[#allocation8 + $0x3f0] ss:$24 sps:$4 sm:$0xff]  }
 0xd03   :  { %v6770_v61 = vld [vmem:[#allocation8 + $0x3cc] ss:$24 sps:$4 sm:$0xff]   ;;  %v6765_v62 = vld [vmem:[#allocation8 + $0x3c0] ss:$24 sps:$4 sm:$0xff]  }
 0xd04   :  { %v2369_v6 = vmax.f32 %v2319_v63, 0.0  ;;  %v2371_v10 = vmax.f32 %v2362_v0, 0.0  ;;  %v2372_v11 = vpack.c.bf16 %v2368_v1, %v2364_v47  ;;  %v2374_v3 = vpack.c.bf16 %v2370_v2, %v2366_v25  ;;  %v6768_v63 = vld [vmem:[#allocation8 + $0x3c8] ss:$24 sps:$4 sm:$0xff]   ;;  %v6773_v0 = vld [vmem:[#allocation8 + $0x394] ss:$24 sps:$4 sm:$0xff]  }
 0xd05   :  { %v6776_v1 = vld [vmem:[#allocation8 + $0x39c] ss:$24 sps:$4 sm:$0xff]   ;;  %v6771_v2 = vld [vmem:[#allocation8 + $0x390] ss:$24 sps:$4 sm:$0xff]  }
 0xd06   :  { %v2373_v12 = vpack.c.bf16 %v2369_v6, %v2365_v4  ;;  %v2375_v56 = vpack.c.bf16 %v2371_v10, %v2367_v5  ;;  %v6774_v4 = vld [vmem:[#allocation8 + $0x398] ss:$24 sps:$4 sm:$0xff]   ;;  %v6779_v5 = vld [vmem:[#allocation8 + $0x364] ss:$24 sps:$4 sm:$0xff]   ;;  %v6780_v47 = vld [vmem:[#allocation8 + $0x368] ss:$24 sps:$4 sm:$0xff]  }
 0xd07   :  { %v6782_v6 = vld [vmem:[#allocation8 + $0x36c] ss:$24 sps:$4 sm:$0xff]   ;;  %v6777_v10 = vld [vmem:[#allocation8 + $0x360] ss:$24 sps:$4 sm:$0xff]  }
 0xd08   :  { %2804 = vmatprep.mubr.bf16.mxu0 %v2373_v12  ;;  %2847 = vmatprep.mubr.bf16.mxu1 %v2375_v56  ;;  %v6785_v25 = vld [vmem:[#allocation8 + $0x334] ss:$24 sps:$4 sm:$0xff]   ;;  %v6783_v56 = vld [vmem:[#allocation8 + $0x330] ss:$24 sps:$4 sm:$0xff]  }
 0xd09   :  { %2805 = vmatmul.mubr.bf16.vlgmr.msra.gmra.mxu0 %v2372_v11  ;;  %2848 = vmatmul.mubr.bf16.vlgmr.msra.gmra.mxu1 %v2374_v3  ;;  %v6788_v12 = vld [vmem:[#allocation8 + $0x33c] ss:$24 sps:$4 sm:$0xff]   ;;  %v6786_v11 = vld [vmem:[#allocation8 + $0x338] ss:$24 sps:$4 sm:$0xff]  }
 0xd0a   :  { %3582 = vmatpush1.bf16.msra.mxu1 %v6750_v44  ;;  %v6791_v3 = vld [vmem:[#allocation8 + $0x304] ss:$24 sps:$4 sm:$0xff]   ;;  %v6810_v50 = vld [vmem:[#allocation8 + $0x578] ss:$24 sps:$4 sm:$0xff]  }
 0xd0b   :  { %3583 = vmatprep.subr.bf16.mxu1 %v6758_v52  ;;  %v6812_v44 = vld [vmem:[#allocation8 + $0x57c] ss:$24 sps:$4 sm:$0xff]  }
 0xd0c   :  { %v6815_v52 = vld [vmem:[#allocation8 + $0x544] ss:$24 sps:$4 sm:$0xff]  }
 0xdc9   :  { %v2806_v16 = vpop.f32.mrf.mxu0  ;;  %v2849_v14 = vpop.f32.mrf.mxu1 }
 0xdca   :  { %v2807_v19 = vadd.f32 %v2806_v16, %v2445_v17  ;;  %v6797_v16 = vld [vmem:[#allocation8 + $0x5d4] ss:$24 sps:$4 sm:$0xff]  }
 0xdcb   :  { %v2808_v23 = vpop.f32.mrf.mxu0  ;;  %v2851_v13 = vpop.f32.mrf.mxu1 }
 0xdcc   :  { %v2850_v24 = vadd.f32 %v2849_v14, %v2807_v19  ;;  %v2809_v26 = vadd.f32 %v2808_v23, %v2449_v20  ;;  %v6800_v14 = vld [vmem:[#allocation8 + $0x5dc] ss:$24 sps:$4 sm:$0xff]   ;;  %v6795_v19 = vld [vmem:[#allocation8 + $0x5d0] ss:$24 sps:$4 sm:$0xff]  }
 0xdcd   :  { %v2810_v27 = vpop.f32.mrf.mxu0  ;;  %v2853_v28 = vpop.f32.mrf.mxu1  ;;  %v6798_v23 = vld [vmem:[#allocation8 + $0x5d8] ss:$24 sps:$4 sm:$0xff]  }
 0xdce   :  { %v2852_v29 = vadd.f32 %v2851_v13, %v2809_v26  ;;  %v2811_v30 = vadd.f32 %v2810_v27, %v2445_v17  ;;  %v7735_v32 = vadd.f32 %v2850_v24, %v7714_v22  ;;  %v6789_v17 = vld [vmem:[#allocation8 + $0x300] ss:$24 sps:$4 sm:$0xff]  }
 0xdcf   :  { %v2812_v31 = vpop.f32.mrf.mxu0  ;;  %v2855_v36 = vpop.f32.mrf.mxu1 }
 0xdd0   :  { %v7738_v33 = vadd.f32 %v2852_v29, %v7710_v9  ;;  %v2854_v34 = vadd.f32 %v2853_v28, %v2811_v30  ;;  %v2813_v35 = vadd.f32 %v2812_v31, %v2449_v20  ;;  %v6747_v9 = vld [vmem:[#allocation8 + $0x450] ss:$24 sps:$4 sm:$0xff]  }
 0xdd1   :  { %3539 = vmatpush1.bf16.msra.mxu0 %v6747_v9  ;;  %v6792_v20 = vld [vmem:[#allocation8 + $0x308] ss:$24 sps:$4 sm:$0xff]   ;;  %v6806_v9 = vld [vmem:[#allocation8 + $0x5ac] ss:$24 sps:$4 sm:$0xff]  }
 0xdd2   :  { %v2856_v37 = vadd.f32 %v2855_v36, %v2813_v35  ;;  %v2864_v39 = vadd.f32 %v7738_v33, %v7735_v32  ;;  %v7743_v42 = vadd.f32 %v2854_v34, %v7716_v8  ;;  %3540 = vmatprep.subr.bf16.mxu0 %v6755_v51  ;;  %v6756_v8 = vld [vmem:[#allocation8 + $0x428] ss:$24 sps:$4 sm:$0xff]  }
 0xdd3   :  { %3584 = vmatpush1.bf16.msra.mxu1 %v6756_v8  ;;  %v6813_v51 = vld [vmem:[#allocation8 + $0x540] ss:$24 sps:$4 sm:$0xff]   ;;  %v6818_v8 = vld [vmem:[#allocation8 + $0x54c] ss:$24 sps:$4 sm:$0xff]  }
 0xdd4   :  { %v7746_v45 = vadd.f32 %v2856_v37, %v7712_v21  ;;  %2865 = vadd.xlane.f32.xlu0 %v2864_v39  ;;  %v6761_v21 = vld [vmem:[#allocation8 + $0x3f4] ss:$24 sps:$4 sm:$0xff]   ;;  %3585 = vmatprep.subr.bf16.mxu1 %v6764_v54  ;;  %v6803_v39 = vld [vmem:[#allocation8 + $0x5a4] ss:$24 sps:$4 sm:$0xff]  }
 0xdd5   :  { %3541 = vmatpush1.bf16.msra.mxu0 %v6753_v53  ;;  %v6816_v53 = vld [vmem:[#allocation8 + $0x548] ss:$24 sps:$4 sm:$0xff]   ;;  %v6824_v54 = vld [vmem:[#allocation8 + $0x51c] ss:$24 sps:$4 sm:$0xff]  }
 0xdd6   :  { %v2867_v22 = vadd.f32 %v7746_v45, %v7743_v42  ;;  %3542 = vmatprep.subr.bf16.mxu0 %v6761_v21  ;;  %v6821_v21 = vld [vmem:[#allocation8 + $0x514] ss:$24 sps:$4 sm:$0xff]  }
 0xdd7   :  { %3586 = vmatpush1.bf16.msra.mxu1 %v6762_v59  ;;  %v6822_v59 = vld [vmem:[#allocation8 + $0x518] ss:$24 sps:$4 sm:$0xff]  }
 0xdd8   :  { %2868 = vadd.xlane.f32.xlu1 %v2867_v22  ;;  %3587 = vmatprep.subr.bf16.mxu1 %v6770_v61  ;;  %v6801_v22 = vld [vmem:[#allocation8 + $0x5a0] ss:$24 sps:$4 sm:$0xff]   ;;  %v6830_v61 = vld [vmem:[#allocation8 + $0x4ec] ss:$24 sps:$4 sm:$0xff]  }
 0xdd9   :  { %3543 = vmatpush1.bf16.msra.mxu0 %v6759_v55  ;;  %v6819_v55 = vld [vmem:[#allocation8 + $0x510] ss:$24 sps:$4 sm:$0xff]  }
 0xdda   :  { %3544 = vmatprep.subr.bf16.mxu0 %v6767_v60  ;;  %v6827_v60 = vld [vmem:[#allocation8 + $0x4e4] ss:$24 sps:$4 sm:$0xff]  }
 0xddb   :  { %3588 = vmatpush1.bf16.msra.mxu1 %v6768_v63  ;;  %v6828_v63 = vld [vmem:[#allocation8 + $0x4e8] ss:$24 sps:$4 sm:$0xff]  }
 0xddc   :  { %3589 = vmatprep.subr.bf16.mxu1 %v6776_v1  ;;  %v6836_v1 = vld [vmem:[#allocation8 + $0x4bc] ss:$24 sps:$4 sm:$0xff]  }
 0xddd   :  { %3545 = vmatpush1.bf16.msra.mxu0 %v6765_v62  ;;  %v6825_v62 = vld [vmem:[#allocation8 + $0x4e0] ss:$24 sps:$4 sm:$0xff]  }
 0xdde   :  { %3546 = vmatprep.subr.bf16.mxu0 %v6773_v0  ;;  %v6833_v0 = vld [vmem:[#allocation8 + $0x4b4] ss:$24 sps:$4 sm:$0xff]  }
 0xddf   :  { %3590 = vmatpush1.bf16.msra.mxu1 %v6774_v4  ;;  %v6834_v4 = vld [vmem:[#allocation8 + $0x4b8] ss:$24 sps:$4 sm:$0xff]  }
 0xde0   :  { %3591 = vmatprep.subr.bf16.mxu1 %v6782_v6  ;;  %v6842_v6 = vld [vmem:[#allocation8 + $0x48c] ss:$24 sps:$4 sm:$0xff]  }
 0xde1   :  { %3547 = vmatpush1.bf16.msra.mxu0 %v6771_v2  ;;  %v6831_v2 = vld [vmem:[#allocation8 + $0x4b0] ss:$24 sps:$4 sm:$0xff]  }
 0xde2   :  { %3548 = vmatprep.subr.bf16.mxu0 %v6779_v5  ;;  %v6839_v5 = vld [vmem:[#allocation8 + $0x484] ss:$24 sps:$4 sm:$0xff]  }
 0xde3   :  { %3592 = vmatpush1.bf16.msra.mxu1 %v6780_v47  ;;  %v6840_v47 = vld [vmem:[#allocation8 + $0x488] ss:$24 sps:$4 sm:$0xff]  }
 0xde4   :  { %3593 = vmatprep.subr.bf16.mxu1 %v6788_v12 }
 0xde5   :  { %3549 = vmatpush1.bf16.msra.mxu0 %v6777_v10  ;;  %v6837_v10 = vld [vmem:[#allocation8 + $0x480] ss:$24 sps:$4 sm:$0xff]  }
 0xde6   :  { %3550 = vmatprep.subr.bf16.mxu0 %v6785_v25  ;;  %v6845_v25 = vld [vmem:[#allocation8 + $0x464] ss:$24 sps:$4 sm:$0xff]  }
 0xde7   :  { %3594 = vmatpush1.bf16.msra.mxu1 %v6786_v11 }
 0xde8   :  { %3595 = vmatprep.subr.bf16.mxu1 %v6794_v15 }
 0xde9   :  { %3551 = vmatpush1.bf16.msra.mxu0 %v6783_v56 }
 0xdea   :  { %3552 = vmatprep.subr.bf16.mxu0 %v6791_v3 }
 0xdeb   :  { %3596 = vmatpush1.bf16.msra.mxu1 %v6792_v20  ;;  %v2862_v20 = vld [vmem:[#allocation17] sm:$0x3] }
 0xdec   :  { %3597 = vmatprep.subr.bf16.mxu1 %v6800_v14  ;;  %v2863_v14 = vld [vmem:[#allocation19] sm:$0x3] }
 0xded   :  { %3553 = vmatpush1.bf16.msra.mxu0 %v6789_v17 }
 0xdee   :  { %3554 = vmatprep.subr.bf16.mxu0 %v6797_v16 }
 0xdef   :  { %3598 = vmatpush2.bf16.msra.mxu1 %v6798_v23  ;;  %v2900_v23 = vrot.slane %v2862_v20, %v7571_v43 }
 0xdf0   :  { %3599 = vmatprep.subr.bf16.mxu1 %v6806_v9 }
 0xdf1   :  { %3555 = vmatpush2.bf16.msra.mxu0 %v6795_v19 }
 0xdf2   :  { %3556 = vmatprep.subr.bf16.mxu0 %v6803_v39 }
 0xdf3   :  { %3600 = vmatpush2.bf16.msra.mxu1 %v6804_v46 }
 0xdf4   :  { %3601 = vmatprep.subr.bf16.mxu1 %v6812_v44  ;;  %v6851_v44 = vld [vmem:[#allocation8 + $0x404] ss:$24 sps:$4 sm:$0xff]  }
 0xdf5   :  { %3557 = vmatpush2.bf16.msra.mxu0 %v6801_v22 }
 0xdf7   :  { %3602 = vmatpush2.bf16.msra.mxu1 %v6810_v50  ;;  %v6849_v50 = vld [vmem:[#allocation8 + $0x400] ss:$24 sps:$4 sm:$0xff]  }
 0xdf8   :  { %3603 = vmatprep.subr.bf16.mxu1 %v6818_v8  ;;  %v6855_v8 = vld [vmem:[#allocation8 + $0x3a0] ss:$24 sps:$4 sm:$0xff]  }
 0xdfb   :  { %3604 = vmatpush2.bf16.msra.mxu1 %v6816_v53  ;;  %v6857_v53 = vld [vmem:[#allocation8 + $0x3a4] ss:$24 sps:$4 sm:$0xff]  }
 0xdfc   :  { %3605 = vmatprep.subr.bf16.mxu1 %v6824_v54  ;;  %v6858_v54 = vld [vmem:[#allocation8 + $0x370] ss:$24 sps:$4 sm:$0xff]  }
 0xdff   :  { %3606 = vmatpush2.bf16.msra.mxu1 %v6822_v59  ;;  %v6861_v59 = vld [vmem:[#allocation8 + $0x340] ss:$24 sps:$4 sm:$0xff]  }
 0xe00   :  { %3607 = vmatprep.subr.bf16.mxu1 %v6830_v61  ;;  %v6864_v61 = vld [vmem:[#allocation8 + $0x310] ss:$24 sps:$4 sm:$0xff]  }
 0xe03   :  { %3608 = vmatpush2.bf16.msra.mxu1 %v6828_v63  ;;  %v6867_v63 = vld [vmem:[#allocation8 + $0x5e0] ss:$24 sps:$4 sm:$0xff]  }
 0xe04   :  { %3609 = vmatprep.subr.bf16.mxu1 %v6836_v1  ;;  %v6870_v1 = vld [vmem:[#allocation8 + $0x5b0] ss:$24 sps:$4 sm:$0xff]  }
 0xe07   :  { %3610 = vmatpush2.bf16.msra.mxu1 %v6834_v4  ;;  %v6873_v4 = vld [vmem:[#allocation8 + $0x580] ss:$24 sps:$4 sm:$0xff]  }
 0xe08   :  { %3611 = vmatprep.subr.bf16.mxu1 %v6842_v6  ;;  %v6876_v6 = vld [vmem:[#allocation8 + $0x550] ss:$24 sps:$4 sm:$0xff]  }
 0xe0b   :  { %3612 = vmatpush2.bf16.msra.mxu1 %v6840_v47  ;;  %v6879_v47 = vld [vmem:[#allocation8 + $0x520] ss:$24 sps:$4 sm:$0xff]  }
 0xe0c   :  { %6300 = vmatprep.subr.mxu1 %v7425_v38 }
 0xe5d   :  { %v2866_v13 = vpop.xlane.xlu0 %2865 }
 0xe5e   :  { %v2870_v24 = vmul.f32 0.00390625, %v2866_v13  ;;  %v2904_v13 = vrot.slane %v2862_v20, %v7578_v48 }
 0xe60   :  { %v7751_v26 = vsub.f32 %v7735_v32, %v2870_v24  ;;  %v7754_v27 = vsub.f32 %v7738_v33, %v2870_v24 }
 0xe61   :  { %v2869_v28 = vpop.xlane.xlu1 %2868 }
 0xe62   :  { %v2871_v29 = vmul.f32 0.00390625, %v2869_v28  ;;  %v2876_v30 = vmul.f32 %v7751_v26, %v7751_v26  ;;  %v2877_v31 = vmul.f32 %v7754_v27, %v7754_v27 }
 0xe64   :  { %v7761_v34 = vsub.f32 %v7743_v42, %v2871_v29  ;;  %v7764_v35 = vsub.f32 %v7746_v45, %v2871_v29  ;;  %v2880_v36 = vadd.f32 %v2877_v31, %v2876_v30  ;;  %v6809_v42 = vld [vmem:[#allocation8 + $0x574] ss:$24 sps:$4 sm:$0xff]   ;;  %v6807_v45 = vld [vmem:[#allocation8 + $0x570] ss:$24 sps:$4 sm:$0xff]   ;;  %v2915_v29 = vrot.slane %v2863_v14, %v7571_v43 }
 0xe65   :  { %3558 = vmatprep.subr.bf16.mxu0 %v6809_v42  ;;  %v2919_v30 = vrot.slane %v2863_v14, %v7578_v48  ;;  %v6843_v42 = vld [vmem:[#allocation8 + $0x460] ss:$24 sps:$4 sm:$0xff]  }
 0xe66   :  { %2881 = vadd.xlane.f32.xlu0 %v2880_v36  ;;  %v2878_v32 = vmul.f32 %v7761_v34, %v7761_v34  ;;  %v2879_v33 = vmul.f32 %v7764_v35, %v7764_v35  ;;  %3559 = vmatpush2.bf16.msra.mxu0 %v6807_v45  ;;  %v6846_v45 = vld [vmem:[#allocation8 + $0x430] ss:$24 sps:$4 sm:$0xff]  }
 0xe67   :  { %3560 = vmatprep.subr.bf16.mxu0 %v6815_v52  ;;  %v6852_v52 = vld [vmem:[#allocation8 + $0x3d0] ss:$24 sps:$4 sm:$0xff]  }
 0xe68   :  { %v2883_v37 = vadd.f32 %v2879_v33, %v2878_v32 }
 0xe6a   :  { %2884 = vadd.xlane.f32.xlu1 %v2883_v37  ;;  %3561 = vmatpush2.bf16.msra.mxu0 %v6813_v51  ;;  %v6854_v51 = vld [vmem:[#allocation8 + $0x3d4] ss:$24 sps:$4 sm:$0xff]  }
 0xe6b   :  { %3562 = vmatprep.subr.bf16.mxu0 %v6821_v21  ;;  %v6860_v21 = vld [vmem:[#allocation8 + $0x374] ss:$24 sps:$4 sm:$0xff]  }
 0xe6e   :  { %3563 = vmatpush2.bf16.msra.mxu0 %v6819_v55  ;;  %v6863_v55 = vld [vmem:[#allocation8 + $0x344] ss:$24 sps:$4 sm:$0xff]  }
 0xe6f   :  { %3564 = vmatprep.subr.bf16.mxu0 %v6827_v60  ;;  %v6866_v60 = vld [vmem:[#allocation8 + $0x314] ss:$24 sps:$4 sm:$0xff]  }
 0xe72   :  { %3565 = vmatpush2.bf16.msra.mxu0 %v6825_v62  ;;  %v6869_v62 = vld [vmem:[#allocation8 + $0x5e4] ss:$24 sps:$4 sm:$0xff]  }
 0xe73   :  { %3566 = vmatprep.subr.bf16.mxu0 %v6833_v0  ;;  %v6872_v0 = vld [vmem:[#allocation8 + $0x5b4] ss:$24 sps:$4 sm:$0xff]  }
 0xe76   :  { %3567 = vmatpush2.bf16.msra.mxu0 %v6831_v2  ;;  %v6875_v2 = vld [vmem:[#allocation8 + $0x584] ss:$24 sps:$4 sm:$0xff]  }
 0xe77   :  { %3568 = vmatprep.subr.bf16.mxu0 %v6839_v5  ;;  %v6878_v5 = vld [vmem:[#allocation8 + $0x554] ss:$24 sps:$4 sm:$0xff]  }
 0xe7a   :  { %3569 = vmatpush2.bf16.msra.mxu0 %v6837_v10  ;;  %v6881_v10 = vld [vmem:[#allocation8 + $0x524] ss:$24 sps:$4 sm:$0xff]  }
 0xe7b   :  { %3624 = vmatprep.subr.bf16.mxu0 %v6845_v25  ;;  %v6884_v25 = vld [vmem:[#allocation8 + $0x4f4] ss:$24 sps:$4 sm:$0xff]  }
 0xeef   :  { %v2882_v12 = vpop.xlane.xlu0 %2881 }
 0xef0   :  { %v2886_v56 = vmul.f32 0.00390625, %v2882_v12  ;;  %v6882_v12 = vld [vmem:[#allocation8 + $0x4f0] ss:$24 sps:$4 sm:$0xff]  }
 0xef2   :  { %v2888_v11 = vadd.f32 1e-05, %v2886_v56  ;;  %v6887_v56 = vld [vmem:[#allocation8 + $0x4c4] ss:$24 sps:$4 sm:$0xff]  }
 0xef3   :  { %v2885_v3 = vpop.xlane.xlu1 %2884 }
 0xef4   :  { %7151 = vrsqrt.f32 %v2888_v11  ;;  %v2887_v15 = vmul.f32 0.00390625, %v2885_v3  ;;  %v6885_v11 = vld [vmem:[#allocation8 + $0x4c0] ss:$24 sps:$4 sm:$0xff]   ;;  %v6890_v3 = vld [vmem:[#allocation8 + $0x494] ss:$24 sps:$4 sm:$0xff]  }
 0xef6   :  { %v2889_v17 = vadd.f32 1e-05, %v2887_v15  ;;  %v6888_v15 = vld [vmem:[#allocation8 + $0x490] ss:$24 sps:$4 sm:$0xff]  }
 0xef8   :  { %7153 = vrsqrt.f32 %v2889_v17  ;;  %v3026_v17 = vld [vmem:[#allocation10 + $0x6] sm:$0x3f] }
 0xef9   :  { %v3039_v20 = vrot.slane %v3026_v17, %v7568_v41 }
 0xf01   :  { %v7152_v16 = vpop.eup %7151 }
 0xf02   :  { %v2893_v19 = vmul.f32 %v7152_v16, %v7754_v27  ;;  %v2892_v24 = vmul.f32 %v7152_v16, %v7751_v26  ;;  %v3031_v16 = vrot.slane %v3026_v17, %v7571_v43 }
 0xf04   :  { %v2908_v36 = vmul.f32 %v2904_v13, %v2893_v19  ;;  %v2907_v33 = vmul.f32 %v2900_v23, %v2892_v24 }
 0xf05   :  { %v7154_v28 = vpop.eup %7153 }
 0xf06   :  { %v2895_v31 = vmul.f32 %v7154_v28, %v7764_v35  ;;  %v2894_v32 = vmul.f32 %v7154_v28, %v7761_v34  ;;  %v7779_v27 = vadd.f32 %v2919_v30, %v2908_v36  ;;  %v7783_v9 = vadd.f32 %v2915_v29, %v2907_v33  ;;  %v6848_v34 = vld [vmem:[#allocation8 + $0x434] ss:$24 sps:$4 sm:$0xff]  }
 0xf08   :  { %v2910_v37 = vmul.f32 %v2904_v13, %v2895_v31  ;;  %v2909_v39 = vmul.f32 %v2900_v23, %v2894_v32  ;;  %v3035_v31 = vrot.slane %v3026_v17, %v7578_v48 }
 0xf0a   :  { %v7781_v22 = vadd.f32 %v2919_v30, %v2910_v37  ;;  %v7785_v26 = vadd.f32 %v2915_v29, %v2909_v39  ;;  %v3047_v39 = vrot.slane %v3026_v17, %v302_v57 }
 0xf0c   :  { %v2927_v46 = vpack.c.bf16 %v7781_v22, %v7779_v27  ;;  %v7791_v35 = vpack.c.bf16 %v7785_v26, %v7783_v9 }
 0xf0e   :  { %3570 = vmatprep.mubr.bf16.mxu0 %v2927_v46  ;;  %3613 = vmatprep.mubr.bf16.mxu1 %v2927_v46 }
 0xf0f   :  { %3571 = vmatmul.mubr.bf16.vlgmr.msra.gmra.mxu0 %v7791_v35  ;;  %3614 = vmatmul.mubr.bf16.vlgmr.msra.gmra.mxu1 %v7791_v35 }
 0xf10   :  { %3625 = vmatpush1.bf16.msra.mxu0 %v6843_v42  ;;  %3656 = vmatprep.mubr.bf16.mxu0 %v2927_v46  ;;  %v3051_v46 = vrot.slane %v3026_v17, %v306_v58 }
 0xf11   :  { %3626 = vmatprep.subr.bf16.mxu0 %v6848_v34  ;;  %6302 = vmatprep.mubr.msk.f32.mxu1 %vm7426_vm0, %v7425_v38 }
 0xf14   :  { %3627 = vmatpush1.bf16.msra.mxu0 %v6846_v45 }
 0xf15   :  { %3628 = vmatprep.subr.bf16.mxu0 %v6851_v44 }
 0xf18   :  { %3629 = vmatpush1.bf16.msra.mxu0 %v6849_v50 }
 0xf19   :  { %3630 = vmatprep.subr.bf16.mxu0 %v6854_v51 }
 0xf1c   :  { %3631 = vmatpush1.bf16.msra.mxu0 %v6852_v52 }
 0xf1d   :  { %3632 = vmatprep.subr.bf16.mxu0 %v6857_v53 }
 0xf20   :  { %3633 = vmatpush1.bf16.msra.mxu0 %v6855_v8 }
 0xf21   :  { %3634 = vmatprep.subr.bf16.mxu0 %v6860_v21 }
 0xf24   :  { %3635 = vmatpush1.bf16.msra.mxu0 %v6858_v54 }
 0xf25   :  { %3636 = vmatprep.subr.bf16.mxu0 %v6863_v55 }
 0xf28   :  { %3637 = vmatpush1.bf16.msra.mxu0 %v6861_v59 }
 0xf29   :  { %3638 = vmatprep.subr.bf16.mxu0 %v6866_v60 }
 0xf2c   :  { %3639 = vmatpush1.bf16.msra.mxu0 %v6864_v61 }
 0xf2d   :  { %3640 = vmatprep.subr.bf16.mxu0 %v6869_v62  ;;  %v3043_v62 = vrot.slane %v3026_v17, %v7608_v18 }
 0xf30   :  { %3641 = vmatpush2.bf16.msra.mxu0 %v6867_v63 }
 0xf31   :  { %3642 = vmatprep.subr.bf16.mxu0 %v6872_v0 }
 0xf34   :  { %3643 = vmatpush2.bf16.msra.mxu0 %v6870_v1 }
 0xf35   :  { %3644 = vmatprep.subr.bf16.mxu0 %v6875_v2 }
 0xf38   :  { %3645 = vmatpush2.bf16.msra.mxu0 %v6873_v4 }
 0xf39   :  { %3646 = vmatprep.subr.bf16.mxu0 %v6878_v5 }
 0xf3c   :  { %3647 = vmatpush2.bf16.msra.mxu0 %v6876_v6 }
 0xf3d   :  { %3648 = vmatprep.subr.bf16.mxu0 %v6881_v10 }
 0xf40   :  { %3649 = vmatpush2.bf16.msra.mxu0 %v6879_v47 }
 0xf41   :  { %3650 = vmatprep.subr.bf16.mxu0 %v6884_v25 }
 0xf44   :  { %3651 = vmatpush2.bf16.msra.mxu0 %v6882_v12 }
 0xf45   :  { %3652 = vmatprep.subr.bf16.mxu0 %v6887_v56 }
 0xf48   :  { %3653 = vmatpush2.bf16.msra.mxu0 %v6885_v11 }
 0xf49   :  { %3654 = vmatprep.subr.bf16.mxu0 %v6890_v3 }
 0xf4c   :  { %3655 = vmatpush2.bf16.msra.mxu0 %v6888_v15 }
 0xf4d   :  { %6335 = vmatprep.subr.mxu0 %v7425_v38 }
 0xf4f   :  { %3657 = vmatmul.mubr.bf16.vlgmr.msra.gmra.mxu0 %v7791_v35 }
 0xf50   :  { %6337 = vmatprep.mubr.msk.f32.mxu0 %vm7426_vm0, %v7425_v38 }
 0xfcf   :  { %v3572_v14 = vpop.f32.mrf.mxu0  ;;  %v3615_v19 = vpop.f32.mrf.mxu1 }
 0xfd0   :  { %v3616_v23 = vadd.f32 %v3615_v19, %v3039_v20  ;;  %v3573_v28 = vadd.f32 %v3572_v14, %v3031_v16 }
 0xfd1   :  { %v3574_v13 = vpop.f32.mrf.mxu0  ;;  %v3617_v24 = vpop.f32.mrf.mxu1 }
 0xfd2   :  { %6301 = vmatpush3.xpose.msra.mxu1 %v3616_v23  ;;  %v3618_v1 = vadd.f32 %v3617_v24, %v3043_v62  ;;  %v3575_v2 = vadd.f32 %v3574_v13, %v3035_v31 }
 0xfd3   :  { %v3576_v29 = vpop.f32.mrf.mxu0  ;;  %v3619_v30 = vpop.f32.mrf.mxu1  ;;  %6305 = vmatprep.subr.mxu1 %v7425_v38 }
 0xfd4   :  { %v7805_v36 = vadd.f32 %v3576_v29, %v3031_v16  ;;  %v7807_v32 = vadd.f32 %v3619_v30, %v3039_v20 }
 0xfd5   :  { %v3578_v33 = vpop.f32.mrf.mxu0  ;;  %6303 = vmatmul.mubr.f32.vlgmr.msra.gmra.mxu1 %v3573_v28  ;;  %v7818_v53 = vpop.f32.mrf.mxu1 }
 0xfd6   :  { %v7809_v37 = vadd.f32 %v3578_v33, %v3035_v31  ;;  %6307 = vmatprep.mubr.msk.f32.mxu1 %vm7426_vm0, %v7425_v38 }
0x100f   :  { %v3658_v42 = vpop.f32.mrf.mxu0 }
0x1010   :  { %v3659_v35 = vadd.f32 %v3658_v42, %v3047_v39 }
0x1011   :  { %v3660_v34 = vpop.f32.mrf.mxu0 }
0x1012   :  { %v3661_v45 = vadd.f32 %v3660_v34, %v3051_v46  ;;  %6306 = vmatpush3.msra.mxu1 %v3659_v35 }
0x1013   :  { %v3662_v44 = vpop.f32.mrf.mxu0  ;;  %6310 = vmatprep.subr.mxu1 %v7425_v38 }
0x1014   :  { %v3663_v50 = vadd.f32 %v3662_v44, %v3047_v39 }
0x1015   :  { %v3664_v51 = vpop.f32.mrf.mxu0 }
0x1016   :  { %v3665_v52 = vadd.f32 %v3664_v51, %v3051_v46  ;;  %v3622_v46 = vadd.f32 %v7818_v53, %v3043_v62  ;;  %v6906_v62 = vld [vmem:[#allocation11 + $0x120] ss:$8 sps:$4 sm:$0xff]  }
0x1018   :  { %6336 = vmatpush3.msra.mxu0 %v3665_v52 }
0x1095   :  { %v3733_v8 = vpop.f32.mrf.mxu1 }
0x1096   :  { %v3737_v57 = vsel %vm7599_vm1, %v3733_v8, -1000000.0 }
0x1097   :  { %v6304_v40 = vpop.f32.mrf.mxu1  ;;  %v3738_v58 = vsel %vm994_vm2, %v3737_v57, -inf }
0x1098   :  { %3739 = vmax.xlane.f32.xlu0 %v3738_v58  ;;  %v6896_v40 = vld [vmem:[#allocation11 + $0x164] ss:$8 sps:$4 sm:$0xff]   ;;  %v6899_v58 = vld [vmem:[#allocation11 + $0x154] ss:$8 sps:$4 sm:$0xff]  }
0x1121   :  { %v3740_v21 = vpop.xlane.xlu0 %3739 }
0x1122   :  { %v3741_v54 = vsub.f32 %v3737_v57, %v3740_v21  ;;  %v6893_v57 = vld [vmem:[#allocation11 + $0x174] ss:$8 sps:$4 sm:$0xff]   ;;  %v6897_v21 = vld [vmem:[#allocation11 + $0x150] ss:$8 sps:$4 sm:$0xff]  }
0x1124   :  { %v3742_v55 = vmul.f32 1.442695, %v3741_v54  ;;  %v6902_v54 = vld [vmem:[#allocation11 + $0x144] ss:$8 sps:$4 sm:$0xff]  }
0x1126   :  { %7155 = vpow2.f32 %v3742_v55  ;;  %v6900_v55 = vld [vmem:[#allocation11 + $0x140] ss:$8 sps:$4 sm:$0xff]  }
0x1133   :  { %v7156_v59 = vpop.eup %7155 }
0x1134   :  { %v3744_v60 = vsel %vm994_vm2, %v7156_v59, 0.0 }
0x1135   :  { %3745 = vadd.xlane.f32.xlu1 %v3744_v60  ;;  %v6903_v60 = vld [vmem:[#allocation11 + $0x130] ss:$8 sps:$4 sm:$0xff]  }
0x11be   :  { %v3746_v61 = vpop.xlane.xlu1 %3745 }
0x11bf   :  { %7157 = vrcp.f32 %v3746_v61  ;;  %v6908_v61 = vld [vmem:[#allocation11 + $0x124] ss:$8 sps:$4 sm:$0xff]  }
0x11cc   :  { %v7158_v63 = vpop.eup %7157 }
0x11cd   :  { %v3748_v0 = vmul.f32 %v7158_v63, %v7156_v59  ;;  %v6905_v59 = vld [vmem:[#allocation11 + $0x134] ss:$8 sps:$4 sm:$0xff]  }
0x11ce   :  { %v6911_v63 = vld [vmem:[#allocation11 + $0x114] ss:$8 sps:$4 sm:$0xff]  }
0x11cf   :  { %6308 = vmatmul.mubr.msk.f32.vlgmr.msra.gmra.mxu1 %vm994_vm2, %v3748_v0  ;;  %v6909_v0 = vld [vmem:[#allocation11 + $0x110] ss:$8 sps:$4 sm:$0xff]  }
0x11d0   :  { %6311 = vmatpush3.xpose.msra.mxu1 %v3618_v1  ;;  %6312 = vmatprep.mubr.msk.f32.mxu1 %vm7426_vm0, %v7425_v38  ;;  %v6914_v1 = vld [vmem:[#allocation11 + $0x104] ss:$8 sps:$4 sm:$0xff]  }
0x11d1   :  { %6315 = vmatprep.subr.mxu1 %v7425_v38 }
0x11d3   :  { %6313 = vmatmul.mubr.f32.vlgmr.msra.gmra.mxu1 %v3575_v2  ;;  %v6912_v2 = vld [vmem:[#allocation11 + $0x100] ss:$8 sps:$4 sm:$0xff]  }
0x11d4   :  { %6316 = vmatpush3.msra.mxu1 %v3661_v45  ;;  %6317 = vmatprep.mubr.msk.f32.mxu1 %vm7426_vm0, %v7425_v38 }
0x11d5   :  { %6320 = vmatprep.subr.mxu1 %v7425_v38 }
0x128f   :  { %v7832_v4 = vpop.f32.mrf.mxu1 }
0x1291   :  { %v6309_v5 = vpop.f32.mrf.mxu1 }
0x1292   :  { %v6917_v5 = vld [vmem:[#allocation11 + $0x1f4] ss:$8 sps:$4 sm:$0xff]  }
0x1293   :  { %v3889_v6 = vpop.f32.mrf.mxu1 }
0x1294   :  { %v3893_v10 = vsel %vm7599_vm1, %v3889_v6, -1000000.0  ;;  %v6915_v6 = vld [vmem:[#allocation11 + $0x1f0] ss:$8 sps:$4 sm:$0xff]  }
0x1295   :  { %v6314_v47 = vpop.f32.mrf.mxu1  ;;  %v3894_v25 = vsel %vm994_vm2, %v3893_v10, -inf }
0x1296   :  { %3895 = vmax.xlane.f32.xlu0 %v3894_v25  ;;  %v6918_v47 = vld [vmem:[#allocation11 + $0x1e0] ss:$8 sps:$4 sm:$0xff]   ;;  %v6923_v25 = vld [vmem:[#allocation11 + $0x1d4] ss:$8 sps:$4 sm:$0xff]  }
0x131f   :  { %v3896_v12 = vpop.xlane.xlu0 %3895 }
0x1320   :  { %v3897_v56 = vsub.f32 %v3893_v10, %v3896_v12  ;;  %v6920_v10 = vld [vmem:[#allocation11 + $0x1e4] ss:$8 sps:$4 sm:$0xff]   ;;  %v6921_v12 = vld [vmem:[#allocation11 + $0x1d0] ss:$8 sps:$4 sm:$0xff]  }
0x1322   :  { %v3898_v11 = vmul.f32 1.442695, %v3897_v56  ;;  %v6926_v56 = vld [vmem:[#allocation11 + $0x1c4] ss:$8 sps:$4 sm:$0xff]  }
0x1324   :  { %7159 = vpow2.f32 %v3898_v11  ;;  %v6924_v11 = vld [vmem:[#allocation11 + $0x1c0] ss:$8 sps:$4 sm:$0xff]  }
0x1331   :  { %v7160_v3 = vpop.eup %7159 }
0x1332   :  { %v3900_v15 = vsel %vm994_vm2, %v7160_v3, 0.0 }
0x1333   :  { %3901 = vadd.xlane.f32.xlu1 %v3900_v15  ;;  %v6927_v15 = vld [vmem:[#allocation11 + $0x1b0] ss:$8 sps:$4 sm:$0xff]  }
0x13bc   :  { %v3902_v17 = vpop.xlane.xlu1 %3901 }
0x13bd   :  { %7161 = vrcp.f32 %v3902_v17  ;;  %v6932_v17 = vld [vmem:[#allocation11 + $0x1a4] ss:$8 sps:$4 sm:$0xff]  }
0x13ca   :  { %v7162_v20 = vpop.eup %7161 }
0x13cb   :  { %v3904_v16 = vmul.f32 %v7162_v20, %v7160_v3  ;;  %v6929_v3 = vld [vmem:[#allocation11 + $0x1b4] ss:$8 sps:$4 sm:$0xff]   ;;  %v6930_v20 = vld [vmem:[#allocation11 + $0x1a0] ss:$8 sps:$4 sm:$0xff]  }
0x13cd   :  { %6318 = vmatmul.mubr.msk.f32.vlgmr.msra.gmra.mxu1 %vm994_vm2, %v3904_v16  ;;  %v6935_v16 = vld [vmem:[#allocation11 + $0x194] ss:$8 sps:$4 sm:$0xff]  }
0x13ce   :  { %6321 = vmatpush3.xpose.msra.mxu1 %v7807_v32  ;;  %6322 = vmatprep.mubr.msk.f32.mxu1 %vm7426_vm0, %v7425_v38 }
0x13cf   :  { %6325 = vmatprep.subr.mxu1 %v7425_v38 }
0x13d1   :  { %6323 = vmatmul.mubr.f32.vlgmr.msra.gmra.mxu1 %v7805_v36 }
0x13d2   :  { %6326 = vmatpush3.msra.mxu1 %v3663_v50  ;;  %6327 = vmatprep.mubr.msk.f32.mxu1 %vm7426_vm0, %v7425_v38 }
0x13d3   :  { %6330 = vmatprep.subr.mxu1 %v7425_v38 }
0x148d   :  { %v7847_v7 = vpop.f32.mrf.mxu1 }
0x148f   :  { %v6319_v14 = vpop.f32.mrf.mxu1 }
0x1490   :  { %v6933_v14 = vld [vmem:[#allocation11 + $0x190] ss:$8 sps:$4 sm:$0xff]  }
0x1491   :  { %v4045_v19 = vpop.f32.mrf.mxu1 }
0x1492   :  { %v4049_v23 = vsel %vm7639_vm3, %v4045_v19, -1000000.0 }
0x1493   :  { %v6324_v13 = vpop.f32.mrf.mxu1  ;;  %v4050_v24 = vsel %vm994_vm2, %v4049_v23, -inf }
0x1494   :  { %4051 = vmax.xlane.f32.xlu0 %v4050_v24  ;;  %v6938_v24 = vld [vmem:[#allocation11 + $0x184] ss:$8 sps:$4 sm:$0xff]  }
0x151d   :  { %v4052_v28 = vpop.xlane.xlu0 %4051 }
0x151e   :  { %v4053_v29 = vsub.f32 %v4049_v23, %v4052_v28  ;;  %v6936_v28 = vld [vmem:[#allocation11 + $0x180] ss:$8 sps:$4 sm:$0xff]  }
0x1520   :  { %v4054_v30 = vmul.f32 1.442695, %v4053_v29 }
0x1522   :  { %7163 = vpow2.f32 %v4054_v30 }
0x152f   :  { %v7164_v31 = vpop.eup %7163 }
0x1530   :  { %v4056_v36 = vsel %vm994_vm2, %v7164_v31, 0.0 }
0x1531   :  { %4057 = vadd.xlane.f32.xlu1 %v4056_v36 }
0x15ba   :  { %v4058_v32 = vpop.xlane.xlu1 %4057 }
0x15bb   :  { %7165 = vrcp.f32 %v4058_v32  ;;  %v6064_v32 = vld [vmem:[%s7967_s5 + $0x2] sm:$0x3] }
0x15c8   :  { %v7166_v33 = vpop.eup %7165 }
0x15c9   :  { %v4060_v39 = vmul.f32 %v7166_v33, %v7164_v31  ;;  %v4336_v33 = vrot.slane %v6064_v32, %v7571_v43 }
0x15cb   :  { %6328 = vmatmul.mubr.msk.f32.vlgmr.msra.gmra.mxu1 %vm994_vm2, %v4060_v39  ;;  %v4340_v39 = vrot.slane %v6064_v32, %v7578_v48 }
0x15cc   :  { %6331 = vmatpush3.xpose.msra.mxu1 %v3622_v46  ;;  %6332 = vmatprep.mubr.msk.f32.mxu1 %vm7426_vm0, %v7425_v38 }
0x15cd   :  { %4503 = vmatprep.subr.bf16.mxu1 %v6893_v57  ;;  %v6944_v57 = vld [vmem:[#allocation14 + $0x2ec] ss:$16 sps:$4 sm:$0xff]  }
0x15cf   :  { %6333 = vmatmul.mubr.f32.vlgmr.msra.gmra.mxu1 %v7809_v37  ;;  %v6891_v37 = vld [vmem:[#allocation11 + $0x170] ss:$8 sps:$4 sm:$0xff]  }
0x15d0   :  { %4504 = vmatpush1.bf16.msra.mxu1 %v6891_v37  ;;  %v6942_v37 = vld [vmem:[#allocation14 + $0x2e8] ss:$16 sps:$4 sm:$0xff]  }
0x15d1   :  { %4505 = vmatprep.subr.bf16.mxu1 %v6896_v40  ;;  %v6947_v40 = vld [vmem:[#allocation14 + $0x2c4] ss:$16 sps:$4 sm:$0xff]  }
0x15d4   :  { %4506 = vmatpush1.bf16.msra.mxu1 %v6894_v49  ;;  %v6950_v49 = vld [vmem:[#allocation14 + $0x2cc] ss:$16 sps:$4 sm:$0xff]  }
0x15d5   :  { %4507 = vmatprep.subr.bf16.mxu1 %v6899_v58  ;;  %v6945_v58 = vld [vmem:[#allocation14 + $0x2c0] ss:$16 sps:$4 sm:$0xff]  }
0x15d8   :  { %4508 = vmatpush1.bf16.msra.mxu1 %v6897_v21  ;;  %v6956_v21 = vld [vmem:[#allocation14 + $0x2ac] ss:$16 sps:$4 sm:$0xff]  }
0x15d9   :  { %4509 = vmatprep.subr.bf16.mxu1 %v6902_v54  ;;  %v6951_v54 = vld [vmem:[#allocation14 + $0x2a0] ss:$16 sps:$4 sm:$0xff]  }
0x15dc   :  { %4510 = vmatpush1.bf16.msra.mxu1 %v6900_v55  ;;  %v6954_v55 = vld [vmem:[#allocation14 + $0x2a8] ss:$16 sps:$4 sm:$0xff]  }
0x15dd   :  { %4511 = vmatprep.subr.bf16.mxu1 %v6905_v59  ;;  %v6959_v59 = vld [vmem:[#allocation14 + $0x284] ss:$16 sps:$4 sm:$0xff]  }
0x15e0   :  { %4512 = vmatpush1.bf16.msra.mxu1 %v6903_v60  ;;  %v6962_v60 = vld [vmem:[#allocation14 + $0x28c] ss:$16 sps:$4 sm:$0xff]  }
0x15e1   :  { %4513 = vmatprep.subr.bf16.mxu1 %v6908_v61  ;;  %v6957_v61 = vld [vmem:[#allocation14 + $0x280] ss:$16 sps:$4 sm:$0xff]  }
0x15e4   :  { %4514 = vmatpush1.bf16.msra.mxu1 %v6906_v62  ;;  %v6960_v62 = vld [vmem:[#allocation14 + $0x288] ss:$16 sps:$4 sm:$0xff]  }
0x15e5   :  { %4515 = vmatprep.subr.bf16.mxu1 %v6911_v63  ;;  %v6965_v63 = vld [vmem:[#allocation14 + $0x264] ss:$16 sps:$4 sm:$0xff]  }
0x15e8   :  { %4516 = vmatpush1.bf16.msra.mxu1 %v6909_v0  ;;  %v6968_v0 = vld [vmem:[#allocation14 + $0x26c] ss:$16 sps:$4 sm:$0xff]  }
0x15e9   :  { %4517 = vmatprep.subr.bf16.mxu1 %v6914_v1  ;;  %v6963_v1 = vld [vmem:[#allocation14 + $0x260] ss:$16 sps:$4 sm:$0xff]  }
0x15ec   :  { %4518 = vmatpush1.bf16.msra.mxu1 %v6912_v2  ;;  %v6966_v2 = vld [vmem:[#allocation14 + $0x268] ss:$16 sps:$4 sm:$0xff]  }
0x15ed   :  { %4519 = vmatprep.subr.bf16.mxu1 %v6917_v5  ;;  %v6971_v5 = vld [vmem:[#allocation14 + $0x244] ss:$16 sps:$4 sm:$0xff]  }
0x15f0   :  { %4520 = vmatpush2.bf16.msra.mxu1 %v6915_v6  ;;  %v6974_v6 = vld [vmem:[#allocation14 + $0x24c] ss:$16 sps:$4 sm:$0xff]  }
0x15f1   :  { %4521 = vmatprep.subr.bf16.mxu1 %v6920_v10  ;;  %v6969_v10 = vld [vmem:[#allocation14 + $0x240] ss:$16 sps:$4 sm:$0xff]  }
0x15f4   :  { %4522 = vmatpush2.bf16.msra.mxu1 %v6918_v47  ;;  %v6972_v47 = vld [vmem:[#allocation14 + $0x248] ss:$16 sps:$4 sm:$0xff]  }
0x15f5   :  { %4523 = vmatprep.subr.bf16.mxu1 %v6923_v25  ;;  %v6977_v25 = vld [vmem:[#allocation14 + $0x224] ss:$16 sps:$4 sm:$0xff]  }
0x15f8   :  { %4524 = vmatpush2.bf16.msra.mxu1 %v6921_v12  ;;  %v6980_v12 = vld [vmem:[#allocation14 + $0x22c] ss:$16 sps:$4 sm:$0xff]  }
0x15f9   :  { %4525 = vmatprep.subr.bf16.mxu1 %v6926_v56  ;;  %v6975_v56 = vld [vmem:[#allocation14 + $0x220] ss:$16 sps:$4 sm:$0xff]  }
0x15fc   :  { %4526 = vmatpush2.bf16.msra.mxu1 %v6924_v11  ;;  %v6978_v11 = vld [vmem:[#allocation14 + $0x228] ss:$16 sps:$4 sm:$0xff]  }
0x15fd   :  { %4527 = vmatprep.subr.bf16.mxu1 %v6929_v3  ;;  %v6983_v3 = vld [vmem:[#allocation14 + $0x204] ss:$16 sps:$4 sm:$0xff]  }
0x1600   :  { %4528 = vmatpush2.bf16.msra.mxu1 %v6927_v15  ;;  %v6986_v15 = vld [vmem:[#allocation14 + $0x20c] ss:$16 sps:$4 sm:$0xff]  }
0x1601   :  { %4529 = vmatprep.subr.bf16.mxu1 %v6932_v17  ;;  %v6981_v17 = vld [vmem:[#allocation14 + $0x200] ss:$16 sps:$4 sm:$0xff]  }
0x1604   :  { %4530 = vmatpush2.bf16.msra.mxu1 %v6930_v20  ;;  %v6984_v20 = vld [vmem:[#allocation14 + $0x208] ss:$16 sps:$4 sm:$0xff]  }
0x1605   :  { %4531 = vmatprep.subr.bf16.mxu1 %v6935_v16  ;;  %v6989_v16 = vld [vmem:[#allocation14 + $0x3e4] ss:$16 sps:$4 sm:$0xff]  }
0x1608   :  { %4532 = vmatpush2.bf16.msra.mxu1 %v6933_v14  ;;  %v6992_v14 = vld [vmem:[#allocation14 + $0x3ec] ss:$16 sps:$4 sm:$0xff]  }
0x1609   :  { %4533 = vmatprep.subr.bf16.mxu1 %v6938_v24 }
0x160c   :  { %4534 = vmatpush2.bf16.msra.mxu1 %v6936_v28 }
0x160d   :  { %5069 = vmatprep.subr.bf16.mxu1 %v6944_v57  ;;  %v7016_v57 = vld [vmem:[#allocation14 + $0x36c] ss:$16 sps:$4 sm:$0xff]  }
0x168b   :  { %v7858_v42 = vpop.f32.mrf.mxu1 }
0x168c   :  { %v4295_v31 = vpack.c.bf16 %v7858_v42, %v7832_v4 }
0x168d   :  { %v6329_v35 = vpop.f32.mrf.mxu1 }
0x168f   :  { %v4201_v34 = vpop.f32.mrf.mxu1 }
0x1690   :  { %v4205_v45 = vsel %vm7639_vm3, %v4201_v34, -1000000.0 }
0x1691   :  { %v6334_v44 = vpop.f32.mrf.mxu1  ;;  %v4206_v50 = vsel %vm994_vm2, %v4205_v45, -inf }
0x1692   :  { %4207 = vmax.xlane.f32.xlu0 %v4206_v50 }
0x171b   :  { %v4208_v51 = vpop.xlane.xlu0 %4207 }
0x171c   :  { %v4209_v52 = vsub.f32 %v4205_v45, %v4208_v51 }
0x171e   :  { %v4210_v53 = vmul.f32 1.442695, %v4209_v52 }
0x1720   :  { %7167 = vpow2.f32 %v4210_v53 }
0x172d   :  { %v7863_v8 = vpop.eup %7167 }
0x172e   :  { %v4212_v38 = vsel %vm994_vm2, %v7863_v8, 0.0 }
0x172f   :  { %4213 = vadd.xlane.f32.xlu1 %v4212_v38  ;;  %v6939_v38 = vld [vmem:[#allocation14 + $0x2e0] ss:$16 sps:$4 sm:$0xff]  }
0x17b8   :  { %v4214_v19 = vpop.xlane.xlu1 %4213 }
0x17b9   :  { %7169 = vrcp.f32 %v4214_v19  ;;  %v6987_v19 = vld [vmem:[#allocation14 + $0x3e0] ss:$16 sps:$4 sm:$0xff]  }
0x17c6   :  { %v7170_v23 = vpop.eup %7169 }
0x17c7   :  { %v4216_v13 = vmul.f32 %v7170_v23, %v7863_v8  ;;  %v6990_v23 = vld [vmem:[#allocation14 + $0x3e8] ss:$16 sps:$4 sm:$0xff]  }
0x17c9   :  { %6338 = vmatmul.mubr.msk.f32.vlgmr.msra.gmra.mxu0 %vm994_vm2, %v4216_v13 }
0x1889   :  { %v4286_v29 = vpop.f32.mrf.mxu0 }
0x188a   :  { %v4296_v30 = vpack.c.bf16 %v4286_v29, %v7847_v7 }
0x188b   :  { %v6339_v36 = vpop.f32.mrf.mxu0 }
0x188c   :  { %4535 = vmatprep.mubr.bf16.mxu1 %v4296_v30 }
0x188d   :  { %4536 = vmatmul.mubr.bf16.vlgmr.msra.gmra.mxu1 %v4295_v31 }
0x188e   :  { %5070 = vmatpush1.bf16.msra.mxu1 %v6942_v37  ;;  %v7013_v37 = vld [vmem:[#allocation14 + $0x364] ss:$16 sps:$4 sm:$0xff]  }
0x188f   :  { %5071 = vmatprep.subr.bf16.mxu1 %v6950_v49  ;;  %v7014_v49 = vld [vmem:[#allocation14 + $0x368] ss:$16 sps:$4 sm:$0xff]  }
0x194d   :  { %v4537_v46 = vpop.f32.mrf.mxu1 }
0x194e   :  { %v4538_v35 = vadd.f32 %v4537_v46, %v4336_v33 }
0x194f   :  { %v4539_v34 = vpop.f32.mrf.mxu1 }
0x1950   :  { %v4540_v45 = vadd.f32 %v4539_v34, %v4340_v39  ;;  %v7878_v7 = vadd.f32 %v4538_v35, %v7783_v9 }
0x1951   :  { %v4541_v44 = vpop.f32.mrf.mxu1 }
0x1952   :  { %v7881_v4 = vadd.f32 %v4540_v45, %v7779_v27  ;;  %v4542_v42 = vadd.f32 %v4541_v44, %v4336_v33  ;;  %v6941_v27 = vld [vmem:[#allocation14 + $0x2e4] ss:$16 sps:$4 sm:$0xff]  }
0x1953   :  { %v4543_v50 = vpop.f32.mrf.mxu1  ;;  %5026 = vmatprep.subr.bf16.mxu0 %v6941_v27  ;;  %v6995_v44 = vld [vmem:[#allocation14 + $0x3c4] ss:$16 sps:$4 sm:$0xff]   ;;  %v7010_v27 = vld [vmem:[#allocation14 + $0x38c] ss:$16 sps:$4 sm:$0xff]  }
0x1954   :  { %v4544_v51 = vadd.f32 %v4543_v50, %v4340_v39  ;;  %v4554_v52 = vadd.f32 %v7881_v4, %v7878_v7  ;;  %v7886_v53 = vadd.f32 %v4542_v42, %v7785_v26  ;;  %5027 = vmatpush1.bf16.msra.mxu0 %v6939_v38  ;;  %v6948_v26 = vld [vmem:[#allocation14 + $0x2c8] ss:$16 sps:$4 sm:$0xff]   ;;  %v7001_v50 = vld [vmem:[#allocation14 + $0x3a4] ss:$16 sps:$4 sm:$0xff]  }
0x1955   :  { %5028 = vmatprep.subr.bf16.mxu0 %v6947_v40  ;;  %5072 = vmatpush1.bf16.msra.mxu1 %v6948_v26  ;;  %v6996_v42 = vld [vmem:[#allocation14 + $0x3c8] ss:$16 sps:$4 sm:$0xff]   ;;  %v7011_v40 = vld [vmem:[#allocation14 + $0x360] ss:$16 sps:$4 sm:$0xff]   ;;  %v7022_v26 = vld [vmem:[#allocation14 + $0x34c] ss:$16 sps:$4 sm:$0xff]  }
0x1956   :  { %v7889_v8 = vadd.f32 %v4544_v51, %v7781_v22  ;;  %4555 = vadd.xlane.f32.xlu0 %v4554_v52  ;;  %v6953_v22 = vld [vmem:[#allocation14 + $0x2a4] ss:$16 sps:$4 sm:$0xff]   ;;  %5073 = vmatprep.subr.bf16.mxu1 %v6956_v21  ;;  %v7004_v51 = vld [vmem:[#allocation14 + $0x3ac] ss:$16 sps:$4 sm:$0xff]   ;;  %v6999_v52 = vld [vmem:[#allocation14 + $0x3a0] ss:$16 sps:$4 sm:$0xff]  }
0x1957   :  { %v7008_v38 = vld [vmem:[#allocation14 + $0x388] ss:$16 sps:$4 sm:$0xff]  }
0x1958   :  { %v4557_v9 = vadd.f32 %v7889_v8, %v7886_v53  ;;  %5029 = vmatpush1.bf16.msra.mxu0 %v6945_v58  ;;  %v7019_v58 = vld [vmem:[#allocation14 + $0x344] ss:$16 sps:$4 sm:$0xff]   ;;  %v7020_v21 = vld [vmem:[#allocation14 + $0x348] ss:$16 sps:$4 sm:$0xff]  }
0x1959   :  { %5030 = vmatprep.subr.bf16.mxu0 %v6953_v22  ;;  %5074 = vmatpush1.bf16.msra.mxu1 %v6954_v55  ;;  %v7017_v22 = vld [vmem:[#allocation14 + $0x340] ss:$16 sps:$4 sm:$0xff]   ;;  %v7028_v55 = vld [vmem:[#allocation14 + $0x32c] ss:$16 sps:$4 sm:$0xff]  }
0x195a   :  { %4558 = vadd.xlane.f32.xlu1 %v4557_v9  ;;  %5075 = vmatprep.subr.bf16.mxu1 %v6962_v60  ;;  %v7005_v9 = vld [vmem:[#allocation14 + $0x380] ss:$16 sps:$4 sm:$0xff]   ;;  %v7026_v60 = vld [vmem:[#allocation14 + $0x328] ss:$16 sps:$4 sm:$0xff]  }
0x195c   :  { %5031 = vmatpush1.bf16.msra.mxu0 %v6951_v54  ;;  %v7025_v54 = vld [vmem:[#allocation14 + $0x324] ss:$16 sps:$4 sm:$0xff]  }
0x195d   :  { %5032 = vmatprep.subr.bf16.mxu0 %v6959_v59  ;;  %5076 = vmatpush1.bf16.msra.mxu1 %v6960_v62  ;;  %v7023_v59 = vld [vmem:[#allocation14 + $0x320] ss:$16 sps:$4 sm:$0xff]   ;;  %v7034_v62 = vld [vmem:[#allocation14 + $0x30c] ss:$16 sps:$4 sm:$0xff]  }
0x195e   :  { %5077 = vmatprep.subr.bf16.mxu1 %v6968_v0  ;;  %v7032_v0 = vld [vmem:[#allocation14 + $0x308] ss:$16 sps:$4 sm:$0xff]  }
0x1960   :  { %5033 = vmatpush1.bf16.msra.mxu0 %v6957_v61  ;;  %v7031_v61 = vld [vmem:[#allocation14 + $0x304] ss:$16 sps:$4 sm:$0xff]  }
0x1961   :  { %5034 = vmatprep.subr.bf16.mxu0 %v6965_v63  ;;  %5078 = vmatpush1.bf16.msra.mxu1 %v6966_v2  ;;  %v7029_v63 = vld [vmem:[#allocation14 + $0x300] ss:$16 sps:$4 sm:$0xff]   ;;  %v7040_v2 = vld [vmem:[#allocation16 + $0x374] ss:$8 sps:$4 sm:$0xff]  }
0x1962   :  { %5079 = vmatprep.subr.bf16.mxu1 %v6974_v6 }
0x1964   :  { %5035 = vmatpush1.bf16.msra.mxu0 %v6963_v1  ;;  %v7037_v1 = vld [vmem:[#allocation16 + $0x274] ss:$8 sps:$4 sm:$0xff]  }
0x1965   :  { %5036 = vmatprep.subr.bf16.mxu0 %v6971_v5  ;;  %5080 = vmatpush1.bf16.msra.mxu1 %v6972_v47 }
0x1966   :  { %5081 = vmatprep.subr.bf16.mxu1 %v6980_v12 }
0x1968   :  { %5037 = vmatpush1.bf16.msra.mxu0 %v6969_v10 }
0x1969   :  { %5038 = vmatprep.subr.bf16.mxu0 %v6977_v25  ;;  %5082 = vmatpush1.bf16.msra.mxu1 %v6978_v11 }
0x196a   :  { %5083 = vmatprep.subr.bf16.mxu1 %v6986_v15 }
0x196c   :  { %5039 = vmatpush1.bf16.msra.mxu0 %v6975_v56  ;;  %v6097_v56 = vld [vmem:[%s7968_s6 + $0x2] sm:$0x3] }
0x196d   :  { %5040 = vmatprep.subr.bf16.mxu0 %v6983_v3  ;;  %5084 = vmatpush1.bf16.msra.mxu1 %v6984_v20  ;;  %v4553_v3 = vld [vmem:[#allocation13 + $0x2] sm:$0x3]  ;;  %v4594_v20 = vrot.slane %v6097_v56, %v7578_v48 }
0x196e   :  { %5085 = vmatprep.subr.bf16.mxu1 %v6992_v14 }
0x1970   :  { %5041 = vmatpush1.bf16.msra.mxu0 %v6981_v17  ;;  %v4590_v17 = vrot.slane %v6097_v56, %v7571_v43  ;;  %v7097_v56 = vld [vmem:[#allocation16 + $0x2d4] ss:$8 sps:$4 sm:$0xff]  }
0x1971   :  { %5042 = vmatprep.subr.bf16.mxu0 %v6989_v16  ;;  %5086 = vmatpush2.bf16.msra.mxu1 %v6990_v23  ;;  %v4609_v23 = vrot.slane %v4553_v3, %v7578_v48 }
0x1974   :  { %5043 = vmatpush2.bf16.msra.mxu0 %v6987_v19  ;;  %v4605_v19 = vrot.slane %v4553_v3, %v7571_v43  ;;  %v7095_v3 = vld [vmem:[#allocation16 + $0x2d0] ss:$8 sps:$4 sm:$0xff]  }
0x1975   :  { %5044 = vmatprep.subr.bf16.mxu0 %v6995_v44  ;;  %v7038_v44 = vld [vmem:[#allocation16 + $0x370] ss:$8 sps:$4 sm:$0xff]  }
0x19df   :  { %v4556_v13 = vpop.xlane.xlu0 %4555 }
0x19e0   :  { %v4560_v24 = vmul.f32 0.00390625, %v4556_v13 }
0x19e2   :  { %v7894_v28 = vsub.f32 %v7878_v7, %v4560_v24  ;;  %v7897_v29 = vsub.f32 %v7881_v4, %v4560_v24  ;;  %v6998_v7 = vld [vmem:[#allocation14 + $0x3cc] ss:$16 sps:$4 sm:$0xff]   ;;  %v6993_v4 = vld [vmem:[#allocation14 + $0x3c0] ss:$16 sps:$4 sm:$0xff]  }
0x19e3   :  { %v4559_v30 = vpop.xlane.xlu1 %4558  ;;  %5087 = vmatprep.subr.bf16.mxu1 %v6998_v7  ;;  %5045 = vmatpush2.bf16.msra.mxu0 %v6993_v4  ;;  %v7046_v7 = vld [vmem:[#allocation16 + $0x364] ss:$8 sps:$4 sm:$0xff]   ;;  %v7041_v4 = vld [vmem:[#allocation16 + $0x260] ss:$8 sps:$4 sm:$0xff]  }
0x19e4   :  { %v4561_v31 = vmul.f32 0.00390625, %v4559_v30  ;;  %v4566_v36 = vmul.f32 %v7894_v28, %v7894_v28  ;;  %v4567_v32 = vmul.f32 %v7897_v29, %v7897_v29  ;;  %5088 = vmatpush2.bf16.msra.mxu1 %v6996_v42  ;;  %5046 = vmatprep.subr.bf16.mxu0 %v7001_v50  ;;  %v7044_v42 = vld [vmem:[#allocation16 + $0x360] ss:$8 sps:$4 sm:$0xff]   ;;  %v7049_v50 = vld [vmem:[#allocation16 + $0x254] ss:$8 sps:$4 sm:$0xff]  }
0x19e5   :  { %5089 = vmatprep.subr.bf16.mxu1 %v7004_v51  ;;  %v7052_v51 = vld [vmem:[#allocation16 + $0x354] ss:$8 sps:$4 sm:$0xff]  }
0x19e6   :  { %v7904_v33 = vsub.f32 %v7886_v53, %v4561_v31  ;;  %v7907_v39 = vsub.f32 %v7889_v8, %v4561_v31  ;;  %v4570_v46 = vadd.f32 %v4567_v32, %v4566_v36  ;;  %v7002_v53 = vld [vmem:[#allocation14 + $0x3a8] ss:$16 sps:$4 sm:$0xff]   ;;  %v7007_v8 = vld [vmem:[#allocation14 + $0x384] ss:$16 sps:$4 sm:$0xff]  }
0x19e7   :  { %5047 = vmatpush2.bf16.msra.mxu0 %v6999_v52  ;;  %v7047_v52 = vld [vmem:[#allocation16 + $0x250] ss:$8 sps:$4 sm:$0xff]  }
0x19e8   :  { %4571 = vadd.xlane.f32.xlu0 %v4570_v46  ;;  %v4568_v35 = vmul.f32 %v7904_v33, %v7904_v33  ;;  %v4569_v34 = vmul.f32 %v7907_v39, %v7907_v39  ;;  %5090 = vmatpush2.bf16.msra.mxu1 %v7002_v53  ;;  %v7050_v53 = vld [vmem:[#allocation16 + $0x350] ss:$8 sps:$4 sm:$0xff]  }
0x19e9   :  { %5048 = vmatprep.subr.bf16.mxu0 %v7007_v8  ;;  %5091 = vmatprep.subr.bf16.mxu1 %v7010_v27  ;;  %v7055_v8 = vld [vmem:[#allocation16 + $0x244] ss:$8 sps:$4 sm:$0xff]   ;;  %v7056_v27 = vld [vmem:[#allocation16 + $0x340] ss:$8 sps:$4 sm:$0xff]  }
0x19ea   :  { %v4573_v45 = vadd.f32 %v4569_v34, %v4568_v35 }
0x19eb   :  { %5049 = vmatpush2.bf16.msra.mxu0 %v7005_v9  ;;  %v7058_v9 = vld [vmem:[#allocation16 + $0x344] ss:$8 sps:$4 sm:$0xff]  }
0x19ec   :  { %4574 = vadd.xlane.f32.xlu1 %v4573_v45  ;;  %5092 = vmatpush2.bf16.msra.mxu1 %v7008_v38  ;;  %v7035_v45 = vld [vmem:[#allocation16 + $0x270] ss:$8 sps:$4 sm:$0xff]   ;;  %v7053_v38 = vld [vmem:[#allocation16 + $0x240] ss:$8 sps:$4 sm:$0xff]  }
0x19ed   :  { %5050 = vmatprep.subr.bf16.mxu0 %v7013_v37  ;;  %5093 = vmatprep.subr.bf16.mxu1 %v7016_v57  ;;  %v7061_v37 = vld [vmem:[#allocation16 + $0x234] ss:$8 sps:$4 sm:$0xff]  }
0x19ee   :  { %v7064_v57 = vld [vmem:[#allocation16 + $0x334] ss:$8 sps:$4 sm:$0xff]  }
0x19ef   :  { %5051 = vmatpush2.bf16.msra.mxu0 %v7011_v40  ;;  %v7059_v40 = vld [vmem:[#allocation16 + $0x230] ss:$8 sps:$4 sm:$0xff]  }
0x19f0   :  { %5094 = vmatpush2.bf16.msra.mxu1 %v7014_v49  ;;  %5052 = vmatprep.subr.bf16.mxu0 %v7019_v58  ;;  %v7062_v49 = vld [vmem:[#allocation16 + $0x330] ss:$8 sps:$4 sm:$0xff]   ;;  %v7067_v58 = vld [vmem:[#allocation16 + $0x224] ss:$8 sps:$4 sm:$0xff]  }
0x19f1   :  { %5095 = vmatprep.subr.bf16.mxu1 %v7022_v26  ;;  %v7070_v26 = vld [vmem:[#allocation16 + $0x324] ss:$8 sps:$4 sm:$0xff]  }
0x19f3   :  { %5053 = vmatpush2.bf16.msra.mxu0 %v7017_v22  ;;  %v7065_v22 = vld [vmem:[#allocation16 + $0x220] ss:$8 sps:$4 sm:$0xff]  }
0x19f4   :  { %5096 = vmatpush2.bf16.msra.mxu1 %v7020_v21  ;;  %5054 = vmatprep.subr.bf16.mxu0 %v7025_v54  ;;  %v7068_v21 = vld [vmem:[#allocation16 + $0x320] ss:$8 sps:$4 sm:$0xff]   ;;  %v7073_v54 = vld [vmem:[#allocation16 + $0x214] ss:$8 sps:$4 sm:$0xff]  }
0x19f5   :  { %5097 = vmatprep.subr.bf16.mxu1 %v7028_v55  ;;  %v7076_v55 = vld [vmem:[#allocation16 + $0x314] ss:$8 sps:$4 sm:$0xff]  }
0x19f7   :  { %5055 = vmatpush2.bf16.msra.mxu0 %v7023_v59  ;;  %v7071_v59 = vld [vmem:[#allocation16 + $0x210] ss:$8 sps:$4 sm:$0xff]  }
0x19f8   :  { %5098 = vmatpush2.bf16.msra.mxu1 %v7026_v60  ;;  %5056 = vmatprep.subr.bf16.mxu0 %v7031_v61  ;;  %v7074_v60 = vld [vmem:[#allocation16 + $0x310] ss:$8 sps:$4 sm:$0xff]   ;;  %v7079_v61 = vld [vmem:[#allocation16 + $0x204] ss:$8 sps:$4 sm:$0xff]  }
0x19f9   :  { %5099 = vmatprep.subr.bf16.mxu1 %v7034_v62  ;;  %v7082_v62 = vld [vmem:[#allocation16 + $0x304] ss:$8 sps:$4 sm:$0xff]  }
0x19fb   :  { %5057 = vmatpush2.bf16.msra.mxu0 %v7029_v63  ;;  %v7077_v63 = vld [vmem:[#allocation16 + $0x200] ss:$8 sps:$4 sm:$0xff]  }
0x19fc   :  { %5100 = vmatpush2.bf16.msra.mxu1 %v7032_v0  ;;  %5522 = vmatprep.subr.bf16.mxu0 %v7037_v1  ;;  %v7080_v0 = vld [vmem:[#allocation16 + $0x300] ss:$8 sps:$4 sm:$0xff]   ;;  %v7085_v1 = vld [vmem:[#allocation16 + $0x2f4] ss:$8 sps:$4 sm:$0xff]  }
0x19fd   :  { %5565 = vmatprep.subr.bf16.mxu1 %v7040_v2  ;;  %v7088_v2 = vld [vmem:[#allocation16 + $0x3f4] ss:$8 sps:$4 sm:$0xff]  }
0x1a71   :  { %v4572_v5 = vpop.xlane.xlu0 %4571 }
0x1a72   :  { %v4576_v6 = vmul.f32 0.00390625, %v4572_v5  ;;  %v7083_v5 = vld [vmem:[#allocation16 + $0x2f0] ss:$8 sps:$4 sm:$0xff]  }
0x1a74   :  { %v4578_v10 = vadd.f32 1e-05, %v4576_v6  ;;  %v7086_v6 = vld [vmem:[#allocation16 + $0x3f0] ss:$8 sps:$4 sm:$0xff]  }
0x1a75   :  { %v4575_v47 = vpop.xlane.xlu1 %4574 }
0x1a76   :  { %7171 = vrsqrt.f32 %v4578_v10  ;;  %v4577_v25 = vmul.f32 0.00390625, %v4575_v47  ;;  %v7091_v10 = vld [vmem:[#allocation16 + $0x2e4] ss:$8 sps:$4 sm:$0xff]  }
0x1a77   :  { %v7094_v47 = vld [vmem:[#allocation16 + $0x3e4] ss:$8 sps:$4 sm:$0xff]  }
0x1a78   :  { %v4579_v12 = vadd.f32 1e-05, %v4577_v25  ;;  %v7089_v25 = vld [vmem:[#allocation16 + $0x2e0] ss:$8 sps:$4 sm:$0xff]  }
0x1a7a   :  { %7173 = vrsqrt.f32 %v4579_v12  ;;  %v7092_v12 = vld [vmem:[#allocation16 + $0x3e0] ss:$8 sps:$4 sm:$0xff]  }
0x1a83   :  { %v7172_v11 = vpop.eup %7171 }
0x1a84   :  { %v4583_v15 = vmul.f32 %v7172_v11, %v7897_v29  ;;  %v4582_v16 = vmul.f32 %v7172_v11, %v7894_v28  ;;  %v7100_v11 = vld [vmem:[#allocation16 + $0x3d4] ss:$8 sps:$4 sm:$0xff]  }
0x1a86   :  { %v4598_v24 = vmul.f32 %v4594_v20, %v4583_v15  ;;  %v4597_v31 = vmul.f32 %v4590_v17, %v4582_v16  ;;  %v7098_v15 = vld [vmem:[#allocation16 + $0x3d0] ss:$8 sps:$4 sm:$0xff]   ;;  %v7101_v16 = vld [vmem:[#allocation16 + $0x2c0] ss:$8 sps:$4 sm:$0xff]  }
0x1a87   :  { %v7174_v14 = vpop.eup %7173 }
0x1a88   :  { %v4585_v13 = vmul.f32 %v7174_v14, %v7907_v39  ;;  %v4584_v30 = vmul.f32 %v7174_v14, %v7904_v33  ;;  %v7924_v29 = vadd.f32 %v4609_v23, %v4598_v24  ;;  %v7928_v35 = vadd.f32 %v4605_v19, %v4597_v31  ;;  %v7043_v33 = vld [vmem:[#allocation16 + $0x264] ss:$8 sps:$4 sm:$0xff]   ;;  %v7104_v14 = vld [vmem:[#allocation16 + $0x3c0] ss:$8 sps:$4 sm:$0xff]   ;;  %v7110_v24 = vld [vmem:[#allocation16 + $0x3b0] ss:$8 sps:$4 sm:$0xff]  }
0x1a89   :  { %v7118_v31 = vld [vmem:[#allocation16 + $0x3a4] ss:$8 sps:$4 sm:$0xff]  }
0x1a8a   :  { %v4600_v36 = vmul.f32 %v4594_v20, %v4585_v13  ;;  %v4599_v32 = vmul.f32 %v4590_v17, %v4584_v30  ;;  %v7103_v17 = vld [vmem:[#allocation16 + $0x2c4] ss:$8 sps:$4 sm:$0xff]   ;;  %v7107_v13 = vld [vmem:[#allocation16 + $0x2b0] ss:$8 sps:$4 sm:$0xff]  }
0x1a8b   :  { %v7106_v20 = vld [vmem:[#allocation16 + $0x3c4] ss:$8 sps:$4 sm:$0xff]  }
0x1a8c   :  { %v7926_v46 = vadd.f32 %v4609_v23, %v4600_v36  ;;  %v7930_v28 = vadd.f32 %v4605_v19, %v4599_v32  ;;  %v7109_v19 = vld [vmem:[#allocation16 + $0x2b4] ss:$8 sps:$4 sm:$0xff]   ;;  %v7115_v30 = vld [vmem:[#allocation16 + $0x2a4] ss:$8 sps:$4 sm:$0xff]   ;;  %v7113_v36 = vld [vmem:[#allocation16 + $0x2a0] ss:$8 sps:$4 sm:$0xff]  }
0x1a8d   :  { %v7112_v23 = vld [vmem:[#allocation16 + $0x3b4] ss:$8 sps:$4 sm:$0xff]   ;;  %v7116_v32 = vld [vmem:[#allocation16 + $0x3a0] ss:$8 sps:$4 sm:$0xff]  }
0x1a8e   :  { %v4617_v34 = vpack.c.bf16 %v7926_v46, %v7924_v29  ;;  %v4616_v39 = vpack.c.bf16 %v7930_v28, %v7928_v35 }
0x1a90   :  { %5058 = vmatprep.mubr.bf16.mxu0 %v4617_v34  ;;  %5101 = vmatprep.mubr.bf16.mxu1 %v4617_v34  ;;  %v7121_v34 = vld [vmem:[#allocation16 + $0x294] ss:$8 sps:$4 sm:$0xff]  }
0x1a91   :  { %5059 = vmatmul.mubr.bf16.vlgmr.msra.gmra.mxu0 %v4616_v39  ;;  %5102 = vmatmul.mubr.bf16.vlgmr.msra.gmra.mxu1 %v4616_v39  ;;  %v7124_v39 = vld [vmem:[#allocation16 + $0x394] ss:$8 sps:$4 sm:$0xff]  }
0x1a92   :  { %5523 = vmatpush1.bf16.msra.mxu0 %v7035_v45  ;;  %5566 = vmatpush1.bf16.msra.mxu1 %v7038_v44  ;;  %v7119_v45 = vld [vmem:[#allocation16 + $0x290] ss:$8 sps:$4 sm:$0xff]  }
0x1a93   :  { %5524 = vmatprep.subr.bf16.mxu0 %v7043_v33  ;;  %5567 = vmatprep.subr.bf16.mxu1 %v7046_v7  ;;  %v7122_v44 = vld [vmem:[#allocation16 + $0x390] ss:$8 sps:$4 sm:$0xff]   ;;  %v7127_v33 = vld [vmem:[#allocation16 + $0x284] ss:$8 sps:$4 sm:$0xff]  }
0x1a94   :  { %v7130_v7 = vld [vmem:[#allocation16 + $0x384] ss:$8 sps:$4 sm:$0xff]  }
0x1a96   :  { %5525 = vmatpush1.bf16.msra.mxu0 %v7041_v4  ;;  %5568 = vmatpush1.bf16.msra.mxu1 %v7044_v42  ;;  %v7125_v4 = vld [vmem:[#allocation16 + $0x280] ss:$8 sps:$4 sm:$0xff]  }
0x1a97   :  { %5526 = vmatprep.subr.bf16.mxu0 %v7049_v50  ;;  %5569 = vmatprep.subr.bf16.mxu1 %v7052_v51  ;;  %v7128_v42 = vld [vmem:[#allocation16 + $0x380] ss:$8 sps:$4 sm:$0xff]   ;;  %v6098_v50 = vld [vmem:[%s7971_s9 + $0x4] sm:$0xf] }
0x1a9a   :  { %5527 = vmatpush1.bf16.msra.mxu0 %v7047_v52  ;;  %5570 = vmatpush1.bf16.msra.mxu1 %v7050_v53  ;;  %v4693_v53 = vrot.slane %v6098_v50, %v7578_v48 }
0x1a9b   :  { %5528 = vmatprep.subr.bf16.mxu0 %v7055_v8  ;;  %5571 = vmatprep.subr.bf16.mxu1 %v7058_v9  ;;  %v4701_v8 = vrot.slane %v6098_v50, %v7608_v18  ;;  %v4689_v9 = vrot.slane %v6098_v50, %v7571_v43 }
0x1a9e   :  { %5529 = vmatpush1.bf16.msra.mxu0 %v7053_v38  ;;  %5572 = vmatpush1.bf16.msra.mxu1 %v7056_v27  ;;  %v4697_v38 = vrot.slane %v6098_v50, %v7568_v41 }
0x1a9f   :  { %5530 = vmatprep.subr.bf16.mxu0 %v7061_v37  ;;  %5573 = vmatprep.subr.bf16.mxu1 %v7064_v57 }
0x1aa2   :  { %5531 = vmatpush1.bf16.msra.mxu0 %v7059_v40  ;;  %5574 = vmatpush1.bf16.msra.mxu1 %v7062_v49 }
0x1aa3   :  { %5532 = vmatprep.subr.bf16.mxu0 %v7067_v58  ;;  %5575 = vmatprep.subr.bf16.mxu1 %v7070_v26 }
0x1aa6   :  { %5533 = vmatpush1.bf16.msra.mxu0 %v7065_v22  ;;  %5576 = vmatpush1.bf16.msra.mxu1 %v7068_v21 }
0x1aa7   :  { %5534 = vmatprep.subr.bf16.mxu0 %v7073_v54  ;;  %5577 = vmatprep.subr.bf16.mxu1 %v7076_v55 }
0x1aaa   :  { %5535 = vmatpush1.bf16.msra.mxu0 %v7071_v59  ;;  %5578 = vmatpush1.bf16.msra.mxu1 %v7074_v60 }
0x1aab   :  { %5536 = vmatprep.subr.bf16.mxu0 %v7079_v61  ;;  %5579 = vmatprep.subr.bf16.mxu1 %v7082_v62 }
0x1aae   :  { %5537 = vmatpush1.bf16.msra.mxu0 %v7077_v63  ;;  %5580 = vmatpush1.bf16.msra.mxu1 %v7080_v0 }
0x1aaf   :  { %5538 = vmatprep.subr.bf16.mxu0 %v7085_v1  ;;  %5581 = vmatprep.subr.bf16.mxu1 %v7088_v2 }
0x1ab2   :  { %5539 = vmatpush2.bf16.msra.mxu0 %v7083_v5  ;;  %5582 = vmatpush2.bf16.msra.mxu1 %v7086_v6 }
0x1ab3   :  { %5540 = vmatprep.subr.bf16.mxu0 %v7091_v10  ;;  %5583 = vmatprep.subr.bf16.mxu1 %v7094_v47 }
0x1ab6   :  { %5541 = vmatpush2.bf16.msra.mxu0 %v7089_v25  ;;  %5584 = vmatpush2.bf16.msra.mxu1 %v7092_v12  ;;  %v6163_v12 = vld [vmem:[%s7973_s11 + $0x2] sm:$0x3]  ;;  %s7427_s11 = smov [#allocation20]  }
0x1ab7   :  { %5542 = vmatprep.subr.bf16.mxu0 %v7097_v56  ;;  %5585 = vmatprep.subr.bf16.mxu1 %v7100_v11  ;;  %v5195_v56 = vrot.slane %v6163_v12, %v7571_v43  ;;  %v5199_v11 = vrot.slane %v6163_v12, %v7578_v48  ;;  %s5687_s8 = sshll.u32 %s7427_s11, 4  ;;  %s5688_s8 = int_to_ptr.vmem [resolvable:$true] %s5687_s8 }
0x1ab8   :  { %s7371_s3 = scalar_lea.vmem %s5688_s8, 512  ;;  %p7376_p4 = scmp.lt.s32.totalorder %s5688_s8, %s5688_s8 }
0x1ab9   :  { %p7372_p3 = scmp.ne.s32.totalorder %s5688_s8, %s7371_s3  ;;  %p7377_p5 = scmp.lt.s32.totalorder %s7371_s3, %s7371_s3 }
0x1aba   :  { %5543 = vmatpush2.bf16.msra.mxu0 %v7095_v3  ;;  %5586 = vmatpush2.bf16.msra.mxu1 %v7098_v15 }
0x1abb   :  { %5544 = vmatprep.subr.bf16.mxu0 %v7103_v17  ;;  %5587 = vmatprep.subr.bf16.mxu1 %v7106_v20  ;;  %p7378_p6 = por %p7377_p5, %p7376_p4 }
0x1abd   :  { %p7379_p7 = pnand %p7378_p6, %p7372_p3 }
0x1abe   :  { %5545 = vmatpush2.bf16.msra.mxu0 %v7101_v16  ;;  %5588 = vmatpush2.bf16.msra.mxu1 %v7104_v14 }
0x1abf   :  { %5546 = vmatprep.subr.bf16.mxu0 %v7109_v19  ;;  %5589 = vmatprep.subr.bf16.mxu1 %v7112_v23 }
0x1ac2   :  { %5547 = vmatpush2.bf16.msra.mxu0 %v7107_v13  ;;  %5590 = vmatpush2.bf16.msra.mxu1 %v7110_v24 }
0x1ac3   :  { %5548 = vmatprep.subr.bf16.mxu0 %v7115_v30  ;;  %5591 = vmatprep.subr.bf16.mxu1 %v7118_v31 }
0x1ac6   :  { %5549 = vmatpush2.bf16.msra.mxu0 %v7113_v36  ;;  %5592 = vmatpush2.bf16.msra.mxu1 %v7116_v32 }
0x1ac7   :  { %5550 = vmatprep.subr.bf16.mxu0 %v7121_v34  ;;  %5593 = vmatprep.subr.bf16.mxu1 %v7124_v39 }
0x1aca   :  { %5551 = vmatpush2.bf16.msra.mxu0 %v7119_v45  ;;  %5594 = vmatpush2.bf16.msra.mxu1 %v7122_v44 }
0x1acb   :  { %5552 = vmatprep.subr.bf16.mxu0 %v7127_v33  ;;  %5595 = vmatprep.subr.bf16.mxu1 %v7130_v7 }
0x1ace   :  { %5553 = vmatpush2.bf16.msra.mxu0 %v7125_v4  ;;  %5596 = vmatpush2.bf16.msra.mxu1 %v7128_v42 }
0x1b51   :  { %v5060_v51 = vpop.f32.mrf.mxu0  ;;  %v5103_v52 = vpop.f32.mrf.mxu1 }
0x1b52   :  { %v5061_v21 = vadd.f32 %v5060_v51, %v4689_v9  ;;  %v5104_v54 = vadd.f32 %v5103_v52, %v4697_v38 }
0x1b53   :  { %v5062_v27 = vpop.f32.mrf.mxu0  ;;  %v5105_v37 = vpop.f32.mrf.mxu1 }
0x1b54   :  { %v5063_v49 = vadd.f32 %v5062_v27, %v4693_v53  ;;  %v5106_v58 = vadd.f32 %v5105_v37, %v4701_v8  ;;  %v5112_v2 = vmax.f32 %v5061_v21, 0.0  ;;  %v5114_v5 = vmax.f32 %v5104_v54, 0.0  ;;  %v5613_v54 = vld [vmem:[#allocation17 + $0x2] sm:$0x3] }
0x1b55   :  { %v5064_v57 = vpop.f32.mrf.mxu0  ;;  %v5107_v40 = vpop.f32.mrf.mxu1 }
0x1b56   :  { %v5065_v26 = vadd.f32 %v5064_v57, %v4689_v9  ;;  %v5108_v22 = vadd.f32 %v5107_v40, %v4697_v38  ;;  %v5113_v63 = vmax.f32 %v5063_v49, 0.0  ;;  %v5115_v0 = vmax.f32 %v5106_v58, 0.0 }
0x1b57   :  { %v5066_v55 = vpop.f32.mrf.mxu0  ;;  %v5109_v59 = vpop.f32.mrf.mxu1 }
0x1b58   :  { %v5067_v60 = vadd.f32 %v5066_v55, %v4693_v53  ;;  %v5110_v61 = vadd.f32 %v5109_v59, %v4701_v8  ;;  %v5116_v62 = vmax.f32 %v5065_v26, 0.0  ;;  %v5118_v18 = vmax.f32 %v5108_v22, 0.0  ;;  %v5615_v55 = vld [vmem:[#allocation19 + $0x2] sm:$0x3] }
0x1b59   :  { %v5652_v59 = vrot.slane %v5613_v54, %v7571_v43 }
0x1b5a   :  { %v5117_v1 = vmax.f32 %v5067_v60, 0.0  ;;  %v5119_v41 = vmax.f32 %v5110_v61, 0.0  ;;  %v5120_v47 = vpack.c.bf16 %v5116_v62, %v5112_v2  ;;  %v5122_v25 = vpack.c.bf16 %v5118_v18, %v5114_v5 }
0x1b5b   :  { %v5656_v60 = vrot.slane %v5613_v54, %v7578_v48 }
0x1b5c   :  { %v5121_v6 = vpack.c.bf16 %v5117_v1, %v5113_v63  ;;  %v5123_v10 = vpack.c.bf16 %v5119_v41, %v5115_v0  ;;  %v5667_v63 = vrot.slane %v5615_v55, %v7571_v43  ;;  %v5671_v0 = vrot.slane %v5615_v55, %v7578_v48 }
0x1b5e   :  { %5554 = vmatprep.mubr.bf16.mxu0 %v5121_v6  ;;  %5597 = vmatprep.mubr.bf16.mxu1 %v5123_v10 }
0x1b5f   :  { %5555 = vmatmul.mubr.bf16.vlgmr.msra.gmra.mxu0 %v5120_v47  ;;  %5598 = vmatmul.mubr.bf16.vlgmr.msra.gmra.mxu1 %v5122_v25 }
0x1c1f   :  { %v5556_v3 = vpop.f32.mrf.mxu0  ;;  %v5599_v15 = vpop.f32.mrf.mxu1 }
0x1c20   :  { %v5557_v17 = vadd.f32 %v5556_v3, %v5195_v56 }
0x1c21   :  { %v5558_v20 = vpop.f32.mrf.mxu0  ;;  %v5601_v16 = vpop.f32.mrf.mxu1 }
0x1c22   :  { %v5600_v14 = vadd.f32 %v5599_v15, %v5557_v17  ;;  %v5559_v19 = vadd.f32 %v5558_v20, %v5199_v11 }
0x1c23   :  { %v5560_v23 = vpop.f32.mrf.mxu0  ;;  %v5603_v13 = vpop.f32.mrf.mxu1 }
0x1c24   :  { %v5602_v24 = vadd.f32 %v5601_v16, %v5559_v19  ;;  %v5561_v30 = vadd.f32 %v5560_v23, %v5195_v56  ;;  %v5608_v36 = vadd.f32 %v5600_v14, %v7928_v35 }
0x1c25   :  { %v5562_v31 = vpop.f32.mrf.mxu0  ;;  %v5605_v45 = vpop.f32.mrf.mxu1 }
0x1c26   :  { %v5609_v32 = vadd.f32 %v5602_v24, %v7924_v29  ;;  %v5604_v34 = vadd.f32 %v5603_v13, %v5561_v30  ;;  %v5563_v39 = vadd.f32 %v5562_v31, %v5199_v11 }
0x1c28   :  { %v5606_v44 = vadd.f32 %v5605_v45, %v5563_v39  ;;  %v5616_v33 = vadd.f32 %v5609_v32, %v5608_v36  ;;  %v5610_v7 = vadd.f32 %v5604_v34, %v7930_v28 }
0x1c2a   :  { %v5611_v4 = vadd.f32 %v5606_v44, %v7926_v46  ;;  %5617 = vadd.xlane.f32.xlu0 %v5616_v33 }
0x1c2c   :  { %v5619_v42 = vadd.f32 %v5611_v4, %v5610_v7 }
0x1c2e   :  { %5620 = vadd.xlane.f32.xlu1 %v5619_v42 }
0x1cb3   :  { %v5618_v50 = vpop.xlane.xlu0 %5617 }
0x1cb4   :  { %v5622_v51 = vmul.f32 0.00390625, %v5618_v50 }
0x1cb6   :  { %v5624_v52 = vsub.f32 %v5608_v36, %v5622_v51  ;;  %v5625_v53 = vsub.f32 %v5609_v32, %v5622_v51 }
0x1cb7   :  { %v5621_v8 = vpop.xlane.xlu1 %5620 }
0x1cb8   :  { %v5623_v35 = vmul.f32 0.00390625, %v5621_v8  ;;  %v5628_v9 = vmul.f32 %v5624_v52, %v5624_v52  ;;  %v5629_v29 = vmul.f32 %v5625_v53, %v5625_v53 }
0x1cba   :  { %v5626_v38 = vsub.f32 %v5610_v7, %v5623_v35  ;;  %v5627_v27 = vsub.f32 %v5611_v4, %v5623_v35  ;;  %v5632_v37 = vadd.f32 %v5629_v29, %v5628_v9 }
0x1cbc   :  { %5633 = vadd.xlane.f32.xlu0 %v5632_v37  ;;  %v5630_v57 = vmul.f32 %v5626_v38, %v5626_v38  ;;  %v5631_v40 = vmul.f32 %v5627_v27, %v5627_v27 }
0x1cbe   :  { %v5635_v28 = vadd.f32 %v5631_v40, %v5630_v57 }
0x1cc0   :  { %5636 = vadd.xlane.f32.xlu1 %v5635_v28 }
0x1d45   :  { %v5634_v46 = vpop.xlane.xlu0 %5633 }
0x1d46   :  { %v5638_v49 = vmul.f32 0.00390625, %v5634_v46 }
0x1d48   :  { %v5640_v58 = vadd.f32 1e-05, %v5638_v49 }
0x1d49   :  { %v5637_v26 = vpop.xlane.xlu1 %5636 }
0x1d4a   :  { %7175 = vrsqrt.f32 %v5640_v58  ;;  %v5639_v22 = vmul.f32 0.00390625, %v5637_v26 }
0x1d4c   :  { %v5641_v21 = vadd.f32 1e-05, %v5639_v22 }
0x1d4e   :  { %7177 = vrsqrt.f32 %v5641_v21 }
0x1d57   :  { %v7176_v61 = vpop.eup %7175 }
0x1d58   :  { %v5644_v62 = vmul.f32 %v7176_v61, %v5624_v52  ;;  %v5645_v18 = vmul.f32 %v7176_v61, %v5625_v53 }
0x1d5a   :  { %v5659_v1 = vmul.f32 %v5652_v59, %v5644_v62  ;;  %v5660_v41 = vmul.f32 %v5656_v60, %v5645_v18 }
0x1d5b   :  { %v7178_v2 = vpop.eup %7177 }
0x1d5c   :  { %v5646_v5 = vmul.f32 %v7178_v2, %v5626_v38  ;;  %v5647_v6 = vmul.f32 %v7178_v2, %v5627_v27  ;;  %v5674_v10 = vadd.f32 %v5667_v63, %v5659_v1  ;;  %v5675_v47 = vadd.f32 %v5671_v0, %v5660_v41 }
0x1d5e   :  { %v5661_v25 = vmul.f32 %v5652_v59, %v5646_v5  ;;  %v5662_v12 = vmul.f32 %v5656_v60, %v5647_v6  ;;  %5678 = vst [vmem:[#allocation20] sm:$0xff] %v5674_v10  ;;  %5679 = vst [vmem:[#allocation20 + $0x8] sm:$0xff] %v5675_v47 }
0x1d60   :  { %v5676_v56 = vadd.f32 %v5667_v63, %v5661_v25  ;;  %v5677_v11 = vadd.f32 %v5671_v0, %v5662_v12 }
0x1d62   :  { %5680 = vst [vmem:[#allocation20 + $0x10] sm:$0xff] %v5676_v56  ;;  %5681 = vst [vmem:[#allocation20 + $0x18] sm:$0xff] %v5677_v11 }
0x1d63   :  { %7382 = shalt.err (!%p7379_p7)
}
0x1d64   :  { %5693 = dma.vmem_to_hbm [thread:$0]  %s5688_s8, 512, %s7976_s14, [#allocation7], %s7413_s15, %s7413_s15, %s7414_s16  }
0x1d65   :  { %7403 = dma.done.wait [#allocation7], 512  }
0x1d66   :  { %7404 = vsyncadd [#allocation7], 4294966784 }
0x1d67   :  { %5697 = vsyncpa [#allocation6], 1 }
0x1d68   :  { %5698 = vsyncpa [#allocation9], 1 }
0x1d69   :  { %5699 = vsyncpa [#allocation12], 1 }
0x1d6a   :  { %5700 = vsyncpa [#allocation15], 1 }
0x1d6b   :  { %5701 = vsyncpa [#allocation18], 1 }
0x1d6c   :  { %5702 = vsyncpa [#allocation7], 1 }

</bundles_post_ra>
